<compile_context>
chip_gen: v6e
topology: v6e:2x2x1
jax: 0.10.0
libtpu: 0.0.40
codegen_flags: <defaults>
</compile_context>

<pallas_src>
import jax
import jax.numpy as jnp
from jax.experimental import pallas as pl
from jax.experimental.pallas import tpu as pltpu


_VMEM_LIMIT = 32 * 1024 * 1024  # safe on v5e (128 MiB) / v6e (128 MiB) / v7x (64 MiB)


# -----------------------------------------------------------------------------
# Shared 3x3-conv body: sum of 9 shifted matmuls + folded-BN shift + leaky_relu
# -----------------------------------------------------------------------------
def _conv3x3_accum(x0_ref, x1_ref, x2_ref, w_ref, shift_ref):
    """x*_ref: (1,1,W+2,Cin) bf16 = padded rows h, h+1, h+2 of the image.
    w_ref   : (9*Cin, Cout) bf16, BN scale pre-folded; tap (di,dj) lives at
              rows (3*di+dj)*Cin : (3*di+dj+1)*Cin  (matches (3,3,Cin,Cout) reshape).
    shift_ref: (1, Cout) f32 folded BN shift.
    Returns (W, Cout) f32 = leaky_relu(conv + shift)."""
    cin = x0_ref.shape[3]
    cout = w_ref.shape[1]
    w_px = x0_ref.shape[2] - 2
    rows = (x0_ref, x1_ref, x2_ref)
    acc = jnp.zeros((w_px, cout), jnp.float32)
    for di in range(3):
        row = rows[di][0, 0]                             # (W+2, Cin) bf16
        for dj in range(3):
            a = row[dj:dj + w_px, :]                     # (W, Cin) bf16
            t = 3 * di + dj
            wk = w_ref[t * cin:(t + 1) * cin, :]         # (Cin, Cout) bf16
            acc = acc + jnp.dot(a, wk, preferred_element_type=jnp.float32)
    y = acc + shift_ref[...]
    # InPlaceABNSync default activation: leaky_relu with slope 0.01
    return jnp.where(y >= 0.0, y, 0.01 * y)


# -----------------------------------------------------------------------------
# Kernel 1: conv1 (3x3, no bias) + folded BN + leaky_relu   -> bf16 output
# -----------------------------------------------------------------------------
def _conv_bn_lrelu_kernel(x0_ref, x1_ref, x2_ref, w_ref, shift_ref, o_ref):
    y = _conv3x3_accum(x0_ref, x1_ref, x2_ref, w_ref, shift_ref)
    o_ref[0, 0] = y.astype(o_ref.dtype)


# -----------------------------------------------------------------------------
# Kernel 2: conv2 (3x3) + folded BN + leaky_relu, fused with the conv_edge head:
#   edge     = y @ W_edge + b_edge                (per-row, (W, 2) f32)
#   edge_sig = argmax over the 2 logits (ties -> 0, matching torch.argmax)
#   feat_out = y * (edge_sig + 1)
# -----------------------------------------------------------------------------
def _conv_bn_lrelu_edge_kernel(x0_ref, x1_ref, x2_ref, w_ref, shift_ref,
                               we_ref, be_ref, feat_ref, edge_ref):
    y = _conv3x3_accum(x0_ref, x1_ref, x2_ref, w_ref, shift_ref)      # (W, 256) f32
    e = jnp.dot(y, we_ref[...], preferred_element_type=jnp.float32) + be_ref[...]
    edge_ref[0, 0] = e.astype(edge_ref.dtype)
    sig = (e[:, 1:2] > e[:, 0:1]).astype(jnp.float32)                 # argmax in {0,1}
    feat_ref[0, 0] = (y * (sig + 1.0)).astype(feat_ref.dtype)


# -----------------------------------------------------------------------------
# Wrappers
# -----------------------------------------------------------------------------
def conv3x3_bn_lrelu(x, w, shift, *, out_dtype=jnp.bfloat16):
    """3x3 'same' conv (no bias) + folded-BN shift + leaky_relu(0.01), NHWC."""
    B, H, W, Cin = x.shape
    Cout = w.shape[1]
    xp = jnp.pad(x.astype(jnp.bfloat16), ((0, 0), (1, 1), (1, 1), (0, 0)))
    row0 = pl.BlockSpec((1, 1, W + 2, Cin), lambda b, h: (b, h, 0, 0))
    row1 = pl.BlockSpec((1, 1, W + 2, Cin), lambda b, h: (b, h + 1, 0, 0))
    row2 = pl.BlockSpec((1, 1, W + 2, Cin), lambda b, h: (b, h + 2, 0, 0))
    return pl.pallas_call(
        _conv_bn_lrelu_kernel,
        out_shape=jax.ShapeDtypeStruct((B, H, W, Cout), out_dtype),
        grid_spec=pltpu.PrefetchScalarGridSpec(
            num_scalar_prefetch=0,
            grid=(B, H),
            in_specs=[row0, row1, row2,
                      pl.BlockSpec((9 * Cin, Cout), lambda b, h: (0, 0)),
                      pl.BlockSpec((1, Cout), lambda b, h: (0, 0))],
            out_specs=pl.BlockSpec((1, 1, W, Cout), lambda b, h: (b, h, 0, 0)),
        ),
        compiler_params=pltpu.CompilerParams(
            dimension_semantics=("parallel", "parallel"),
            vmem_limit_bytes=_VMEM_LIMIT),
    )(xp, xp, xp, w, shift)


def conv3x3_bn_lrelu_edge(x, w, shift, w_edge, b_edge):
    """conv2 + BN + leaky_relu fused with the 1x1 conv_edge head + argmax gating."""
    B, H, W, Cin = x.shape
    Cout = w.shape[1]
    xp = jnp.pad(x.astype(jnp.bfloat16), ((0, 0), (1, 1), (1, 1), (0, 0)))
    row0 = pl.BlockSpec((1, 1, W + 2, Cin), lambda b, h: (b, h, 0, 0))
    row1 = pl.BlockSpec((1, 1, W + 2, Cin), lambda b, h: (b, h + 1, 0, 0))
    row2 = pl.BlockSpec((1, 1, W + 2, Cin), lambda b, h: (b, h + 2, 0, 0))
    return pl.pallas_call(
        _conv_bn_lrelu_edge_kernel,
        out_shape=(jax.ShapeDtypeStruct((B, H, W, Cout), jnp.float32),
                   jax.ShapeDtypeStruct((B, H, W, 2), jnp.float32)),
        grid_spec=pltpu.PrefetchScalarGridSpec(
            num_scalar_prefetch=0,
            grid=(B, H),
            in_specs=[row0, row1, row2,
                      pl.BlockSpec((9 * Cin, Cout), lambda b, h: (0, 0)),
                      pl.BlockSpec((1, Cout), lambda b, h: (0, 0)),
                      pl.BlockSpec((Cout, 2), lambda b, h: (0, 0)),
                      pl.BlockSpec((1, 2), lambda b, h: (0, 0))],
            out_specs=(pl.BlockSpec((1, 1, W, Cout), lambda b, h: (b, h, 0, 0)),
                       pl.BlockSpec((1, 1, W, 2), lambda b, h: (b, h, 0, 0))),
        ),
        compiler_params=pltpu.CompilerParams(
            dimension_semantics=("parallel", "parallel"),
            vmem_limit_bytes=_VMEM_LIMIT),
    )(xp, xp, xp, w, shift, w_edge, b_edge)


# -----------------------------------------------------------------------------
# Parameter init (deterministic, synthetic) + BN folding into weights
# -----------------------------------------------------------------------------
def _fold_bn(gamma, beta, mean, var, eps=1e-5):
    scale = gamma / jnp.sqrt(var + eps)
    shift = beta - mean * scale
    return scale, shift[None, :]


def init_params(key):
    ks = jax.random.split(key, 12)
    p = {}
    # conv1: 3x3, 256 -> 64 (no bias). (3,3,Cin,Cout) -> (9*Cin, Cout); BN scale folded in.
    w1 = jax.random.normal(ks[0], (3, 3, 256, 64), jnp.float32) * (2.0 / (9 * 256)) ** 0.5
    scale1, shift1 = _fold_bn(
        jax.random.uniform(ks[1], (64,), jnp.float32, 0.5, 1.5),
        0.1 * jax.random.normal(ks[2], (64,), jnp.float32),
        0.1 * jax.random.normal(ks[3], (64,), jnp.float32),
        jax.random.uniform(ks[4], (64,), jnp.float32, 0.5, 1.5))
    p["w1"] = (w1.reshape(9 * 256, 64) * scale1[None, :]).astype(jnp.bfloat16)
    p["shift1"] = shift1
    # conv2: 3x3, 320 -> 256 (no bias)
    w2 = jax.random.normal(ks[5], (3, 3, 320, 256), jnp.float32) * (2.0 / (9 * 320)) ** 0.5
    scale2, shift2 = _fold_bn(
        jax.random.uniform(ks[6], (256,), jnp.float32, 0.5, 1.5),
        0.1 * jax.random.normal(ks[7], (256,), jnp.float32),
        0.1 * jax.random.normal(ks[8], (256,), jnp.float32),
        jax.random.uniform(ks[9], (256,), jnp.float32, 0.5, 1.5))
    p["w2"] = (w2.reshape(9 * 320, 256) * scale2[None, :]).astype(jnp.bfloat16)
    p["shift2"] = shift2
    # conv_edge: 1x1, 256 -> 2, with bias (kept f32: its logits feed an argmax gate)
    p["w_edge"] = jax.random.normal(ks[10], (256, 2), jnp.float32) * (1.0 / 256) ** 0.5
    p["b_edge"] = 0.1 * jax.random.normal(ks[11], (1, 2), jnp.float32)
    return p


# -----------------------------------------------------------------------------
# Edge.forward
# -----------------------------------------------------------------------------
@jax.jit
def edge_forward(feat_nchw, x2_nchw, params):
    x2 = jnp.transpose(x2_nchw, (0, 2, 3, 1))      # NHWC
    feat = jnp.transpose(feat_nchw, (0, 2, 3, 1))  # NHWC

    # conv1 + InPlaceABNSync(64) -> bf16 (it only feeds conv2's bf16 MXU operand)
    x2_out = conv3x3_bn_lrelu(x2, params["w1"], params["shift1"])            # (B,H,W,64)

    # torch.cat([feat, x2], dim=1)  -> channels-last concat in bf16
    # TODO(synk): could fuse this copy into conv1's output via input_output_aliases.
    feat_cat = jnp.concatenate([feat.astype(jnp.bfloat16), x2_out], axis=-1)  # (B,H,W,320)

    # conv2 + InPlaceABNSync(256), fused with conv_edge (Dropout2d(0.1) is identity
    # at inference) and the argmax gate: feat_edge = feat_edge*argmax(edge) + feat_edge.
    # TODO(synk): training-mode channel dropout (Dropout2d) not implemented.
    feat_edge, edge = conv3x3_bn_lrelu_edge(
        feat_cat, params["w2"], params["shift2"], params["w_edge"], params["b_edge"])

    return (jnp.transpose(feat_edge, (0, 3, 1, 2)),   # NCHW (B,256,H,W)
            jnp.transpose(edge, (0, 3, 1, 2)))        # NCHW (B,2,H,W)


if __name__ == "__main__":
    key = jax.random.PRNGKey(0)
    k_feat, k_x2, k_params = jax.random.split(key, 3)

    B, H, W = 2, 8, 8
    feat = jax.random.normal(k_feat, (B, 256, H, W), jnp.float32)  # feat: 256 channels
    x2 = jax.random.normal(k_x2, (B, 256, H, W), jnp.float32)      # x2: 256 channels

    params = init_params(k_params)

    feat_edge, edge = edge_forward(feat, x2, params)
    jax.block_until_ready((feat_edge, edge))

    assert feat_edge.shape == (B, 256, H, W), feat_edge.shape
    assert edge.shape == (B, 2, H, W), edge.shape
    assert feat_edge.dtype == jnp.float32 and edge.dtype == jnp.float32
    assert bool(jnp.all(jnp.isfinite(feat_edge))) and bool(jnp.all(jnp.isfinite(edge)))
    print("KERNEL_OK")
</pallas_src>

<mosaic_0001>
module attributes {stable_mosaic.version = 11 : i64} {
  func.func @_conv_bn_lrelu_kernel(%arg0: i32, %arg1: i32, %arg2: memref<1x1x10x256xbf16, #tpu.memory_space<vmem>>, %arg3: memref<1x1x10x256xbf16, #tpu.memory_space<vmem>>, %arg4: memref<1x1x10x256xbf16, #tpu.memory_space<vmem>>, %arg5: memref<2304x64xbf16, #tpu.memory_space<vmem>>, %arg6: memref<1x64xf32, #tpu.memory_space<vmem>>, %arg7: memref<1x1x8x64xbf16, #tpu.memory_space<vmem>>) attributes {dimension_semantics = [#tpu.dimension_semantics<parallel>, #tpu.dimension_semantics<parallel>], iteration_bounds = array<i64: 2, 8>, scalar_prefetch = 0 : i64, scratch_operands = 0 : i64, tpu.core_type = #tpu.core_type<tc>, window_params = [{transform_indices = @transform_0, window_bounds = array<i64: 1, 1, 10, 256>}, {transform_indices = @transform_1, window_bounds = array<i64: 1, 1, 10, 256>}, {transform_indices = @transform_2, window_bounds = array<i64: 1, 1, 10, 256>}, {pipeline_mode = #tpu.pipeline_mode<synchronous>, transform_indices = @transform_3, window_bounds = array<i64: 2304, 64>}, {pipeline_mode = #tpu.pipeline_mode<synchronous>, transform_indices = @transform_4, window_bounds = array<i64: 1, 64>}, {transform_indices = @transform_5, window_bounds = array<i64: 1, 1, 8, 64>}]} {
    %cst = arith.constant 0.000000e+00 : f32
    %0 = vector.broadcast %cst : f32 to vector<8x64xf32>
    %c0 = arith.constant 0 : index
    %c0_0 = arith.constant 0 : index
    %c0_1 = arith.constant 0 : index
    %c0_2 = arith.constant 0 : index
    %1 = vector.load %arg2[%c0, %c0_0, %c0_1, %c0_2] : memref<1x1x10x256xbf16, #tpu.memory_space<vmem>>, vector<1x1x10x256xbf16>
    %2 = vector.shape_cast %1 : vector<1x1x10x256xbf16> to vector<10x256xbf16>
    %3 = vector.extract_strided_slice %2 {offsets = [0, 0], sizes = [8, 256], strides = [1, 1]} : vector<10x256xbf16> to vector<8x256xbf16>
    %c0_3 = arith.constant 0 : index
    %c0_4 = arith.constant 0 : index
    %4 = vector.load %arg5[%c0_3, %c0_4] : memref<2304x64xbf16, #tpu.memory_space<vmem>>, vector<256x64xbf16>
    %cst_5 = arith.constant dense<0.000000e+00> : vector<8x64xf32>
    %5 = tpu.matmul %3, %4, %cst_5 {dimension_numbers = #tpu.dot_dimension_numbers<[1], [0], [0], [1], [0, 0, 1, 1], [], []>} : vector<8x256xbf16>, vector<256x64xbf16>, vector<8x64xf32> -> vector<8x64xf32>
    %6 = arith.addf %0, %5 : vector<8x64xf32>
    %7 = vector.extract_strided_slice %2 {offsets = [1, 0], sizes = [8, 256], strides = [1, 1]} : vector<10x256xbf16> to vector<8x256xbf16>
    %c256 = arith.constant 256 : index
    %c0_6 = arith.constant 0 : index
    %8 = vector.load %arg5[%c256, %c0_6] : memref<2304x64xbf16, #tpu.memory_space<vmem>>, vector<256x64xbf16>
    %cst_7 = arith.constant dense<0.000000e+00> : vector<8x64xf32>
    %9 = tpu.matmul %7, %8, %cst_7 {dimension_numbers = #tpu.dot_dimension_numbers<[1], [0], [0], [1], [0, 0, 1, 1], [], []>} : vector<8x256xbf16>, vector<256x64xbf16>, vector<8x64xf32> -> vector<8x64xf32>
    %10 = arith.addf %6, %9 : vector<8x64xf32>
    %11 = vector.extract_strided_slice %2 {offsets = [2, 0], sizes = [8, 256], strides = [1, 1]} : vector<10x256xbf16> to vector<8x256xbf16>
    %c512 = arith.constant 512 : index
    %c0_8 = arith.constant 0 : index
    %12 = vector.load %arg5[%c512, %c0_8] : memref<2304x64xbf16, #tpu.memory_space<vmem>>, vector<256x64xbf16>
    %cst_9 = arith.constant dense<0.000000e+00> : vector<8x64xf32>
    %13 = tpu.matmul %11, %12, %cst_9 {dimension_numbers = #tpu.dot_dimension_numbers<[1], [0], [0], [1], [0, 0, 1, 1], [], []>} : vector<8x256xbf16>, vector<256x64xbf16>, vector<8x64xf32> -> vector<8x64xf32>
    %14 = arith.addf %10, %13 : vector<8x64xf32>
    %c0_10 = arith.constant 0 : index
    %c0_11 = arith.constant 0 : index
    %c0_12 = arith.constant 0 : index
    %c0_13 = arith.constant 0 : index
    %15 = vector.load %arg3[%c0_10, %c0_11, %c0_12, %c0_13] : memref<1x1x10x256xbf16, #tpu.memory_space<vmem>>, vector<1x1x10x256xbf16>
    %16 = vector.shape_cast %15 : vector<1x1x10x256xbf16> to vector<10x256xbf16>
    %17 = vector.extract_strided_slice %16 {offsets = [0, 0], sizes = [8, 256], strides = [1, 1]} : vector<10x256xbf16> to vector<8x256xbf16>
    %c768 = arith.constant 768 : index
    %c0_14 = arith.constant 0 : index
    %18 = vector.load %arg5[%c768, %c0_14] : memref<2304x64xbf16, #tpu.memory_space<vmem>>, vector<256x64xbf16>
    %cst_15 = arith.constant dense<0.000000e+00> : vector<8x64xf32>
    %19 = tpu.matmul %17, %18, %cst_15 {dimension_numbers = #tpu.dot_dimension_numbers<[1], [0], [0], [1], [0, 0, 1, 1], [], []>} : vector<8x256xbf16>, vector<256x64xbf16>, vector<8x64xf32> -> vector<8x64xf32>
    %20 = arith.addf %14, %19 : vector<8x64xf32>
    %21 = vector.extract_strided_slice %16 {offsets = [1, 0], sizes = [8, 256], strides = [1, 1]} : vector<10x256xbf16> to vector<8x256xbf16>
    %c1024 = arith.constant 1024 : index
    %c0_16 = arith.constant 0 : index
    %22 = vector.load %arg5[%c1024, %c0_16] : memref<2304x64xbf16, #tpu.memory_space<vmem>>, vector<256x64xbf16>
    %cst_17 = arith.constant dense<0.000000e+00> : vector<8x64xf32>
    %23 = tpu.matmul %21, %22, %cst_17 {dimension_numbers = #tpu.dot_dimension_numbers<[1], [0], [0], [1], [0, 0, 1, 1], [], []>} : vector<8x256xbf16>, vector<256x64xbf16>, vector<8x64xf32> -> vector<8x64xf32>
    %24 = arith.addf %20, %23 : vector<8x64xf32>
    %25 = vector.extract_strided_slice %16 {offsets = [2, 0], sizes = [8, 256], strides = [1, 1]} : vector<10x256xbf16> to vector<8x256xbf16>
    %c1280 = arith.constant 1280 : index
    %c0_18 = arith.constant 0 : index
    %26 = vector.load %arg5[%c1280, %c0_18] : memref<2304x64xbf16, #tpu.memory_space<vmem>>, vector<256x64xbf16>
    %cst_19 = arith.constant dense<0.000000e+00> : vector<8x64xf32>
    %27 = tpu.matmul %25, %26, %cst_19 {dimension_numbers = #tpu.dot_dimension_numbers<[1], [0], [0], [1], [0, 0, 1, 1], [], []>} : vector<8x256xbf16>, vector<256x64xbf16>, vector<8x64xf32> -> vector<8x64xf32>
    %28 = arith.addf %24, %27 : vector<8x64xf32>
    %c0_20 = arith.constant 0 : index
    %c0_21 = arith.constant 0 : index
    %c0_22 = arith.constant 0 : index
    %c0_23 = arith.constant 0 : index
    %29 = vector.load %arg4[%c0_20, %c0_21, %c0_22, %c0_23] : memref<1x1x10x256xbf16, #tpu.memory_space<vmem>>, vector<1x1x10x256xbf16>
    %30 = vector.shape_cast %29 : vector<1x1x10x256xbf16> to vector<10x256xbf16>
    %31 = vector.extract_strided_slice %30 {offsets = [0, 0], sizes = [8, 256], strides = [1, 1]} : vector<10x256xbf16> to vector<8x256xbf16>
    %c1536 = arith.constant 1536 : index
    %c0_24 = arith.constant 0 : index
    %32 = vector.load %arg5[%c1536, %c0_24] : memref<2304x64xbf16, #tpu.memory_space<vmem>>, vector<256x64xbf16>
    %cst_25 = arith.constant dense<0.000000e+00> : vector<8x64xf32>
    %33 = tpu.matmul %31, %32, %cst_25 {dimension_numbers = #tpu.dot_dimension_numbers<[1], [0], [0], [1], [0, 0, 1, 1], [], []>} : vector<8x256xbf16>, vector<256x64xbf16>, vector<8x64xf32> -> vector<8x64xf32>
    %34 = arith.addf %28, %33 : vector<8x64xf32>
    %35 = vector.extract_strided_slice %30 {offsets = [1, 0], sizes = [8, 256], strides = [1, 1]} : vector<10x256xbf16> to vector<8x256xbf16>
    %c1792 = arith.constant 1792 : index
    %c0_26 = arith.constant 0 : index
    %36 = vector.load %arg5[%c1792, %c0_26] : memref<2304x64xbf16, #tpu.memory_space<vmem>>, vector<256x64xbf16>
    %cst_27 = arith.constant dense<0.000000e+00> : vector<8x64xf32>
    %37 = tpu.matmul %35, %36, %cst_27 {dimension_numbers = #tpu.dot_dimension_numbers<[1], [0], [0], [1], [0, 0, 1, 1], [], []>} : vector<8x256xbf16>, vector<256x64xbf16>, vector<8x64xf32> -> vector<8x64xf32>
    %38 = arith.addf %34, %37 : vector<8x64xf32>
    %39 = vector.extract_strided_slice %30 {offsets = [2, 0], sizes = [8, 256], strides = [1, 1]} : vector<10x256xbf16> to vector<8x256xbf16>
    %c2048 = arith.constant 2048 : index
    %c0_28 = arith.constant 0 : index
    %40 = vector.load %arg5[%c2048, %c0_28] : memref<2304x64xbf16, #tpu.memory_space<vmem>>, vector<256x64xbf16>
    %cst_29 = arith.constant dense<0.000000e+00> : vector<8x64xf32>
    %41 = tpu.matmul %39, %40, %cst_29 {dimension_numbers = #tpu.dot_dimension_numbers<[1], [0], [0], [1], [0, 0, 1, 1], [], []>} : vector<8x256xbf16>, vector<256x64xbf16>, vector<8x64xf32> -> vector<8x64xf32>
    %42 = arith.addf %38, %41 : vector<8x64xf32>
    %c0_30 = arith.constant 0 : index
    %c0_31 = arith.constant 0 : index
    %43 = vector.load %arg6[%c0_30, %c0_31] : memref<1x64xf32, #tpu.memory_space<vmem>>, vector<1x64xf32>
    %44 = vector.broadcast %43 : vector<1x64xf32> to vector<8x64xf32>
    %45 = arith.addf %42, %44 : vector<8x64xf32>
    %cst_32 = arith.constant 0.000000e+00 : f32
    %46 = vector.broadcast %cst_32 : f32 to vector<8x64xf32>
    %47 = arith.cmpf oge, %45, %46 : vector<8x64xf32>
    %cst_33 = arith.constant 0.00999999977 : f32
    %48 = vector.broadcast %cst_33 : f32 to vector<8x64xf32>
    %49 = arith.mulf %48, %45 : vector<8x64xf32>
    %50 = arith.select %47, %45, %49 : vector<8x64xi1>, vector<8x64xf32>
    %51 = arith.truncf %50 : vector<8x64xf32> to vector<8x64xbf16>
    %c0_34 = arith.constant 0 : index
    %c0_35 = arith.constant 0 : index
    %c0_36 = arith.constant 0 : index
    %c0_37 = arith.constant 0 : index
    %52 = vector.load %arg7[%c0_34, %c0_35, %c0_36, %c0_37] : memref<1x1x8x64xbf16, #tpu.memory_space<vmem>>, vector<1x1x8x64xbf16>
    %53 = vector.shape_cast %52 : vector<1x1x8x64xbf16> to vector<8x64xbf16>
    %54 = vector.shape_cast %51 : vector<8x64xbf16> to vector<1x1x8x64xbf16>
    tpu.vector_store %arg7[%c0_34, %c0_35, %c0_36, %c0_37], %54 {strides = array<i32>} : memref<1x1x8x64xbf16, #tpu.memory_space<vmem>>, vector<1x1x8x64xbf16>,
    return
  }
  func.func @transform_0(%arg0: i32, %arg1: i32) -> (i32, i32, i32, i32) {
    %c0_i32 = arith.constant 0 : i32
    %c0_i32_0 = arith.constant 0 : i32
    %c0_i32_1 = arith.constant 0 : i32
    return %arg0, %arg1, %c0_i32, %c0_i32_0 : i32, i32, i32, i32
  }
  func.func @transform_1(%arg0: i32, %arg1: i32) -> (i32, i32, i32, i32) {
    %c1_i32 = arith.constant 1 : i32
    %0 = arith.addi %arg1, %c1_i32 : i32
    %c0_i32 = arith.constant 0 : i32
    %c0_i32_0 = arith.constant 0 : i32
    %c0_i32_1 = arith.constant 0 : i32
    return %arg0, %0, %c0_i32, %c0_i32_0 : i32, i32, i32, i32
  }
  func.func @transform_2(%arg0: i32, %arg1: i32) -> (i32, i32, i32, i32) {
    %c2_i32 = arith.constant 2 : i32
    %0 = arith.addi %arg1, %c2_i32 : i32
    %c0_i32 = arith.constant 0 : i32
    %c0_i32_0 = arith.constant 0 : i32
    %c0_i32_1 = arith.constant 0 : i32
    return %arg0, %0, %c0_i32, %c0_i32_0 : i32, i32, i32, i32
  }
  func.func @transform_3(%arg0: i32, %arg1: i32) -> (i32, i32) {
    %c0_i32 = arith.constant 0 : i32
    %c0_i32_0 = arith.constant 0 : i32
    %c0_i32_1 = arith.constant 0 : i32
    return %c0_i32, %c0_i32_0 : i32, i32
  }
  func.func @transform_4(%arg0: i32, %arg1: i32) -> (i32, i32) {
    %c0_i32 = arith.constant 0 : i32
    %c0_i32_0 = arith.constant 0 : i32
    %c0_i32_1 = arith.constant 0 : i32
    return %c0_i32, %c0_i32_0 : i32, i32
  }
  func.func @transform_5(%arg0: i32, %arg1: i32) -> (i32, i32, i32, i32) {
    %c0_i32 = arith.constant 0 : i32
    %c0_i32_0 = arith.constant 0 : i32
    %c0_i32_1 = arith.constant 0 : i32
    return %arg0, %arg1, %c0_i32, %c0_i32_0 : i32, i32, i32, i32
  }
}

module attributes {stable_mosaic.version = 11 : i64} {
  func.func @_conv_bn_lrelu_edge_kernel(%arg0: i32, %arg1: i32, %arg2: memref<1x1x10x320xbf16, #tpu.memory_space<vmem>>, %arg3: memref<1x1x10x320xbf16, #tpu.memory_space<vmem>>, %arg4: memref<1x1x10x320xbf16, #tpu.memory_space<vmem>>, %arg5: memref<2880x256xbf16, #tpu.memory_space<vmem>>, %arg6: memref<1x256xf32, #tpu.memory_space<vmem>>, %arg7: memref<256x2xf32, #tpu.memory_space<vmem>>, %arg8: memref<1x2xf32, #tpu.memory_space<vmem>>, %arg9: memref<1x1x8x256xf32, #tpu.memory_space<vmem>>, %arg10: memref<1x1x8x2xf32, #tpu.memory_space<vmem>>) attributes {dimension_semantics = [#tpu.dimension_semantics<parallel>, #tpu.dimension_semantics<parallel>], iteration_bounds = array<i64: 2, 8>, scalar_prefetch = 0 : i64, scratch_operands = 0 : i64, tpu.core_type = #tpu.core_type<tc>, window_params = [{transform_indices = @transform_0, window_bounds = array<i64: 1, 1, 10, 320>}, {transform_indices = @transform_1, window_bounds = array<i64: 1, 1, 10, 320>}, {transform_indices = @transform_2, window_bounds = array<i64: 1, 1, 10, 320>}, {pipeline_mode = #tpu.pipeline_mode<synchronous>, transform_indices = @transform_3, window_bounds = array<i64: 2880, 256>}, {pipeline_mode = #tpu.pipeline_mode<synchronous>, transform_indices = @transform_4, window_bounds = array<i64: 1, 256>}, {pipeline_mode = #tpu.pipeline_mode<synchronous>, transform_indices = @transform_5, window_bounds = array<i64: 256, 2>}, {pipeline_mode = #tpu.pipeline_mode<synchronous>, transform_indices = @transform_6, window_bounds = array<i64: 1, 2>}, {transform_indices = @transform_7, window_bounds = array<i64: 1, 1, 8, 256>}, {transform_indices = @transform_8, window_bounds = array<i64: 1, 1, 8, 2>}]} {
    %cst = arith.constant 0.000000e+00 : f32
    %0 = vector.broadcast %cst : f32 to vector<8x256xf32>
    %c0 = arith.constant 0 : index
    %c0_0 = arith.constant 0 : index
    %c0_1 = arith.constant 0 : index
    %c0_2 = arith.constant 0 : index
    %1 = vector.load %arg2[%c0, %c0_0, %c0_1, %c0_2] : memref<1x1x10x320xbf16, #tpu.memory_space<vmem>>, vector<1x1x10x320xbf16>
    %2 = vector.shape_cast %1 : vector<1x1x10x320xbf16> to vector<10x320xbf16>
    %3 = vector.extract_strided_slice %2 {offsets = [0, 0], sizes = [8, 320], strides = [1, 1]} : vector<10x320xbf16> to vector<8x320xbf16>
    %c0_3 = arith.constant 0 : index
    %c0_4 = arith.constant 0 : index
    %4 = vector.load %arg5[%c0_3, %c0_4] : memref<2880x256xbf16, #tpu.memory_space<vmem>>, vector<320x256xbf16>
    %cst_5 = arith.constant dense<0.000000e+00> : vector<8x256xf32>
    %5 = tpu.matmul %3, %4, %cst_5 {dimension_numbers = #tpu.dot_dimension_numbers<[1], [0], [0], [1], [0, 0, 1, 1], [], []>} : vector<8x320xbf16>, vector<320x256xbf16>, vector<8x256xf32> -> vector<8x256xf32>
    %6 = arith.addf %0, %5 : vector<8x256xf32>
    %7 = vector.extract_strided_slice %2 {offsets = [1, 0], sizes = [8, 320], strides = [1, 1]} : vector<10x320xbf16> to vector<8x320xbf16>
    %c320 = arith.constant 320 : index
    %c0_6 = arith.constant 0 : index
    %8 = vector.load %arg5[%c320, %c0_6] : memref<2880x256xbf16, #tpu.memory_space<vmem>>, vector<320x256xbf16>
    %cst_7 = arith.constant dense<0.000000e+00> : vector<8x256xf32>
    %9 = tpu.matmul %7, %8, %cst_7 {dimension_numbers = #tpu.dot_dimension_numbers<[1], [0], [0], [1], [0, 0, 1, 1], [], []>} : vector<8x320xbf16>, vector<320x256xbf16>, vector<8x256xf32> -> vector<8x256xf32>
    %10 = arith.addf %6, %9 : vector<8x256xf32>
    %11 = vector.extract_strided_slice %2 {offsets = [2, 0], sizes = [8, 320], strides = [1, 1]} : vector<10x320xbf16> to vector<8x320xbf16>
    %c640 = arith.constant 640 : index
    %c0_8 = arith.constant 0 : index
    %12 = vector.load %arg5[%c640, %c0_8] : memref<2880x256xbf16, #tpu.memory_space<vmem>>, vector<320x256xbf16>
    %cst_9 = arith.constant dense<0.000000e+00> : vector<8x256xf32>
    %13 = tpu.matmul %11, %12, %cst_9 {dimension_numbers = #tpu.dot_dimension_numbers<[1], [0], [0], [1], [0, 0, 1, 1], [], []>} : vector<8x320xbf16>, vector<320x256xbf16>, vector<8x256xf32> -> vector<8x256xf32>
    %14 = arith.addf %10, %13 : vector<8x256xf32>
    %c0_10 = arith.constant 0 : index
    %c0_11 = arith.constant 0 : index
    %c0_12 = arith.constant 0 : index
    %c0_13 = arith.constant 0 : index
    %15 = vector.load %arg3[%c0_10, %c0_11, %c0_12, %c0_13] : memref<1x1x10x320xbf16, #tpu.memory_space<vmem>>, vector<1x1x10x320xbf16>
    %16 = vector.shape_cast %15 : vector<1x1x10x320xbf16> to vector<10x320xbf16>
    %17 = vector.extract_strided_slice %16 {offsets = [0, 0], sizes = [8, 320], strides = [1, 1]} : vector<10x320xbf16> to vector<8x320xbf16>
    %c960 = arith.constant 960 : index
    %c0_14 = arith.constant 0 : index
    %18 = vector.load %arg5[%c960, %c0_14] : memref<2880x256xbf16, #tpu.memory_space<vmem>>, vector<320x256xbf16>
    %cst_15 = arith.constant dense<0.000000e+00> : vector<8x256xf32>
    %19 = tpu.matmul %17, %18, %cst_15 {dimension_numbers = #tpu.dot_dimension_numbers<[1], [0], [0], [1], [0, 0, 1, 1], [], []>} : vector<8x320xbf16>, vector<320x256xbf16>, vector<8x256xf32> -> vector<8x256xf32>
    %20 = arith.addf %14, %19 : vector<8x256xf32>
    %21 = vector.extract_strided_slice %16 {offsets = [1, 0], sizes = [8, 320], strides = [1, 1]} : vector<10x320xbf16> to vector<8x320xbf16>
    %c1280 = arith.constant 1280 : index
    %c0_16 = arith.constant 0 : index
    %22 = vector.load %arg5[%c1280, %c0_16] : memref<2880x256xbf16, #tpu.memory_space<vmem>>, vector<320x256xbf16>
    %cst_17 = arith.constant dense<0.000000e+00> : vector<8x256xf32>
    %23 = tpu.matmul %21, %22, %cst_17 {dimension_numbers = #tpu.dot_dimension_numbers<[1], [0], [0], [1], [0, 0, 1, 1], [], []>} : vector<8x320xbf16>, vector<320x256xbf16>, vector<8x256xf32> -> vector<8x256xf32>
    %24 = arith.addf %20, %23 : vector<8x256xf32>
    %25 = vector.extract_strided_slice %16 {offsets = [2, 0], sizes = [8, 320], strides = [1, 1]} : vector<10x320xbf16> to vector<8x320xbf16>
    %c1600 = arith.constant 1600 : index
    %c0_18 = arith.constant 0 : index
    %26 = vector.load %arg5[%c1600, %c0_18] : memref<2880x256xbf16, #tpu.memory_space<vmem>>, vector<320x256xbf16>
    %cst_19 = arith.constant dense<0.000000e+00> : vector<8x256xf32>
    %27 = tpu.matmul %25, %26, %cst_19 {dimension_numbers = #tpu.dot_dimension_numbers<[1], [0], [0], [1], [0, 0, 1, 1], [], []>} : vector<8x320xbf16>, vector<320x256xbf16>, vector<8x256xf32> -> vector<8x256xf32>
    %28 = arith.addf %24, %27 : vector<8x256xf32>
    %c0_20 = arith.constant 0 : index
    %c0_21 = arith.constant 0 : index
    %c0_22 = arith.constant 0 : index
    %c0_23 = arith.constant 0 : index
    %29 = vector.load %arg4[%c0_20, %c0_21, %c0_22, %c0_23] : memref<1x1x10x320xbf16, #tpu.memory_space<vmem>>, vector<1x1x10x320xbf16>
    %30 = vector.shape_cast %29 : vector<1x1x10x320xbf16> to vector<10x320xbf16>
    %31 = vector.extract_strided_slice %30 {offsets = [0, 0], sizes = [8, 320], strides = [1, 1]} : vector<10x320xbf16> to vector<8x320xbf16>
    %c1920 = arith.constant 1920 : index
    %c0_24 = arith.constant 0 : index
    %32 = vector.load %arg5[%c1920, %c0_24] : memref<2880x256xbf16, #tpu.memory_space<vmem>>, vector<320x256xbf16>
    %cst_25 = arith.constant dense<0.000000e+00> : vector<8x256xf32>
    %33 = tpu.matmul %31, %32, %cst_25 {dimension_numbers = #tpu.dot_dimension_numbers<[1], [0], [0], [1], [0, 0, 1, 1], [], []>} : vector<8x320xbf16>, vector<320x256xbf16>, vector<8x256xf32> -> vector<8x256xf32>
    %34 = arith.addf %28, %33 : vector<8x256xf32>
    %35 = vector.extract_strided_slice %30 {offsets = [1, 0], sizes = [8, 320], strides = [1, 1]} : vector<10x320xbf16> to vector<8x320xbf16>
    %c2240 = arith.constant 2240 : index
    %c0_26 = arith.constant 0 : index
    %36 = vector.load %arg5[%c2240, %c0_26] : memref<2880x256xbf16, #tpu.memory_space<vmem>>, vector<320x256xbf16>
    %cst_27 = arith.constant dense<0.000000e+00> : vector<8x256xf32>
    %37 = tpu.matmul %35, %36, %cst_27 {dimension_numbers = #tpu.dot_dimension_numbers<[1], [0], [0], [1], [0, 0, 1, 1], [], []>} : vector<8x320xbf16>, vector<320x256xbf16>, vector<8x256xf32> -> vector<8x256xf32>
    %38 = arith.addf %34, %37 : vector<8x256xf32>
    %39 = vector.extract_strided_slice %30 {offsets = [2, 0], sizes = [8, 320], strides = [1, 1]} : vector<10x320xbf16> to vector<8x320xbf16>
    %c2560 = arith.constant 2560 : index
    %c0_28 = arith.constant 0 : index
    %40 = vector.load %arg5[%c2560, %c0_28] : memref<2880x256xbf16, #tpu.memory_space<vmem>>, vector<320x256xbf16>
    %cst_29 = arith.constant dense<0.000000e+00> : vector<8x256xf32>
    %41 = tpu.matmul %39, %40, %cst_29 {dimension_numbers = #tpu.dot_dimension_numbers<[1], [0], [0], [1], [0, 0, 1, 1], [], []>} : vector<8x320xbf16>, vector<320x256xbf16>, vector<8x256xf32> -> vector<8x256xf32>
    %42 = arith.addf %38, %41 : vector<8x256xf32>
    %c0_30 = arith.constant 0 : index
    %c0_31 = arith.constant 0 : index
    %43 = vector.load %arg6[%c0_30, %c0_31] : memref<1x256xf32, #tpu.memory_space<vmem>>, vector<1x256xf32>
    %44 = vector.broadcast %43 : vector<1x256xf32> to vector<8x256xf32>
    %45 = arith.addf %42, %44 : vector<8x256xf32>
    %cst_32 = arith.constant 0.000000e+00 : f32
    %46 = vector.broadcast %cst_32 : f32 to vector<8x256xf32>
    %47 = arith.cmpf oge, %45, %46 : vector<8x256xf32>
    %cst_33 = arith.constant 0.00999999977 : f32
    %48 = vector.broadcast %cst_33 : f32 to vector<8x256xf32>
    %49 = arith.mulf %48, %45 : vector<8x256xf32>
    %50 = arith.select %47, %45, %49 : vector<8x256xi1>, vector<8x256xf32>
    %c0_34 = arith.constant 0 : index
    %c0_35 = arith.constant 0 : index
    %51 = vector.load %arg7[%c0_34, %c0_35] : memref<256x2xf32, #tpu.memory_space<vmem>>, vector<256x2xf32>
    %cst_36 = arith.constant dense<0.000000e+00> : vector<8x2xf32>
    %52 = tpu.matmul %50, %51, %cst_36 {dimension_numbers = #tpu.dot_dimension_numbers<[1], [0], [0], [1], [0, 0, 1, 1], [], []>} : vector<8x256xf32>, vector<256x2xf32>, vector<8x2xf32> -> vector<8x2xf32>
    %c0_37 = arith.constant 0 : index
    %c0_38 = arith.constant 0 : index
    %53 = vector.load %arg8[%c0_37, %c0_38] : memref<1x2xf32, #tpu.memory_space<vmem>>, vector<1x2xf32>
    %54 = vector.broadcast %53 : vector<1x2xf32> to vector<8x2xf32>
    %55 = arith.addf %52, %54 : vector<8x2xf32>
    %c0_39 = arith.constant 0 : index
    %c0_40 = arith.constant 0 : index
    %c0_41 = arith.constant 0 : index
    %c0_42 = arith.constant 0 : index
    %56 = vector.load %arg10[%c0_39, %c0_40, %c0_41, %c0_42] : memref<1x1x8x2xf32, #tpu.memory_space<vmem>>, vector<1x1x8x2xf32>
    %57 = vector.shape_cast %56 : vector<1x1x8x2xf32> to vector<8x2xf32>
    %58 = vector.shape_cast %55 : vector<8x2xf32> to vector<1x1x8x2xf32>
    tpu.vector_store %arg10[%c0_39, %c0_40, %c0_41, %c0_42], %58 {strides = array<i32>} : memref<1x1x8x2xf32, #tpu.memory_space<vmem>>, vector<1x1x8x2xf32>,
    %59 = vector.extract_strided_slice %55 {offsets = [0, 1], sizes = [8, 1], strides = [1, 1]} : vector<8x2xf32> to vector<8x1xf32>
    %60 = vector.extract_strided_slice %55 {offsets = [0, 0], sizes = [8, 1], strides = [1, 1]} : vector<8x2xf32> to vector<8x1xf32>
    %61 = arith.cmpf ogt, %59, %60 : vector<8x1xf32>
    %62 = arith.extui %61 : vector<8x1xi1> to vector<8x1xi32>
    %63 = arith.sitofp %62 : vector<8x1xi32> to vector<8x1xf32>
    %cst_43 = arith.constant 1.000000e+00 : f32
    %64 = vector.broadcast %cst_43 : f32 to vector<8x1xf32>
    %65 = arith.addf %63, %64 : vector<8x1xf32>
    %66 = vector.broadcast %65 : vector<8x1xf32> to vector<8x256xf32>
    %67 = arith.mulf %50, %66 : vector<8x256xf32>
    %c0_44 = arith.constant 0 : index
    %c0_45 = arith.constant 0 : index
    %c0_46 = arith.constant 0 : index
    %c0_47 = arith.constant 0 : index
    %68 = vector.load %arg9[%c0_44, %c0_45, %c0_46, %c0_47] : memref<1x1x8x256xf32, #tpu.memory_space<vmem>>, vector<1x1x8x256xf32>
    %69 = vector.shape_cast %68 : vector<1x1x8x256xf32> to vector<8x256xf32>
    %70 = vector.shape_cast %67 : vector<8x256xf32> to vector<1x1x8x256xf32>
    tpu.vector_store %arg9[%c0_44, %c0_45, %c0_46, %c0_47], %70 {strides = array<i32>} : memref<1x1x8x256xf32, #tpu.memory_space<vmem>>, vector<1x1x8x256xf32>,
    return
  }
  func.func @transform_0(%arg0: i32, %arg1: i32) -> (i32, i32, i32, i32) {
    %c0_i32 = arith.constant 0 : i32
    %c0_i32_0 = arith.constant 0 : i32
    %c0_i32_1 = arith.constant 0 : i32
    return %arg0, %arg1, %c0_i32, %c0_i32_0 : i32, i32, i32, i32
  }
  func.func @transform_1(%arg0: i32, %arg1: i32) -> (i32, i32, i32, i32) {
    %c1_i32 = arith.constant 1 : i32
    %0 = arith.addi %arg1, %c1_i32 : i32
    %c0_i32 = arith.constant 0 : i32
    %c0_i32_0 = arith.constant 0 : i32
    %c0_i32_1 = arith.constant 0 : i32
    return %arg0, %0, %c0_i32, %c0_i32_0 : i32, i32, i32, i32
  }
  func.func @transform_2(%arg0: i32, %arg1: i32) -> (i32, i32, i32, i32) {
    %c2_i32 = arith.constant 2 : i32
    %0 = arith.addi %arg1, %c2_i32 : i32
    %c0_i32 = arith.constant 0 : i32
    %c0_i32_0 = arith.constant 0 : i32
    %c0_i32_1 = arith.constant 0 : i32
    return %arg0, %0, %c0_i32, %c0_i32_0 : i32, i32, i32, i32
  }
  func.func @transform_3(%arg0: i32, %arg1: i32) -> (i32, i32) {
    %c0_i32 = arith.constant 0 : i32
    %c0_i32_0 = arith.constant 0 : i32
    %c0_i32_1 = arith.constant 0 : i32
    return %c0_i32, %c0_i32_0 : i32, i32
  }
  func.func @transform_4(%arg0: i32, %arg1: i32) -> (i32, i32) {
    %c0_i32 = arith.constant 0 : i32
    %c0_i32_0 = arith.constant 0 : i32
    %c0_i32_1 = arith.constant 0 : i32
    return %c0_i32, %c0_i32_0 : i32, i32
  }
  func.func @transform_5(%arg0: i32, %arg1: i32) -> (i32, i32) {
    %c0_i32 = arith.constant 0 : i32
    %c0_i32_0 = arith.constant 0 : i32
    %c0_i32_1 = arith.constant 0 : i32
    return %c0_i32, %c0_i32_0 : i32, i32
  }
  func.func @transform_6(%arg0: i32, %arg1: i32) -> (i32, i32) {
    %c0_i32 = arith.constant 0 : i32
    %c0_i32_0 = arith.constant 0 : i32
    %c0_i32_1 = arith.constant 0 : i32
    return %c0_i32, %c0_i32_0 : i32, i32
  }
  func.func @transform_7(%arg0: i32, %arg1: i32) -> (i32, i32, i32, i32) {
    %c0_i32 = arith.constant 0 : i32
    %c0_i32_0 = arith.constant 0 : i32
    %c0_i32_1 = arith.constant 0 : i32
    return %arg0, %arg1, %c0_i32, %c0_i32_0 : i32, i32, i32, i32
  }
  func.func @transform_8(%arg0: i32, %arg1: i32) -> (i32, i32, i32, i32) {
    %c0_i32 = arith.constant 0 : i32
    %c0_i32_0 = arith.constant 0 : i32
    %c0_i32_1 = arith.constant 0 : i32
    return %arg0, %arg1, %c0_i32, %c0_i32_0 : i32, i32, i32, i32
  }
}

</mosaic_0001>

<bundles_post_ra>
// kernel: edge_forward.2
= control target key start
LH: loop header
LB: loop body
LE: loop exit
PB: predicated region body
PF: predicated region fallthrough
CT: control target
= control target key end

     0   :  { %10 = vsyncpa [#allocation3], 0  ;;  %s2815_s18 = smov 0   ;;  %s2817_s19 = smov 0   ;;  %s3352_s0 = inlined_call_operand.vmem [shape: bf16[2,10,10,256], index: 0, kind: input, shape index: {}, may-alias: {0,1,2}]   ;;  %s3353_s1 = inlined_call_operand.vmem [shape: bf16[2,10,10,256], index: 1, kind: input, shape index: {}, may-alias: {0,1,2}]   ;;  %s3354_s2 = inlined_call_operand.vmem [shape: bf16[2,10,10,256], index: 2, kind: input, shape index: {}, may-alias: {0,1,2}]   ;;  %s3355_s3 = inlined_call_operand.vmem [shape: bf16[2304,64], index: 3, kind: input, shape index: {}]   ;;  %s3356_s4 = inlined_call_operand.hbm [shape: f32[1,64], index: 4, kind: input, shape index: {}]   ;;  %s3357_s5 = inlined_call_operand.vmem [shape: bf16[2,8,8,64], index: 5, kind: output, shape index: {}]  }
   0x1   :  { %s2819_s20 = smov 0   ;;  %s2821_s21 = smov 0  }
   0x2   :  { %s2823_s22 = smov 0  }
   0x3 LB: > { %s2134_s23 = sadd.s32 4294967295, %s2782_s22   ;;  %s25_s24 = sadd.s32 1, %s2774_s20  ;;  %s2782_s22 = sphi %s2823_s22, %s16_s22   ;;  %s2778_s21 = sphi %s2821_s21, %s3363_s21   ;;  %s2774_s20 = sphi %s2819_s20, %s3362_s20   ;;  %s2770_s19 = sphi %s2817_s19, %s3361_s19   ;;  %s2766_s18 = sphi %s2815_s18, %s3360_s18  }
   0x4   : > { %p26_p0 = scmp.ge.s32.totalorder %s25_s24, 8  ;;  %s28_s25 = sadd.s32 1, %s2778_s21 }
   0x5   : > { %p2136_p1 = scmp.ge.s32.totalorder %s2782_s22, 1  ;;  %p191_p2 = scmp.lt.s32.totalorder %s2782_s22, 17 }
   0x6   : > { %s3365_s24 = smov (%p26_p0, %s25_s24), 0  ;;  %s3367_s25 = smov (!%p26_p0, %s28_s25), %s2778_s21 }
   0x7   : > { %p2848_p3 = pnand %p2136_p1, %p191_p2  ;;  %p30_p4 = scmp.ge.s32.totalorder %s3367_s25, 2 }
   0x8   : > { %p2852_p5 = scmp.eq.s32.totalorder %s2134_s23, 0  ;;  %s2784_s28 = smov [#allocation2]  }
   0x9   : > { %p2511_p6 = pneg %p2848_p3  ;;  %s3369_s25 = smov (%p30_p4, %s3367_s25), 0 }
   0xa   : > { %s207_s29 = sshll.u32 %s2784_s28, 4  ;;  %s208_s29 = int_to_ptr.vmem [resolvable:$true] %s207_s29 }
   0xb   : > { %p2512_p7 = pnand %p2852_p5, %p2511_p6  ;;  %s2725_s30 = scalar_lea.vmem %s208_s29, 16 }
   0xc   : > { %p2726_p9 = scmp.ne.s32.totalorder %s208_s29, %s2725_s30  ;;  %s2732_s6 = scalar_lea.vmem %s208_s29, 32 }
   0xd   : > { %p2716_p8 = pneg %p2512_p7  ;;  %p2733_p12 = scmp.lt.s32.totalorder %s208_s29, %s208_s29 }
   0xe   : > { %p2734_p13 = scmp.lt.s32.totalorder %s2732_s6, %s2725_s30 }
   0xf   : > { %p2728_p10 = pnand %p2726_p9, %p2716_p8 }
  0x10   : > { %p2735_p0 = por %p2734_p13, %p2733_p12 }
  0x11   : > { %p2729_p11 = pneg %p2728_p10 }
  0x13   : > { %p2736_p1 = pnand %p2735_p0, %p2729_p11 }
  0x15   : > { %2739 = shalt.err (!%p2736_p1)
}
  0x16   : > { %2514 = dma.hbm_to_vmem [thread:$0]  (!%p2512_p7), %s3356_s4, 16, %s208_s29, [#allocation3]  }
  0x17   : > { %260 = sbr.rel (%p2848_p3) target bundleno = 398 (0x18e), region = 40 }
  0x1c   : > { %2761 = dma.done.wait (%p2852_p5), [#allocation3], 16  }
  0x1d   : > { %2763 = vsyncadd (%p2852_p5), [#allocation3], 4294967280  ;;  %v2558_v0 = vld [vmem:[%s3355_s3 + $0xf8] sm:$0xff]   ;;  %v2562_v4 = vld [vmem:[%s3355_s3 + $0xf0] sm:$0xff]   ;;  %p315_p2 = scmp.lt.s32.totalorder %s2770_s19, 1  ;;  %p317_p3 = scmp.lt.s32.totalorder %s2766_s18, 9 }
  0x1e   : > { %v2559_v1 = vld [vmem:[%s3355_s3 + $0x78] sm:$0xff]   ;;  %2308 = vmatprep.subr.bf16.mxu0 %v2558_v0  ;;  %v2563_v5 = vld [vmem:[%s3355_s3 + $0x70] sm:$0xff]   ;;  %v2566_v8 = vld [vmem:[%s3355_s3 + $0xe8] sm:$0xff]   ;;  %s324_s11 = sadd.s32 1, %s2766_s18  ;;  %p348_p6 = scmp.lt.s32.totalorder %s2766_s18, 7  ;;  %vm1988_vm1 = vcmask 519168  }
  0x1f   : > { %v2560_v2 = vld [vmem:[%s3355_s3 + $0xb8] sm:$0xff]   ;;  %2330 = vmatprep.subr.bf16.mxu1 %v2559_v1  ;;  %v2564_v6 = vld [vmem:[%s3355_s3 + $0xb0] sm:$0xff]   ;;  %v2567_v9 = vld [vmem:[%s3355_s3 + $0x68] sm:$0xff]   ;;  %s3371_s19 = smov (!%p315_p2, %s2770_s19), 1  ;;  %p327_p4 = scmp.lt.s32.totalorder %s324_s11, 9 }
  0x20   : > { %v2561_v3 = vld [vmem:[%s3355_s3 + $0x38] sm:$0xff]   ;;  %2309 = vmatpush3.bf16.msra.mxu0 %v2560_v2  ;;  %v2565_v7 = vld [vmem:[%s3355_s3 + $0x30] sm:$0xff]   ;;  %v2568_v10 = vld [vmem:[%s3355_s3 + $0xa8] sm:$0xff]   ;;  %s318_s7 = scalar_select %p317_p3, %s2766_s18, 9 }
  0x21   : > { %2331 = vmatpush3.bf16.msra.mxu1 %v2561_v3  ;;  %2310 = vmatprep.subr.bf16.mxu0 %v2562_v4  ;;  %v2569_v11 = vld [vmem:[%s3355_s3 + $0x28] sm:$0xff]   ;;  %v2570_v12 = vld [vmem:[%s3355_s3 + $0xe0] sm:$0xff]   ;;  %v2574_v16 = vld [vmem:[%s3355_s3 + $0xd8] sm:$0xff]   ;;  %s2938_s14 = smul.u32 40, %s3371_s19  ;;  %s3373_s11 = smov (!%p327_p4, %s324_s11), 9 }
  0x22   : > { %2332 = vmatprep.subr.bf16.mxu1 %v2563_v5  ;;  %v2571_v13 = vld [vmem:[%s3355_s3 + $0x60] sm:$0xff]   ;;  %v2575_v17 = vld [vmem:[%s3355_s3 + $0x58] sm:$0xff]   ;;  %v2578_v20 = vld [vmem:[%s3355_s3 + $0xd0] sm:$0xff]   ;;  %s2141_s17 = sshll.u32 %s318_s7, 2  ;;  %s2143_s26 = sshll.u32 %s3373_s11, 2 }
  0x23   : > { %v2572_v14 = vld [vmem:[%s3355_s3 + $0xa0] sm:$0xff]   ;;  %v2576_v18 = vld [vmem:[%s3355_s3 + $0x98] sm:$0xff]   ;;  %v2579_v21 = vld [vmem:[%s3355_s3 + $0x50] sm:$0xff]   ;;  %s321_s6 = sadd.s32 %s2938_s14, %s2141_s17  ;;  %s331_s9 = sadd.s32 %s2938_s14, %s2143_s26 }
  0x24   : > { %2311 = vmatpush3.bf16.msra.mxu0 %v2564_v6  ;;  %v2573_v15 = vld [vmem:[%s3355_s3 + $0x20] sm:$0xff]   ;;  %v2577_v19 = vld [vmem:[%s3355_s3 + $0x18] sm:$0xff]   ;;  %v2580_v22 = vld [vmem:[%s3355_s3 + $0x90] sm:$0xff]   ;;  %s2142_s13 = sshll.u32 %s321_s6, 2  ;;  %s2144_s16 = sshll.u32 %s331_s9, 2 }
  0x25   : > { %2333 = vmatpush3.bf16.msra.mxu1 %v2565_v7  ;;  %2312 = vmatprep.subr.bf16.mxu0 %v2566_v8  ;;  %v2581_v23 = vld [vmem:[%s3355_s3 + $0x10] sm:$0xff]   ;;  %v2582_v24 = vld [vmem:[%s3355_s3 + $0xc8] sm:$0xff]   ;;  %v2586_v28 = vld [vmem:[%s3355_s3 + $0xc0] sm:$0xff]   ;;  %s323_s30 = scalar_lea.vmem %s3352_s0, %s2142_s13  ;;  %s333_s8 = scalar_lea.vmem %s3353_s1, %s2144_s16 }
  0x26   : > { %2334 = vmatprep.subr.bf16.mxu1 %v2567_v9  ;;  %v2583_v25 = vld [vmem:[%s3355_s3 + $0x48] sm:$0xff]   ;;  %v2587_v29 = vld [vmem:[%s3355_s3 + $0x40] sm:$0xff]   ;;  %v2594_v38 = vld [vmem:[%s3355_s3 + $0x178] sm:$0xff]   ;;  %s335_s7 = sadd.s32 2, %s2766_s18  ;;  %s3377_s18 = smov (!%p348_p6, %s2766_s18), 7 }
  0x27   : > { %v2584_v26 = vld [vmem:[%s3355_s3 + $0x88] sm:$0xff]   ;;  %v2588_v30 = vld [vmem:[%s3355_s3 + $0x80] sm:$0xff]   ;;  %v2596_v43 = vld [vmem:[%s3355_s3 + $0x1f8] sm:$0xff]   ;;  %p338_p5 = scmp.lt.s32.totalorder %s335_s7, 9 }
  0x28   : > { %2313 = vmatpush3.bf16.msra.mxu0 %v2568_v10  ;;  %v2585_v27 = vld [vmem:[%s3355_s3 + $0x8] sm:$0xff]   ;;  %v2589_v31 = vld [vmem:[%s3355_s3] sm:$0xff]   ;;  %v2595_v46 = vld [vmem:[%s3355_s3 + $0x138] sm:$0xff]  }
  0x29   : > { %2335 = vmatpush3.bf16.msra.mxu1 %v2569_v11  ;;  %2314 = vmatprep.subr.bf16.mxu0 %v2570_v12  ;;  %v355_v32 = vld [vmem:[%s323_s30] sm:$0xff]  ;;  %v356_v33 = vld [vmem:[%s323_s30 + $0x8] sm:$0x11]  ;;  %v2597_v47 = vld [vmem:[%s3355_s3 + $0x1b8] sm:$0xff]   ;;  %s3375_s7 = smov (!%p338_p5, %s335_s7), 9 }
  0x2a   : > { %2336 = vmatprep.subr.bf16.mxu1 %v2571_v13  ;;  %v2980_v34 = vcombine.low %v355_v32, %v356_v33  ;;  %v2150_v35 = vcombine.high %v355_v32, %v356_v33  ;;  %v2168_v36 = vcombine.high %v355_v32, %v355_v32  ;;  %v2167_v37 = vcombine.low %v355_v32, %v355_v32  ;;  %v2598_v50 = vld [vmem:[%s3355_s3 + $0x170] sm:$0xff]   ;;  %v2602_v55 = vld [vmem:[%s3355_s3 + $0x168] sm:$0xff]   ;;  %v2606_v59 = vld [vmem:[%s3355_s3 + $0x160] sm:$0xff]   ;;  %s2145_s17 = sshll.u32 %s3375_s7, 2  ;;  %s2147_s7 = sshll.u32 %s3371_s19, 3 }
  0x2b   : > { %v2600_v51 = vld [vmem:[%s3355_s3 + $0x1f0] sm:$0xff]   ;;  %v2604_v56 = vld [vmem:[%s3355_s3 + $0x1e8] sm:$0xff]   ;;  %v2608_v60 = vld [vmem:[%s3355_s3 + $0x1e0] sm:$0xff]   ;;  %s342_s6 = sadd.s32 %s2938_s14, %s2145_s17  ;;  %s351_s10 = sadd.s32 %s2147_s7, %s3377_s18 }
  0x2c   : > { %2315 = vmatpush3.bf16.msra.mxu0 %v2572_v14  ;;  %v437_v39 = vshrl.u32 %v2150_v35, 16  ;;  %v439_v40 = vshll.u32 %v2150_v35, 16  ;;  %713 = vmatprep.mubr.bf16.mxu1 %v2168_v36  ;;  %v430_v41 = vshrl.u32 %v2980_v34, 16  ;;  %v432_v42 = vshll.u32 %v2980_v34, 16  ;;  %v2601_v53 = vld [vmem:[%s3355_s3 + $0x1b0] sm:$0xff]   ;;  %v2605_v57 = vld [vmem:[%s3355_s3 + $0x1a8] sm:$0xff]  }
  0x2d   : > { %2337 = vmatpush3.bf16.msra.mxu1 %v2573_v15  ;;  %2316 = vmatprep.subr.bf16.mxu0 %v2574_v16  ;;  %v754_v52 = vrot.slane %v2150_v35, 1  ;;  %v2599_v54 = vld [vmem:[%s3355_s3 + $0x130] sm:$0xff]   ;;  %v2603_v58 = vld [vmem:[%s3355_s3 + $0x128] sm:$0xff]   ;;  %v2609_v61 = vld [vmem:[%s3355_s3 + $0x1a0] sm:$0xff]   ;;  %s2146_s13 = sshll.u32 %s342_s6, 2  ;;  %s2148_s11 = sshll.u32 %s351_s10, 2 }
  0x2e   : > { %2338 = vmatprep.subr.bf16.mxu1 %v2575_v17  ;;  %v441_v44 = vrot.slane %v439_v40, 1  ;;  %v434_v45 = vrot.slane %v432_v42, 1  ;;  %v2607_v62 = vld [vmem:[%s3355_s3 + $0x120] sm:$0xff]   ;;  %v2610_v63 = vld [vmem:[%s3355_s3 + $0x158] sm:$0xff]   ;;  %v2614_v3 = vld [vmem:[%s3355_s3 + $0x150] sm:$0xff]   ;;  %s344_s29 = scalar_lea.vmem %s3354_s2, %s2146_s13  ;;  %s353_s15 = scalar_lea.vmem %s3357_s5, %s2148_s11 }
  0x2f   : > { %v2612_v0 = vld [vmem:[%s3355_s3 + $0x1d8] sm:$0xff]   ;;  %v2616_v4 = vld [vmem:[%s3355_s3 + $0x1d0] sm:$0xff]   ;;  %v2618_v7 = vld [vmem:[%s3355_s3 + $0x148] sm:$0xff]  }
  0x30   : > { %2317 = vmatpush3.bf16.msra.mxu0 %v2576_v18  ;;  %v442_v48 = vor.u32 %v441_v44, %v437_v39  ;;  %v435_v49 = vor.u32 %v434_v45, %v430_v41  ;;  %v2613_v1 = vld [vmem:[%s3355_s3 + $0x198] sm:$0xff]   ;;  %v2617_v5 = vld [vmem:[%s3355_s3 + $0x190] sm:$0xff]   ;;  %v2620_v8 = vld [vmem:[%s3355_s3 + $0x1c8] sm:$0xff]  }
  0x31   : > { %2339 = vmatpush3.bf16.msra.mxu1 %v2577_v19  ;;  %2318 = vmatprep.subr.bf16.mxu0 %v2578_v20  ;;  %v2611_v2 = vld [vmem:[%s3355_s3 + $0x118] sm:$0xff]   ;;  %v2615_v6 = vld [vmem:[%s3355_s3 + $0x110] sm:$0xff]   ;;  %v2621_v9 = vld [vmem:[%s3355_s3 + $0x188] sm:$0xff]  }
  0x32   : > { %2340 = vmatprep.subr.bf16.mxu1 %v2579_v21  ;;  %573 = vmatprep.mubr.bf16.mxu0 %v442_v48  ;;  %v2619_v10 = vld [vmem:[%s3355_s3 + $0x108] sm:$0xff]   ;;  %v2622_v11 = vld [vmem:[%s3355_s3 + $0x140] sm:$0xff]   ;;  %v2626_v17 = vld [vmem:[%s3355_s3 + $0x278] sm:$0xff]  }
  0x33   : > { %v2624_v12 = vld [vmem:[%s3355_s3 + $0x1c0] sm:$0xff]   ;;  %v895_v16 = vld [vmem:[%s333_s8 + $0x8] sm:$0x11]  ;;  %v2631_v20 = vld [vmem:[%s3355_s3 + $0x2f8] sm:$0xff]  }
  0x34   : > { %2319 = vmatpush3.bf16.msra.mxu0 %v2580_v22  ;;  %v2625_v13 = vld [vmem:[%s3355_s3 + $0x180] sm:$0xff]   ;;  %v2629_v22 = vld [vmem:[%s3355_s3 + $0x238] sm:$0xff]   ;;  %v2637_v32 = vld [vmem:[%s3355_s3 + $0x268] sm:$0xff]  }
  0x35   : > { %2341 = vmatpush3.bf16.msra.mxu1 %v2581_v23  ;;  %2320 = vmatprep.subr.bf16.mxu0 %v2582_v24  ;;  %v2623_v14 = vld [vmem:[%s3355_s3 + $0x100] sm:$0xff]   ;;  %v2632_v23 = vld [vmem:[%s3355_s3 + $0x2b8] sm:$0xff]   ;;  %v753_v24 = vrot.slane %v2980_v34, 1  ;;  %v2639_v35 = vld [vmem:[%s3355_s3 + $0x2e8] sm:$0xff]  }
  0x36   : > { %2342 = vmatprep.subr.bf16.mxu1 %v2583_v25  ;;  %v894_v15 = vld [vmem:[%s333_s8] sm:$0xff]  ;;  %v2633_v25 = vld [vmem:[%s3355_s3 + $0x270] sm:$0xff]   ;;  %v2640_v36 = vld [vmem:[%s3355_s3 + $0x2a8] sm:$0xff]  }
  0x37   : > { %v2202_v18 = vcombine.high %v894_v15, %v894_v15  ;;  %v2201_v19 = vcombine.low %v894_v15, %v894_v15  ;;  %v2220_v21 = vcombine.high %v894_v15, %v895_v16  ;;  %v2643_v39 = vld [vmem:[%s3355_s3 + $0x2e0] sm:$0xff]   ;;  %v2645_v42 = vld [vmem:[%s3355_s3 + $0x258] sm:$0xff]   ;;  %v2219_v48 = vcombine.low %v894_v15, %v895_v16 }
  0x38   : > { %2321 = vmatpush3.bf16.msra.mxu0 %v2584_v26  ;;  %v2644_v40 = vld [vmem:[%s3355_s3 + $0x2a0] sm:$0xff]   ;;  %v2648_v44 = vld [vmem:[%s3355_s3 + $0x298] sm:$0xff]  }
  0x39   : > { %2343 = vmatpush3.bf16.msra.mxu1 %v2585_v27  ;;  %2322 = vmatprep.subr.bf16.mxu0 %v2586_v28  ;;  %v1117_v26 = vshrl.u32 %v2220_v21, 16  ;;  %v1119_v27 = vshll.u32 %v2220_v21, 16  ;;  %v2635_v28 = vld [vmem:[%s3355_s3 + $0x2f0] sm:$0xff]   ;;  %v1295_v34 = vrot.slane %v2220_v21, 1  ;;  %v2642_v41 = vld [vmem:[%s3355_s3 + $0x220] sm:$0xff]   ;;  %v2646_v45 = vld [vmem:[%s3355_s3 + $0x218] sm:$0xff]  }
  0x3a   : > { %2344 = vmatprep.subr.bf16.mxu1 %v2587_v29  ;;  %v2636_v29 = vld [vmem:[%s3355_s3 + $0x2b0] sm:$0xff]   ;;  %v2675_v15 = vld [vmem:[%s3355_s3 + $0x320] sm:$0xff]   ;;  %v2678_v16 = vld [vmem:[%s3355_s3 + $0x358] sm:$0xff]  }
  0x3b   : > { %v2684_v21 = vld [vmem:[%s3355_s3 + $0x3d0] sm:$0xff]  }
  0x3c   : > { %2323 = vmatpush3.bf16.msra.mxu0 %v2588_v30  ;;  %v1121_v30 = vrot.slane %v1119_v27, 1  ;;  %v2687_v27 = vld [vmem:[%s3355_s3 + $0x308] sm:$0xff]  }
  0x3d   : > { %2345 = vmatpush3.bf16.msra.mxu1 %v2589_v31  ;;  %2352 = vmatprep.subr.bf16.mxu0 %v2594_v38  ;;  %v2634_v31 = vld [vmem:[%s3355_s3 + $0x230] sm:$0xff]   ;;  %v2641_v38 = vld [vmem:[%s3355_s3 + $0x260] sm:$0xff]  }
  0x3e   : > { %2374 = vmatprep.subr.bf16.mxu1 %v2596_v43  ;;  %v1122_v33 = vor.u32 %v1121_v30, %v1117_v26  ;;  %v2647_v43 = vld [vmem:[%s3355_s3 + $0x2d8] sm:$0xff]   ;;  %v2689_v26 = vld [vmem:[%s3355_s3 + $0x388] sm:$0xff]   ;;  %v1435_v30 = vld [vmem:[%s344_s29] sm:$0xff] }
  0x3f   : > { %574 = vmatmul.mubr.bf16.vlgmr.msra.gmra.mxu0 %v435_v49  ;;  %v2652_v49 = vld [vmem:[%s3355_s3 + $0x290] sm:$0xff]  }
  0x40   : > { %714 = vmatmul.mubr.bf16.vlgmr.msra.gmra.mxu1 %v2167_v37  ;;  %2353 = vmatpush3.bf16.msra.mxu0 %v2595_v46  ;;  %v2638_v37 = vld [vmem:[%s3355_s3 + $0x228] sm:$0xff]   ;;  %v2649_v46 = vld [vmem:[%s3355_s3 + $0x250] sm:$0xff]  }
  0x41   : > { %2375 = vmatpush3.bf16.msra.mxu1 %v2597_v47  ;;  %2354 = vmatprep.subr.bf16.mxu0 %v2598_v50  ;;  %v2651_v47 = vld [vmem:[%s3355_s3 + $0x2d0] sm:$0xff]  }
  0x42   : > { %2376 = vmatprep.subr.bf16.mxu1 %v2600_v51  ;;  %885 = vmatprep.mubr.bf16.mxu0 %v754_v52  ;;  %v2650_v50 = vld [vmem:[%s3355_s3 + $0x210] sm:$0xff]   ;;  %v2653_v51 = vld [vmem:[%s3355_s3 + $0x248] sm:$0xff]  }
  0x43   : > { %1063 = vmatprep.mubr.bf16.mxu1 %v2202_v18  ;;  %v2655_v52 = vld [vmem:[%s3355_s3 + $0x2c8] sm:$0xff]   ;;  %v2681_v18 = vld [vmem:[%s3355_s3 + $0x398] sm:$0xff]  }
  0x44   : > { %2355 = vmatpush3.bf16.msra.mxu0 %v2599_v54  ;;  %v1112_v54 = vshll.u32 %v2219_v48, 16 }
  0x45   : > { %2377 = vmatpush3.bf16.msra.mxu1 %v2601_v53  ;;  %2356 = vmatprep.subr.bf16.mxu0 %v2602_v55  ;;  %v2656_v53 = vld [vmem:[%s3355_s3 + $0x288] sm:$0xff]  }
  0x46   : > { %2378 = vmatprep.subr.bf16.mxu1 %v2604_v56  ;;  %v2654_v55 = vld [vmem:[%s3355_s3 + $0x208] sm:$0xff]   ;;  %v2657_v56 = vld [vmem:[%s3355_s3 + $0x240] sm:$0xff]  }
  0x48   : > { %2357 = vmatpush3.bf16.msra.mxu0 %v2603_v58  ;;  %v1110_v58 = vshrl.u32 %v2219_v48, 16 }
  0x49   : > { %2379 = vmatpush3.bf16.msra.mxu1 %v2605_v57  ;;  %2358 = vmatprep.subr.bf16.mxu0 %v2606_v59  ;;  %v2659_v57 = vld [vmem:[%s3355_s3 + $0x2c0] sm:$0xff]  }
  0x4a   : > { %2380 = vmatprep.subr.bf16.mxu1 %v2608_v60  ;;  %v2661_v59 = vld [vmem:[%s3355_s3 + $0x280] sm:$0xff]   ;;  %v1114_v60 = vrot.slane %v1112_v54, 1 }
  0x4b   : > { %v2705_v54 = vld [vmem:[%s3355_s3 + $0x420] sm:$0xff]  }
  0x4c   : > { %2359 = vmatpush3.bf16.msra.mxu0 %v2607_v62  ;;  %v1294_v62 = vrot.slane %v2219_v48, 1 }
  0x4d   : > { %2381 = vmatpush3.bf16.msra.mxu1 %v2609_v61  ;;  %2360 = vmatprep.subr.bf16.mxu0 %v2610_v63  ;;  %v2658_v61 = vld [vmem:[%s3355_s3 + $0x200] sm:$0xff]   ;;  %v2662_v63 = vld [vmem:[%s3355_s3 + $0x378] sm:$0xff]  }
  0x4e   : > { %2382 = vmatprep.subr.bf16.mxu1 %v2612_v0  ;;  %v2664_v0 = vld [vmem:[%s3355_s3 + $0x3f8] sm:$0xff]  }
  0x50   : > { %2361 = vmatpush3.bf16.msra.mxu0 %v2611_v2  ;;  %v1115_v2 = vor.u32 %v1114_v60, %v1110_v58  ;;  %v2709_v58 = vld [vmem:[%s3355_s3 + $0x410] sm:$0xff]   ;;  %v2711_v60 = vld [vmem:[%s3355_s3 + $0x408] sm:$0xff]  }
  0x51   : > { %2383 = vmatpush3.bf16.msra.mxu1 %v2613_v1  ;;  %2362 = vmatprep.subr.bf16.mxu0 %v2614_v3  ;;  %v2665_v1 = vld [vmem:[%s3355_s3 + $0x3b8] sm:$0xff]  }
  0x52   : > { %2384 = vmatprep.subr.bf16.mxu1 %v2616_v4  ;;  %v2663_v3 = vld [vmem:[%s3355_s3 + $0x338] sm:$0xff]   ;;  %v2666_v4 = vld [vmem:[%s3355_s3 + $0x370] sm:$0xff]  }
  0x54   : > { %2363 = vmatpush3.bf16.msra.mxu0 %v2615_v6  ;;  %v2669_v6 = vld [vmem:[%s3355_s3 + $0x3b0] sm:$0xff]  }
  0x55   : > { %2385 = vmatpush3.bf16.msra.mxu1 %v2617_v5  ;;  %2364 = vmatprep.subr.bf16.mxu0 %v2618_v7  ;;  %v2668_v5 = vld [vmem:[%s3355_s3 + $0x3f0] sm:$0xff]  }
  0x56   : > { %2386 = vmatprep.subr.bf16.mxu1 %v2620_v8  ;;  %v2667_v7 = vld [vmem:[%s3355_s3 + $0x330] sm:$0xff]   ;;  %v2670_v8 = vld [vmem:[%s3355_s3 + $0x368] sm:$0xff]  }
  0x58   : > { %2365 = vmatpush3.bf16.msra.mxu0 %v2619_v10  ;;  %v2673_v10 = vld [vmem:[%s3355_s3 + $0x3a8] sm:$0xff]  }
  0x59   : > { %2387 = vmatpush3.bf16.msra.mxu1 %v2621_v9  ;;  %2366 = vmatprep.subr.bf16.mxu0 %v2622_v11  ;;  %v2672_v9 = vld [vmem:[%s3355_s3 + $0x3e8] sm:$0xff]  }
  0x5a   : > { %2388 = vmatprep.subr.bf16.mxu1 %v2624_v12  ;;  %v2671_v11 = vld [vmem:[%s3355_s3 + $0x328] sm:$0xff]   ;;  %v2674_v12 = vld [vmem:[%s3355_s3 + $0x360] sm:$0xff]  }
  0x5c   : > { %2367 = vmatpush3.bf16.msra.mxu0 %v2623_v14  ;;  %v2677_v14 = vld [vmem:[%s3355_s3 + $0x3a0] sm:$0xff]  }
  0x5d   : > { %2389 = vmatpush3.bf16.msra.mxu1 %v2625_v13  ;;  %2396 = vmatprep.subr.bf16.mxu0 %v2626_v17  ;;  %v2676_v13 = vld [vmem:[%s3355_s3 + $0x3e0] sm:$0xff]   ;;  %v2680_v17 = vld [vmem:[%s3355_s3 + $0x3d8] sm:$0xff]  }
  0x5e   : > { %2418 = vmatprep.subr.bf16.mxu1 %v2631_v20  ;;  %v2682_v20 = vld [vmem:[%s3355_s3 + $0x350] sm:$0xff]  }
  0x5f   : > { %886 = vmatmul.mubr.bf16.vlgmr.msra.gmra.mxu0 %v753_v24  ;;  %v2686_v24 = vld [vmem:[%s3355_s3 + $0x348] sm:$0xff]  }
  0x60   : > { %1064 = vmatmul.mubr.bf16.vlgmr.msra.gmra.mxu1 %v2201_v19  ;;  %2397 = vmatpush3.bf16.msra.mxu0 %v2629_v22  ;;  %v2679_v19 = vld [vmem:[%s3355_s3 + $0x318] sm:$0xff]   ;;  %v2685_v22 = vld [vmem:[%s3355_s3 + $0x390] sm:$0xff]  }
  0x61   : > { %2419 = vmatpush3.bf16.msra.mxu1 %v2632_v23  ;;  %2398 = vmatprep.subr.bf16.mxu0 %v2633_v25  ;;  %v2683_v23 = vld [vmem:[%s3355_s3 + $0x310] sm:$0xff]   ;;  %v2688_v25 = vld [vmem:[%s3355_s3 + $0x3c8] sm:$0xff]  }
  0x62   : > { %2420 = vmatprep.subr.bf16.mxu1 %v2635_v28  ;;  %1253 = vmatprep.mubr.bf16.mxu0 %v1122_v33  ;;  %v2690_v28 = vld [vmem:[%s3355_s3 + $0x340] sm:$0xff]  }
  0x63   : > { %1426 = vmatprep.mubr.bf16.mxu1 %v1295_v34  ;;  %v2695_v34 = vld [vmem:[%s3355_s3 + $0x380] sm:$0xff]  }
  0x64   : > { %2399 = vmatpush3.bf16.msra.mxu0 %v2634_v31  ;;  %v1436_v31 = vld [vmem:[%s344_s29 + $0x8] sm:$0x11] }
  0x65   : > { %2421 = vmatpush3.bf16.msra.mxu1 %v2636_v29  ;;  %2400 = vmatprep.subr.bf16.mxu0 %v2637_v32  ;;  %v2692_v29 = vld [vmem:[%s3355_s3 + $0x3c0] sm:$0xff]   ;;  %v2254_v32 = vcombine.high %v1435_v30, %v1435_v30  ;;  %v2271_v33 = vcombine.low %v1435_v30, %v1436_v31 }
  0x66   : > { %2422 = vmatprep.subr.bf16.mxu1 %v2639_v35  ;;  %v2272_v35 = vcombine.high %v1435_v30, %v1436_v31 }
  0x68   : > { %2401 = vmatpush3.bf16.msra.mxu0 %v2638_v37  ;;  %v2697_v37 = vld [vmem:[%s3355_s3 + $0x478] sm:$0xff]   ;;  %v1836_v48 = vrot.slane %v2272_v35, 1 }
  0x69   : > { %2423 = vmatpush3.bf16.msra.mxu1 %v2640_v36  ;;  %2402 = vmatprep.subr.bf16.mxu0 %v2641_v38  ;;  %v2691_v36 = vld [vmem:[%s3355_s3 + $0x300] sm:$0xff]   ;;  %v1658_v38 = vshrl.u32 %v2272_v35, 16 }
  0x6a   : > { %2424 = vmatprep.subr.bf16.mxu1 %v2643_v39  ;;  %v1660_v39 = vshll.u32 %v2272_v35, 16 }
  0x6c   : > { %2403 = vmatpush3.bf16.msra.mxu0 %v2642_v41  ;;  %v1653_v41 = vshll.u32 %v2271_v33, 16 }
  0x6d   : > { %2425 = vmatpush3.bf16.msra.mxu1 %v2644_v40  ;;  %2404 = vmatprep.subr.bf16.mxu0 %v2645_v42  ;;  %v1651_v40 = vshrl.u32 %v2271_v33, 16  ;;  %v2253_v42 = vcombine.low %v1435_v30, %v1435_v30 }
  0x6e   : > { %2426 = vmatprep.subr.bf16.mxu1 %v2647_v43  ;;  %v1662_v43 = vrot.slane %v1660_v39, 1 }
  0x70   : > { %2405 = vmatpush3.bf16.msra.mxu0 %v2646_v45  ;;  %v1655_v45 = vrot.slane %v1653_v41, 1 }
  0x71   : > { %2427 = vmatpush3.bf16.msra.mxu1 %v2648_v44  ;;  %2406 = vmatprep.subr.bf16.mxu0 %v2649_v46  ;;  %v2699_v44 = vld [vmem:[%s3355_s3 + $0x438] sm:$0xff]   ;;  %v1663_v46 = vor.u32 %v1662_v43, %v1658_v38 }
  0x72   : > { %2428 = vmatprep.subr.bf16.mxu1 %v2651_v47  ;;  %v2700_v47 = vld [vmem:[%s3355_s3 + $0x470] sm:$0xff]  }
  0x74   : > { %2407 = vmatpush3.bf16.msra.mxu0 %v2650_v50  ;;  %v2701_v50 = vld [vmem:[%s3355_s3 + $0x430] sm:$0xff]  }
  0x75   : > { %2429 = vmatpush3.bf16.msra.mxu1 %v2652_v49  ;;  %2408 = vmatprep.subr.bf16.mxu0 %v2653_v51  ;;  %v1656_v49 = vor.u32 %v1655_v45, %v1651_v40  ;;  %v2702_v51 = vld [vmem:[%s3355_s3 + $0x468] sm:$0xff]  }
  0x76   : > { %2430 = vmatprep.subr.bf16.mxu1 %v2655_v52  ;;  %v2703_v52 = vld [vmem:[%s3355_s3 + $0x428] sm:$0xff]  }
  0x78   : > { %2409 = vmatpush3.bf16.msra.mxu0 %v2654_v55  ;;  %v2706_v55 = vld [vmem:[%s3355_s3 + $0x458] sm:$0xff]  }
  0x79   : > { %2431 = vmatpush3.bf16.msra.mxu1 %v2656_v53  ;;  %2410 = vmatprep.subr.bf16.mxu0 %v2657_v56  ;;  %v2704_v53 = vld [vmem:[%s3355_s3 + $0x460] sm:$0xff]   ;;  %v2707_v56 = vld [vmem:[%s3355_s3 + $0x418] sm:$0xff]  }
  0x7a   : > { %2432 = vmatprep.subr.bf16.mxu1 %v2659_v57  ;;  %v2708_v57 = vld [vmem:[%s3355_s3 + $0x450] sm:$0xff]  }
  0x7c   : > { %2411 = vmatpush3.bf16.msra.mxu0 %v2658_v61  ;;  %v2712_v61 = vld [vmem:[%s3355_s3 + $0x440] sm:$0xff]  }
  0x7d   : > { %2433 = vmatpush3.bf16.msra.mxu1 %v2661_v59  ;;  %2440 = vmatprep.subr.bf16.mxu0 %v2662_v63  ;;  %v2710_v59 = vld [vmem:[%s3355_s3 + $0x448] sm:$0xff]   ;;  %v1835_v63 = vrot.slane %v2271_v33, 1 }
  0x7e   : > { %2462 = vmatprep.subr.bf16.mxu1 %v2664_v0 }
  0x7f   : > { %1254 = vmatmul.mubr.bf16.vlgmr.msra.gmra.mxu0 %v1115_v2 }
  0x80   : > { %1427 = vmatmul.mubr.bf16.vlgmr.msra.gmra.mxu1 %v1294_v62  ;;  %2441 = vmatpush3.bf16.msra.mxu0 %v2663_v3  ;;  %v2713_v62 = vld [vmem:[%s3355_s3 + $0x400] sm:$0xff]  }
  0x81   : > { %2463 = vmatpush3.bf16.msra.mxu1 %v2665_v1  ;;  %2442 = vmatprep.subr.bf16.mxu0 %v2666_v4 }
  0x82   : > { %2464 = vmatprep.subr.bf16.mxu1 %v2668_v5  ;;  %1604 = vmatprep.mubr.bf16.mxu0 %v2254_v32 }
  0x83   : > { %1794 = vmatprep.mubr.bf16.mxu1 %v1663_v46 }
  0x84   : > { %2443 = vmatpush3.bf16.msra.mxu0 %v2667_v7 }
  0x85   : > { %2465 = vmatpush3.bf16.msra.mxu1 %v2669_v6  ;;  %2444 = vmatprep.subr.bf16.mxu0 %v2670_v8 }
  0x86   : > { %2466 = vmatprep.subr.bf16.mxu1 %v2672_v9 }
  0x88   : > { %2445 = vmatpush3.bf16.msra.mxu0 %v2671_v11 }
  0x89   : > { %2467 = vmatpush3.bf16.msra.mxu1 %v2673_v10  ;;  %2446 = vmatprep.subr.bf16.mxu0 %v2674_v12 }
  0x8a   : > { %2468 = vmatprep.subr.bf16.mxu1 %v2676_v13 }
  0x8c   : > { %2447 = vmatpush3.bf16.msra.mxu0 %v2675_v15 }
  0x8d   : > { %2469 = vmatpush3.bf16.msra.mxu1 %v2677_v14  ;;  %2448 = vmatprep.subr.bf16.mxu0 %v2678_v16 }
  0x8e   : > { %2470 = vmatprep.subr.bf16.mxu1 %v2680_v17 }
  0x90   : > { %2449 = vmatpush3.bf16.msra.mxu0 %v2679_v19 }
  0x91   : > { %2471 = vmatpush3.bf16.msra.mxu1 %v2681_v18  ;;  %2450 = vmatprep.subr.bf16.mxu0 %v2682_v20 }
  0x92   : > { %2472 = vmatprep.subr.bf16.mxu1 %v2684_v21 }
  0x94   : > { %2451 = vmatpush3.bf16.msra.mxu0 %v2683_v23 }
  0x95   : > { %2473 = vmatpush3.bf16.msra.mxu1 %v2685_v22  ;;  %2452 = vmatprep.subr.bf16.mxu0 %v2686_v24 }
  0x96   : > { %2474 = vmatprep.subr.bf16.mxu1 %v2688_v25 }
  0x98   : > { %2453 = vmatpush3.bf16.msra.mxu0 %v2687_v27 }
  0x99   : > { %2475 = vmatpush3.bf16.msra.mxu1 %v2689_v26  ;;  %2454 = vmatprep.subr.bf16.mxu0 %v2690_v28 }
  0x9a   : > { %2476 = vmatprep.subr.bf16.mxu1 %v2692_v29 }
  0x9c   : > { %2455 = vmatpush3.bf16.msra.mxu0 %v2691_v36 }
  0x9d   : > { %2477 = vmatpush3.bf16.msra.mxu1 %v2695_v34  ;;  %2484 = vmatprep.subr.bf16.mxu0 %v2697_v37 }
  0x9f   : > { %1605 = vmatmul.mubr.bf16.vlgmr.msra.gmra.mxu0 %v2253_v42 }
  0xa0   : > { %2485 = vmatpush3.bf16.msra.mxu0 %v2699_v44  ;;  %1795 = vmatmul.mubr.bf16.vlgmr.msra.gmra.mxu1 %v1656_v49 }
  0xa1   : > { %2486 = vmatprep.subr.bf16.mxu0 %v2700_v47  ;;  %1967 = vmatprep.mubr.bf16.mxu0 %v1836_v48 }
  0xa4   : > { %2487 = vmatpush3.bf16.msra.mxu0 %v2701_v50  ;;  %v2305_v50 = vld [vmem:[#allocation2] ss:$0 sm:$0xff] }
  0xa5   : > { %2488 = vmatprep.subr.bf16.mxu0 %v2702_v51 }
  0xa8   : > { %2489 = vmatpush3.bf16.msra.mxu0 %v2703_v52 }
  0xa9   : > { %2490 = vmatprep.subr.bf16.mxu0 %v2704_v53 }
  0xac   : > { %2491 = vmatpush3.bf16.msra.mxu0 %v2705_v54 }
  0xad   : > { %2492 = vmatprep.subr.bf16.mxu0 %v2706_v55 }
  0xb0   : > { %2493 = vmatpush3.bf16.msra.mxu0 %v2707_v56 }
  0xb1   : > { %2494 = vmatprep.subr.bf16.mxu0 %v2708_v57 }
  0xb4   : > { %2495 = vmatpush3.bf16.msra.mxu0 %v2709_v58 }
  0xb5   : > { %2496 = vmatprep.subr.bf16.mxu0 %v2710_v59 }
  0xb8   : > { %2497 = vmatpush3.bf16.msra.mxu0 %v2711_v60 }
  0xb9   : > { %2498 = vmatprep.subr.bf16.mxu0 %v2712_v61 }
  0xbc   : > { %2499 = vmatpush3.bf16.msra.mxu0 %v2713_v62 }
  0xbf   : > { %1968 = vmatmul.mubr.bf16.vlgmr.msra.gmra.mxu0 %v1835_v63 }
  0xff   : > { %v2324_v4 = vpop.f32.mrf.mxu0 }
 0x100   : > { %v2346_v0 = vpop.f32.mrf.mxu1 }
 0x101   : > { %v2325_v6 = vpop.f32.mrf.mxu0 }
 0x102   : > { %v2347_v1 = vpop.f32.mrf.mxu1  ;;  %v2326_v7 = vadd.f32 %v2325_v6, %v2324_v4 }
 0x103   : > { %v2348_v2 = vadd.f32 %v2347_v1, %v2346_v0  ;;  %v2327_v8 = vpop.f32.mrf.mxu0 }
 0x104   : > { %v2349_v3 = vpop.f32.mrf.mxu1 }
 0x105   : > { %v716_v9 = vadd.f32 %v2348_v2, %v2326_v7  ;;  %v2328_v10 = vpop.f32.mrf.mxu0 }
 0x106   : > { %v2350_v5 = vpop.f32.mrf.mxu1 }
 0x11f   : > { %v2368_v14 = vpop.f32.mrf.mxu0 }
 0x120   : > { %v2390_v11 = vpop.f32.mrf.mxu1 }
 0x121   : > { %v2369_v16 = vpop.f32.mrf.mxu0 }
 0x122   : > { %v2391_v12 = vpop.f32.mrf.mxu1  ;;  %v2370_v18 = vadd.f32 %v2369_v16, %v2368_v14 }
 0x123   : > { %v2392_v13 = vadd.f32 %v2391_v12, %v2390_v11  ;;  %v2371_v19 = vpop.f32.mrf.mxu0 }
 0x124   : > { %v2393_v15 = vpop.f32.mrf.mxu1  ;;  %v893_v20 = vadd.f32 %v2370_v18, %v716_v9 }
 0x125   : > { %v2372_v21 = vpop.f32.mrf.mxu0 }
 0x126   : > { %v2394_v17 = vpop.f32.mrf.mxu1  ;;  %v1071_v22 = vadd.f32 %v2392_v13, %v893_v20 }
 0x13f   : > { %v2412_v25 = vpop.f32.mrf.mxu0 }
 0x140   : > { %v2434_v23 = vpop.f32.mrf.mxu1 }
 0x141   : > { %v2413_v27 = vpop.f32.mrf.mxu0 }
 0x142   : > { %v2435_v24 = vpop.f32.mrf.mxu1  ;;  %v2414_v29 = vadd.f32 %v2413_v27, %v2412_v25 }
 0x143   : > { %v2436_v30 = vadd.f32 %v2435_v24, %v2434_v23  ;;  %v2415_v31 = vpop.f32.mrf.mxu0 }
 0x144   : > { %v2437_v26 = vpop.f32.mrf.mxu1  ;;  %v1261_v32 = vadd.f32 %v2414_v29, %v1071_v22 }
 0x145   : > { %v2416_v33 = vpop.f32.mrf.mxu0 }
 0x146   : > { %v2438_v28 = vpop.f32.mrf.mxu1  ;;  %v1434_v34 = vadd.f32 %v2436_v30, %v1261_v32 }
 0x15f   : > { %v2456_v35 = vpop.f32.mrf.mxu0 }
 0x160   : > { %v2478_v36 = vpop.f32.mrf.mxu1 }
 0x161   : > { %v2457_v37 = vpop.f32.mrf.mxu0 }
 0x162   : > { %v2479_v38 = vpop.f32.mrf.mxu1  ;;  %v2458_v43 = vadd.f32 %v2457_v37, %v2456_v35 }
 0x163   : > { %v2459_v39 = vpop.f32.mrf.mxu0  ;;  %v2480_v45 = vadd.f32 %v2479_v38, %v2478_v36 }
 0x164   : > { %v2481_v40 = vpop.f32.mrf.mxu1  ;;  %v1612_v44 = vadd.f32 %v2458_v43, %v1434_v34 }
 0x165   : > { %v2460_v41 = vpop.f32.mrf.mxu0 }
 0x166   : > { %v2482_v42 = vpop.f32.mrf.mxu1  ;;  %v1802_v48 = vadd.f32 %v2480_v45, %v1612_v44 }
 0x17f   : > { %v2500_v46 = vpop.f32.mrf.mxu0 }
 0x181   : > { %v2501_v47 = vpop.f32.mrf.mxu0 }
 0x182   : > { %v2502_v49 = vadd.f32 %v2501_v47, %v2500_v46 }
 0x183   : > { %v2503_v51 = vpop.f32.mrf.mxu0 }
 0x184   : > { %v1975_v52 = vadd.f32 %v2502_v49, %v1802_v48 }
 0x185   : > { %v2504_v53 = vpop.f32.mrf.mxu0 }
 0x186   : > { %v1983_v54 = vadd.f32 %v2305_v50, %v1975_v52 }
 0x188   : > { %vm1984_vm0 = vcmp.ge.f32.partialorder %v1983_v54, 0.0  ;;  %v1985_v55 = vmul.f32 0.01, %v1983_v54 }
 0x18a   : > { %v1986_v56 = vsel %vm1984_vm0, %v1983_v54, %v1985_v55 }
 0x18b   : > { %v1987_v57 = vpack.c.bf16 %v1986_v56, %v1986_v56 }
 0x18d   : > { %1989 = vst.msk [vmem:[%s353_s15] sm:$0xf] %vm1988_vm1, %v1987_v57 }
 0x18e PF: > { %s16_s22 = sadd.s32 1, %s2782_s22   ;;  %s3360_s18 = smov %s2774_s20 }
 0x18f   : > { %p13_p7 = scmp.ge.s32.totalorder %s16_s22, 18   ;;  %s3361_s19 = smov %s2778_s21 }
 0x190   : > { %s3362_s20 = smov %s3365_s24  ;;  %s3363_s21 = smov %s3369_s25 }
 0x191   :  { %15 = sbr.rel (!%p13_p7) target bundleno = 3 (0x3), region = 81 }
 0x196   :  { %2017 = vsyncpa [#allocation3], 1 }
 0x197   :  { %2019 = vsyncpa [#allocation3 + $0x1], 1 }

// kernel: edge_forward.3
= control target key start
LH: loop header
LB: loop body
LE: loop exit
PB: predicated region body
PF: predicated region fallthrough
CT: control target
= control target key end

     0   :  { %14 = vsyncpa [#allocation3], 0  ;;  %s6561_s0 = inlined_call_operand.vmem [shape: bf16[2,10,10,320], index: 0, kind: input, shape index: {}, may-alias: {0,1,2}]   ;;  %s6562_s1 = inlined_call_operand.vmem [shape: bf16[2,10,10,320], index: 1, kind: input, shape index: {}, may-alias: {0,1,2}]   ;;  %s6563_s2 = inlined_call_operand.vmem [shape: bf16[2,10,10,320], index: 2, kind: input, shape index: {}, may-alias: {0,1,2}]   ;;  %s6564_s3 = inlined_call_operand.vmem [shape: bf16[2880,256], index: 3, kind: input, shape index: {}]   ;;  %s6565_s4 = inlined_call_operand.vmem [shape: f32[1,256], index: 4, kind: input, shape index: {}]   ;;  %s6566_s5 = inlined_call_operand.vmem [shape: f32[256,2], index: 5, kind: input, shape index: {}]   ;;  %s6567_s6 = inlined_call_operand.vmem [shape: f32[1,2], index: 6, kind: input, shape index: {}]   ;;  %s6568_s7 = inlined_call_operand.hbm [shape: f32[2,8,8,256], index: 7, kind: output, shape index: {0}]   ;;  %s6569_s8 = inlined_call_operand.vmem [shape: f32[2,8,8,2], index: 8, kind: output, shape index: {1}]  }
   0x1   :  { %16 = vsyncpa [#allocation3 + $0x1], 0  ;;  %s5085_s27 = smov 0   ;;  %s5087_s28 = smov 0  }
   0x2   :  { %s5089_s29 = smov 0   ;;  %s5091_s30 = smov 0  }
   0x3   :  { %s5093_s9 = smov 0   ;;  %s5095_s10 = smov 0  }
   0x4   :  { %s5097_s11 = smov 0   ;;  %s5099_s12 = smov 0  }
   0x5 LB: > { %6574 = sst [smem:[#allocation5_spill]] %s5025_s10  ;;  %s3862_s13 = sadd.s32 4294967295, %s5033_s12   ;;  %s5033_s12 = sphi %s5099_s12, %s22_s12   ;;  %s5029_s11 = sphi %s5097_s11, %s6585_s11   ;;  %s5025_s10 = sphi %s5095_s10, %s6584_s10   ;;  %s5021_s9 = sphi %s5093_s9, %s6583_s9   ;;  %s5017_s30 = sphi %s5091_s30, %s6582_s30   ;;  %s5013_s29 = sphi %s5089_s29, %s6588_s29   ;;  %s5009_s28 = sphi %s5087_s28, %s6587_s28   ;;  %s5005_s27 = sphi %s5085_s27, %s6586_s27  }
   0x6   : > { %6575 = sst [smem:[#allocation6_spill]] %s5029_s11  ;;  %s3863_s14 = sadd.s32 4294967294, %s5033_s12  }
   0x7   : > { %s31_s15 = sadd.s32 1, %s5025_s10  ;;  %s34_s16 = sadd.s32 1, %s5029_s11 }
   0x8   : > { %p32_p0 = scmp.ge.s32.totalorder %s31_s15, 8  ;;  %p225_p1 = scmp.ne.s32.totalorder %s5013_s29, %s5009_s28 }
   0x9   : > { %p226_p2 = scmp.eq.s32.totalorder %s3862_s13, 15  ;;  %p231_p5 = scmp.ne.s32.totalorder %s5009_s28, %s5005_s27 }
   0xa   : > { %s6590_s15 = smov (%p32_p0, %s31_s15), 0  ;;  %s6592_s16 = smov (!%p32_p0, %s34_s16), %s5029_s11 }
   0xb   : > { %6576 = sst [smem:[#allocation7_spill]] %s6590_s15  ;;  %s211_s17 = ssub.s32 %s5025_s10, %s6590_s15 }
   0xc   : > { %p5136_p3 = por %p226_p2, %p225_p1  ;;  %p36_p4 = scmp.ge.s32.totalorder %s6592_s16, 2 }
   0xd   : > { %p232_p6 = scmp.eq.s32.totalorder %s3863_s14, 15  ;;  %p3866_p7 = scmp.ge.s32.totalorder %s5033_s12, 1 }
   0xe   : > { %s6594_s16 = smov (%p36_p4, %s6592_s16), 0  ;;  %p330_p9 = scmp.lt.s32.totalorder %s5033_s12, 17 }
   0xf   : > { %6578 = sst [smem:[#allocation8_spill]] %s6594_s16  ;;  %p5145_p8 = por %p232_p6, %p231_p5 }
  0x10   : > { %s210_s20 = ssub.s32 %s5029_s11, %s6594_s16  ;;  %s215_s21 = sadd.s32 1, %s5013_s29 }
  0x11   : > { %s212_s22 = sor.u32 %s211_s17, %s210_s20  ;;  %p331_p10 = pnand %p3866_p7, %p330_p9 }
  0x12   : > { %p213_p11 = scmp.eq.s32.totalorder %s212_s22, 0  ;;  %p396_p12 = scmp.lt.s32.totalorder (!%p331_p10), %s5021_s9, 1 }
  0x13   : > { %334 = sbr.rel (%p331_p10) target bundleno = 1055 (0x41f), region = 48  ;;  %p398_p13 = scmp.lt.s32.totalorder (!%p331_p10), %s5017_s30, 9 }
  0x14   : > { %s5154_s23 = scalar_select %p213_p11, %s5013_s29, %s215_s21  }
  0x15   : > { %s405_s13 = sadd.s32 (!%p331_p10), 1, %s5017_s30  ;;  %s416_s25 = sadd.s32 (!%p331_p10), 2, %s5017_s30 }
  0x16   : > { %6580 = sst [smem:[#allocation9_spill]] %s5154_s23  ;;  %p408_p0 = scmp.lt.s32.totalorder (!%p331_p10), %s405_s13, 9 }
  0x17   : > { %p419_p1 = scmp.lt.s32.totalorder (!%p331_p10), %s416_s25, 9  ;;  %p429_p2 = scmp.lt.s32.totalorder (!%p331_p10), %s5017_s30, 7 }
  0x18   : > { %v4383_v0 = vld [vmem:[%s6564_s3 + $0x1b4] ss:$8 sps:$4 sm:$0xff]   ;;  %v5035_v2 = vmov 0   ;;  %v4387_v3 = vld [vmem:[%s6564_s3 + $0x1b0] ss:$8 sps:$4 sm:$0xff]   ;;  %s5172_s22 = scalar_select %p396_p12, %s5021_s9, 1 }
  0x19   : > { %v4385_v1 = vld [vmem:[%s6564_s3 + $0x274] ss:$8 sps:$4 sm:$0xff]   ;;  %833 = vmatprep.mubr.bf16.mxu1 %v5035_v2  ;;  %760 = vmatprep.subr.bf16.mxu0 %v4383_v0  ;;  %v4388_v4 = vld [vmem:[%s6564_s3 + $0x270] ss:$8 sps:$4 sm:$0xff]   ;;  %v4389_v5 = vld [vmem:[%s6564_s3 + $0x1a4] ss:$8 sps:$4 sm:$0xff]  }
  0x1a   : > { %809 = vmatprep.subr.bf16.mxu1 %v4385_v1  ;;  %s399_s26 = scalar_select %p398_p13, %s5017_s30, 9  ;;  %761 = vmatpush1.bf16.msra.mxu0 %v4387_v3  ;;  %v4391_v6 = vld [vmem:[%s6564_s3 + $0x264] ss:$8 sps:$4 sm:$0xff]   ;;  %v4393_v7 = vld [vmem:[%s6564_s3 + $0x1a0] ss:$8 sps:$4 sm:$0xff]   ;;  %vm756_vm0 = vcmask 523264  }
  0x1b   : > { %810 = vmatpush1.bf16.msra.mxu1 %v4388_v4  ;;  %s5185_s20 = smul.u32 60, %s5172_s22  ;;  %762 = vmatprep.subr.bf16.mxu0 %v4389_v5  ;;  %v4394_v8 = vld [vmem:[%s6564_s3 + $0x260] ss:$8 sps:$4 sm:$0xff]   ;;  %v4395_v9 = vld [vmem:[%s6564_s3 + $0x194] ss:$8 sps:$4 sm:$0xff]   ;;  %s6596_s13 = smov (!%p408_p0, %s405_s13), 9 }
  0x1c   : > { %s4303_s24 = smul.u32 6, %s399_s26  ;;  %811 = vmatprep.subr.bf16.mxu1 %v4391_v6  ;;  %v4397_v10 = vld [vmem:[%s6564_s3 + $0x254] ss:$8 sps:$4 sm:$0xff]   ;;  %v4399_v11 = vld [vmem:[%s6564_s3 + $0x190] ss:$8 sps:$4 sm:$0xff]   ;;  %s6598_s25 = smov (!%p419_p1, %s416_s25), 9 }
  0x1d   : > { %v4400_v12 = vld [vmem:[%s6564_s3 + $0x250] ss:$8 sps:$4 sm:$0xff]   ;;  %v4401_v13 = vld [vmem:[%s6564_s3 + $0x184] ss:$8 sps:$4 sm:$0xff]   ;;  %v4405_v15 = vld [vmem:[%s6564_s3 + $0x180] ss:$8 sps:$4 sm:$0xff]  }
  0x1e   : > { %s402_s15 = sadd.s32 %s5185_s20, %s4303_s24  ;;  %763 = vmatpush1.bf16.msra.mxu0 %v4393_v7  ;;  %v4403_v14 = vld [vmem:[%s6564_s3 + $0x244] ss:$8 sps:$4 sm:$0xff]   ;;  %v4406_v16 = vld [vmem:[%s6564_s3 + $0x240] ss:$8 sps:$4 sm:$0xff]   ;;  %v4407_v17 = vld [vmem:[%s6564_s3 + $0x174] ss:$8 sps:$4 sm:$0xff]  }
  0x1f   : > { %812 = vmatpush1.bf16.msra.mxu1 %v4394_v8  ;;  %s3868_s11 = sshll.u32 %s402_s15, 2  ;;  %764 = vmatprep.subr.bf16.mxu0 %v4395_v9  ;;  %v4411_v18 = vld [vmem:[%s6564_s3 + $0x74] ss:$8 sps:$4 sm:$0xff]   ;;  %v4412_v22 = vld [vmem:[%s6564_s3 + $0x170] ss:$8 sps:$4 sm:$0xff]   ;;  %s4305_s23 = smul.u32 6, %s6596_s13 }
  0x20   : > { %813 = vmatprep.subr.bf16.mxu1 %v4397_v10  ;;  %s5212_s17 = scalar_lea.vmem %s6561_s0, %s3868_s11  ;;  %v4414_v25 = vld [vmem:[%s6564_s3 + $0x164] ss:$8 sps:$4 sm:$0xff]   ;;  %v4409_v27 = vld [vmem:[%s6564_s3 + $0x70] ss:$8 sps:$4 sm:$0xff]   ;;  %v4419_v30 = vld [vmem:[%s6564_s3 + $0x160] ss:$8 sps:$4 sm:$0xff]  }
  0x21   : > { %v5227_v19 = vld [vmem:[%s5212_s17 + $0x8] sm:$0xf]  ;;  %v439_v20 = vld [vmem:[%s5212_s17 + $0x14] sm:$0x1]  ;;  %v4418_v28 = vld [vmem:[%s6564_s3 + $0x64] ss:$8 sps:$4 sm:$0xff]   ;;  %s412_s13 = sadd.s32 %s4305_s23, %s5185_s20 }
  0x22   : > { %765 = vmatpush1.bf16.msra.mxu0 %v4399_v11  ;;  %v5231_v21 = vcombine.low %v5227_v19, %v439_v20  ;;  %v4420_v31 = vld [vmem:[%s6564_s3 + $0x154] ss:$8 sps:$4 sm:$0xff]   ;;  %v4416_v32 = vld [vmem:[%s6564_s3 + $0x60] ss:$8 sps:$4 sm:$0xff]   ;;  %v4425_v34 = vld [vmem:[%s6564_s3 + $0x150] ss:$8 sps:$4 sm:$0xff]  }
  0x23   : > { %814 = vmatpush1.bf16.msra.mxu1 %v4400_v12  ;;  %766 = vmatprep.subr.bf16.mxu0 %v4401_v13  ;;  %v4424_v33 = vld [vmem:[%s6564_s3 + $0x54] ss:$8 sps:$4 sm:$0xff]   ;;  %v4426_v35 = vld [vmem:[%s6564_s3 + $0x144] ss:$8 sps:$4 sm:$0xff]   ;;  %v4422_v36 = vld [vmem:[%s6564_s3 + $0x50] ss:$8 sps:$4 sm:$0xff]  }
  0x24   : > { %815 = vmatprep.subr.bf16.mxu1 %v4403_v14  ;;  %v548_v23 = vshrl.u32 %v5231_v21, 16  ;;  %v550_v24 = vshll.u32 %v5231_v21, 16  ;;  %v4430_v37 = vld [vmem:[%s6564_s3 + $0x44] ss:$8 sps:$4 sm:$0xff]   ;;  %v4431_v38 = vld [vmem:[%s6564_s3 + $0x140] ss:$8 sps:$4 sm:$0xff]  }
  0x25   : > { %v4432_v39 = vld [vmem:[%s6564_s3 + $0x234] ss:$8 sps:$4 sm:$0xff]   ;;  %v4428_v40 = vld [vmem:[%s6564_s3 + $0x40] ss:$8 sps:$4 sm:$0xff]   ;;  %v4437_v42 = vld [vmem:[%s6564_s3 + $0x230] ss:$8 sps:$4 sm:$0xff]  }
  0x26   : > { %767 = vmatpush1.bf16.msra.mxu0 %v4405_v15  ;;  %v552_v26 = vrot.slane %v550_v24, 1  ;;  %v4436_v41 = vld [vmem:[%s6564_s3 + $0x34] ss:$8 sps:$4 sm:$0xff]   ;;  %v4438_v43 = vld [vmem:[%s6564_s3 + $0x224] ss:$8 sps:$4 sm:$0xff]   ;;  %s3869_s21 = sshll.u32 %s412_s13, 2 }
  0x27   : > { %816 = vmatpush1.bf16.msra.mxu1 %v4406_v16  ;;  %768 = vmatprep.subr.bf16.mxu0 %v4407_v17  ;;  %v4434_v44 = vld [vmem:[%s6564_s3 + $0x30] ss:$8 sps:$4 sm:$0xff]   ;;  %v4442_v45 = vld [vmem:[%s6564_s3 + $0x24] ss:$8 sps:$4 sm:$0xff]   ;;  %v4443_v46 = vld [vmem:[%s6564_s3 + $0x220] ss:$8 sps:$4 sm:$0xff]   ;;  %s5577_s26 = scalar_lea.vmem %s6562_s1, %s3869_s21 }
  0x28   : > { %1050 = vmatprep.subr.bf16.mxu1 %v4411_v18  ;;  %v553_v29 = vor.u32 %v552_v26, %v548_v23  ;;  %v4444_v47 = vld [vmem:[%s6564_s3 + $0x214] ss:$8 sps:$4 sm:$0xff]   ;;  %v4440_v48 = vld [vmem:[%s6564_s3 + $0x20] ss:$8 sps:$4 sm:$0xff]   ;;  %v4449_v50 = vld [vmem:[%s6564_s3 + $0x210] ss:$8 sps:$4 sm:$0xff]  }
  0x29   : > { %v4448_v49 = vld [vmem:[%s6564_s3 + $0x14] ss:$8 sps:$4 sm:$0xff]   ;;  %v4450_v51 = vld [vmem:[%s6564_s3 + $0x204] ss:$8 sps:$4 sm:$0xff]   ;;  %v4446_v52 = vld [vmem:[%s6564_s3 + $0x10] ss:$8 sps:$4 sm:$0xff]  }
  0x2a   : > { %769 = vmatpush1.bf16.msra.mxu0 %v4412_v22  ;;  %3916 = vmatmul.mubr.msk.bf16.vlgmr.msra.gmra.mxu1 %vm756_vm0, %v553_v29  ;;  %v4454_v53 = vld [vmem:[%s6564_s3 + $0x4] ss:$8 sps:$4 sm:$0xff]   ;;  %v4455_v54 = vld [vmem:[%s6564_s3 + $0x200] ss:$8 sps:$4 sm:$0xff]   ;;  %v4456_v58 = vld [vmem:[%s6564_s3 + $0x1f4] ss:$8 sps:$4 sm:$0xff]  }
  0x2b   : > { %770 = vmatprep.subr.bf16.mxu0 %v4414_v25  ;;  %1051 = vmatpush1.bf16.msra.mxu1 %v4409_v27  ;;  %v5324_v55 = vld [vmem:[%s5212_s17] sm:$0xff]  ;;  %v438_v56 = vld [vmem:[%s5212_s17 + $0xc] sm:$0x11]  ;;  %v4460_v63 = vld [vmem:[%s6564_s3 + $0xf4] ss:$8 sps:$4 sm:$0xff]   ;;  %s4306_s16 = smul.u32 6, %s6598_s25 }
  0x2c   : > { %1052 = vmatprep.subr.bf16.mxu1 %v4418_v28  ;;  %v3918_v57 = vcombine.high %v5324_v55, %v5324_v55  ;;  %v3874_v59 = vcombine.high %v5324_v55, %v438_v56  ;;  %v4452_v60 = vld [vmem:[%s6564_s3] ss:$8 sps:$4 sm:$0xff]   ;;  %v4461_v0 = vld [vmem:[%s6564_s3 + $0x1f0] ss:$8 sps:$4 sm:$0xff]   ;;  %v4462_v1 = vld [vmem:[%s6564_s3 + $0x1e4] ss:$8 sps:$4 sm:$0xff]   ;;  %v5349_v5 = vcombine.low %v5324_v55, %v438_v56 }
  0x2d   : > { %v4458_v4 = vld [vmem:[%s6564_s3 + $0xf0] ss:$8 sps:$4 sm:$0xff]   ;;  %v4466_v7 = vld [vmem:[%s6564_s3 + $0xe4] ss:$8 sps:$4 sm:$0xff]   ;;  %v4467_v8 = vld [vmem:[%s6564_s3 + $0x1e0] ss:$8 sps:$4 sm:$0xff]   ;;  %s423_s17 = sadd.s32 %s4306_s16, %s5185_s20 }
  0x2e   : > { %771 = vmatpush1.bf16.msra.mxu0 %v4419_v30  ;;  %1082 = vmatprep.mubr.bf16.mxu1 %v3918_v57  ;;  %v541_v61 = vshrl.u32 %v3874_v59, 16  ;;  %v543_v62 = vshll.u32 %v3874_v59, 16  ;;  %v4468_v9 = vld [vmem:[%s6564_s3 + $0x1d4] ss:$8 sps:$4 sm:$0xff]   ;;  %v4464_v10 = vld [vmem:[%s6564_s3 + $0xe0] ss:$8 sps:$4 sm:$0xff]  }
  0x2f   : > { %772 = vmatprep.subr.bf16.mxu0 %v4420_v31  ;;  %1053 = vmatpush1.bf16.msra.mxu1 %v4416_v32  ;;  %v536_v11 = vshll.u32 %v5349_v5, 16  ;;  %v4472_v12 = vld [vmem:[%s6564_s3 + $0xd4] ss:$8 sps:$4 sm:$0xff]   ;;  %v4473_v13 = vld [vmem:[%s6564_s3 + $0x1d0] ss:$8 sps:$4 sm:$0xff]   ;;  %v534_v16 = vshrl.u32 %v5349_v5, 16 }
  0x30   : > { %1054 = vmatprep.subr.bf16.mxu1 %v4424_v33  ;;  %v545_v3 = vrot.slane %v543_v62, 1  ;;  %v4474_v14 = vld [vmem:[%s6564_s3 + $0x1c4] ss:$8 sps:$4 sm:$0xff]   ;;  %v4470_v15 = vld [vmem:[%s6564_s3 + $0xd0] ss:$8 sps:$4 sm:$0xff]   ;;  %v1173_v28 = vrot.slane %v3874_v59, 1  ;;  %v3919_v62 = vcombine.low %v5227_v19, %v5227_v19 }
  0x31   : > { %v538_v17 = vrot.slane %v536_v11, 1  ;;  %v4478_v18 = vld [vmem:[%s6564_s3 + $0xc4] ss:$8 sps:$4 sm:$0xff]   ;;  %v4479_v20 = vld [vmem:[%s6564_s3 + $0x1c0] ss:$8 sps:$4 sm:$0xff]   ;;  %s3870_s10 = sshll.u32 %s423_s17, 2 }
  0x32   : > { %773 = vmatpush1.bf16.msra.mxu0 %v4425_v34  ;;  %v546_v6 = vor.u32 %v545_v3, %v541_v61  ;;  %v4487_v22 = vld [vmem:[%s6564_s3 + $0x2f4] ss:$8 sps:$4 sm:$0xff]   ;;  %v4476_v23 = vld [vmem:[%s6564_s3 + $0xc0] ss:$8 sps:$4 sm:$0xff]   ;;  %v4485_v26 = vld [vmem:[%s6564_s3 + $0x2f0] ss:$8 sps:$4 sm:$0xff]   ;;  %s5931_s21 = scalar_lea.vmem %s6563_s2, %s3870_s10 }
  0x33   : > { %774 = vmatprep.subr.bf16.mxu0 %v4426_v35  ;;  %1055 = vmatpush1.bf16.msra.mxu1 %v4422_v36  ;;  %v539_v24 = vor.u32 %v538_v17, %v534_v16  ;;  %v4484_v25 = vld [vmem:[%s6564_s3 + $0xb4] ss:$8 sps:$4 sm:$0xff]   ;;  %v4493_v27 = vld [vmem:[%s6564_s3 + $0x2e4] ss:$8 sps:$4 sm:$0xff]   ;;  %v4482_v29 = vld [vmem:[%s6564_s3 + $0xb0] ss:$8 sps:$4 sm:$0xff]  }
  0x34   : > { %1056 = vmatprep.subr.bf16.mxu1 %v4430_v37  ;;  %792 = vmatprep.mubr.bf16.mxu0 %v546_v6  ;;  %v4490_v30 = vld [vmem:[%s6564_s3 + $0xa4] ss:$8 sps:$4 sm:$0xff]   ;;  %v4491_v31 = vld [vmem:[%s6564_s3 + $0x2e0] ss:$8 sps:$4 sm:$0xff]   ;;  %v4499_v32 = vld [vmem:[%s6564_s3 + $0x2d4] ss:$8 sps:$4 sm:$0xff]  }
  0x35   : > { %v4488_v33 = vld [vmem:[%s6564_s3 + $0xa0] ss:$8 sps:$4 sm:$0xff]   ;;  %v4496_v34 = vld [vmem:[%s6564_s3 + $0x94] ss:$8 sps:$4 sm:$0xff]   ;;  %v4497_v35 = vld [vmem:[%s6564_s3 + $0x2d0] ss:$8 sps:$4 sm:$0xff]  }
  0x36   : > { %775 = vmatpush1.bf16.msra.mxu0 %v4431_v38  ;;  %v4505_v36 = vld [vmem:[%s6564_s3 + $0x2c4] ss:$8 sps:$4 sm:$0xff]   ;;  %v4494_v37 = vld [vmem:[%s6564_s3 + $0x90] ss:$8 sps:$4 sm:$0xff]   ;;  %v4529_v56 = vld [vmem:[%s6564_s3 + $0x280] ss:$8 sps:$4 sm:$0xff]  }
  0x37   : > { %776 = vmatprep.subr.bf16.mxu0 %v4432_v39  ;;  %1057 = vmatpush1.bf16.msra.mxu1 %v4428_v40  ;;  %v4502_v38 = vld [vmem:[%s6564_s3 + $0x84] ss:$8 sps:$4 sm:$0xff]   ;;  %v4503_v39 = vld [vmem:[%s6564_s3 + $0x2c0] ss:$8 sps:$4 sm:$0xff]   ;;  %v4513_v40 = vld [vmem:[%s6564_s3 + $0x2b4] ss:$8 sps:$4 sm:$0xff]  }
  0x38   : > { %1058 = vmatprep.subr.bf16.mxu1 %v4436_v41  ;;  %v4500_v41 = vld [vmem:[%s6564_s3 + $0x80] ss:$8 sps:$4 sm:$0xff]   ;;  %v4535_v57 = vld [vmem:[%s6564_s3 + $0x374] ss:$8 sps:$4 sm:$0xff]   ;;  %v4533_v59 = vld [vmem:[%s6564_s3 + $0x370] ss:$8 sps:$4 sm:$0xff]  }
  0x39   : > { %v4541_v61 = vld [vmem:[%s6564_s3 + $0x364] ss:$8 sps:$4 sm:$0xff]   ;;  %v4547_v19 = vld [vmem:[%s6564_s3 + $0x354] ss:$8 sps:$4 sm:$0xff]   ;;  %v4542_v3 = vld [vmem:[%s6564_s3 + $0x3a0] ss:$8 sps:$4 sm:$0xff]  }
  0x3a   : > { %777 = vmatpush2.bf16.msra.mxu0 %v4437_v42  ;;  %v4510_v42 = vld [vmem:[%s6564_s3 + $0x134] ss:$8 sps:$4 sm:$0xff]   ;;  %v1174_v16 = vrot.slane %v5231_v21, 1  ;;  %v4560_v17 = vld [vmem:[%s6564_s3 + $0x430] ss:$8 sps:$4 sm:$0xff]   ;;  %s430_s17 = scalar_select %p429_p2, %s5017_s30, 7 }
  0x3b   : > { %778 = vmatprep.subr.bf16.mxu0 %v4438_v43  ;;  %1059 = vmatpush1.bf16.msra.mxu1 %v4434_v44  ;;  %v4511_v43 = vld [vmem:[%s6564_s3 + $0x2b0] ss:$8 sps:$4 sm:$0xff]   ;;  %v4519_v44 = vld [vmem:[%s6564_s3 + $0x2a4] ss:$8 sps:$4 sm:$0xff]   ;;  %v4550_v6 = vld [vmem:[%s6564_s3 + $0x394] ss:$8 sps:$4 sm:$0xff]  }
  0x3c   : > { %1060 = vmatprep.subr.bf16.mxu1 %v4442_v45  ;;  %v3917_v45 = vcombine.low %v5324_v55, %v5324_v55  ;;  %v4528_v55 = vld [vmem:[%s6564_s3 + $0x104] ss:$8 sps:$4 sm:$0xff]   ;;  %v4559_v11 = vld [vmem:[%s6564_s3 + $0x334] ss:$8 sps:$4 sm:$0xff]   ;;  %s3871_s11 = sshll.u32 %s5172_s22, 3  ;;  %vm3655_vm3 = vcmask 15360  }
  0x3d   : > { %v4571_v21 = vld [vmem:[%s6564_s3 + $0x314] ss:$8 sps:$4 sm:$0xff]   ;;  %s432_s14 = sadd.s32 %s3871_s11, %s430_s17  ;;  %s5037_s22 = smov 1  }
  0x3e   : > { %779 = vmatpush2.bf16.msra.mxu0 %v4443_v46  ;;  %v4508_v46 = vld [vmem:[%s6564_s3 + $0x130] ss:$8 sps:$4 sm:$0xff]   ;;  %s3872_s24 = sshll.u32 %s432_s14, 3  ;;  %s383_s10 = sand.u32 1, %s5009_s28  }
  0x3f   : > { %780 = vmatprep.subr.bf16.mxu0 %v4444_v47  ;;  %1061 = vmatpush1.bf16.msra.mxu1 %v4440_v48  ;;  %v4516_v47 = vld [vmem:[%s6564_s3 + $0x124] ss:$8 sps:$4 sm:$0xff]   ;;  %v4517_v48 = vld [vmem:[%s6564_s3 + $0x2a0] ss:$8 sps:$4 sm:$0xff]   ;;  %s434_s13 = scalar_lea.vmem %s6569_s8, %s3872_s24  ;;  %s3867_s25 = sshll.u32 %s383_s10, 4 }
  0x40   : > { %1062 = vmatprep.subr.bf16.mxu1 %v4448_v49  ;;  %v4525_v49 = vld [vmem:[%s6564_s3 + $0x294] ss:$8 sps:$4 sm:$0xff]   ;;  %s4264_s23 = sshll.u32 %s5021_s9, 4  ;;  %s385_s14 = scalar_lea.vmem [#allocation2], %s3867_s25 }
  0x41   : > { %s3699_s24 = sshll.u32 %s385_s14, 4  ;;  %s3675_s16 = scalar_lea.sflag [#allocation3], %s383_s10  ;;  %s3700_s24 = int_to_ptr.vmem [resolvable:$true] %s3699_s24 }
  0x42   : > { %781 = vmatpush2.bf16.msra.mxu0 %v4449_v50  ;;  %v4514_v50 = vld [vmem:[%s6564_s3 + $0x120] ss:$8 sps:$4 sm:$0xff]  }
  0x43   : > { %782 = vmatprep.subr.bf16.mxu0 %v4450_v51  ;;  %1063 = vmatpush1.bf16.msra.mxu1 %v4446_v52  ;;  %v4522_v51 = vld [vmem:[%s6564_s3 + $0x114] ss:$8 sps:$4 sm:$0xff]   ;;  %v4523_v52 = vld [vmem:[%s6564_s3 + $0x290] ss:$8 sps:$4 sm:$0xff]  }
  0x44   : > { %1064 = vmatprep.subr.bf16.mxu1 %v4454_v53  ;;  %v4531_v53 = vld [vmem:[%s6564_s3 + $0x284] ss:$8 sps:$4 sm:$0xff]  }
  0x46   : > { %783 = vmatpush2.bf16.msra.mxu0 %v4455_v54  ;;  %v4520_v54 = vld [vmem:[%s6564_s3 + $0x110] ss:$8 sps:$4 sm:$0xff]  }
  0x47   : > { %784 = vmatprep.subr.bf16.mxu0 %v4456_v58  ;;  %1065 = vmatpush1.bf16.msra.mxu1 %v4452_v60  ;;  %v4526_v58 = vld [vmem:[%s6564_s3 + $0x100] ss:$8 sps:$4 sm:$0xff]   ;;  %v4538_v60 = vld [vmem:[%s6564_s3 + $0x3b4] ss:$8 sps:$4 sm:$0xff]  }
  0x48   : > { %1066 = vmatprep.subr.bf16.mxu1 %v4460_v63  ;;  %v4536_v63 = vld [vmem:[%s6564_s3 + $0x3b0] ss:$8 sps:$4 sm:$0xff]  }
  0x4a   : > { %785 = vmatpush2.bf16.msra.mxu0 %v4461_v0  ;;  %v4539_v0 = vld [vmem:[%s6564_s3 + $0x360] ss:$8 sps:$4 sm:$0xff]  }
  0x4b   : > { %786 = vmatprep.subr.bf16.mxu0 %v4462_v1  ;;  %1067 = vmatpush2.bf16.msra.mxu1 %v4458_v4  ;;  %v4544_v1 = vld [vmem:[%s6564_s3 + $0x3a4] ss:$8 sps:$4 sm:$0xff]   ;;  %v4545_v4 = vld [vmem:[%s6564_s3 + $0x350] ss:$8 sps:$4 sm:$0xff]  }
  0x4c   : > { %1068 = vmatprep.subr.bf16.mxu1 %v4466_v7  ;;  %v4553_v7 = vld [vmem:[%s6564_s3 + $0x344] ss:$8 sps:$4 sm:$0xff]  }
  0x4e   : > { %787 = vmatpush2.bf16.msra.mxu0 %v4467_v8  ;;  %v4548_v8 = vld [vmem:[%s6564_s3 + $0x390] ss:$8 sps:$4 sm:$0xff]  }
  0x4f   : > { %788 = vmatprep.subr.bf16.mxu0 %v4468_v9  ;;  %1069 = vmatpush2.bf16.msra.mxu1 %v4464_v10  ;;  %v4551_v9 = vld [vmem:[%s6564_s3 + $0x340] ss:$8 sps:$4 sm:$0xff]   ;;  %v4556_v10 = vld [vmem:[%s6564_s3 + $0x384] ss:$8 sps:$4 sm:$0xff]  }
  0x50   : > { %1070 = vmatprep.subr.bf16.mxu1 %v4472_v12  ;;  %v4554_v12 = vld [vmem:[%s6564_s3 + $0x380] ss:$8 sps:$4 sm:$0xff]  }
  0x52   : > { %789 = vmatpush2.bf16.msra.mxu0 %v4473_v13  ;;  %v4557_v13 = vld [vmem:[%s6564_s3 + $0x330] ss:$8 sps:$4 sm:$0xff]  }
  0x53   : > { %790 = vmatprep.subr.bf16.mxu0 %v4474_v14  ;;  %1071 = vmatpush2.bf16.msra.mxu1 %v4470_v15  ;;  %v4562_v14 = vld [vmem:[%s6564_s3 + $0x434] ss:$8 sps:$4 sm:$0xff]   ;;  %v4565_v15 = vld [vmem:[%s6564_s3 + $0x324] ss:$8 sps:$4 sm:$0xff]  }
  0x54   : > { %1072 = vmatprep.subr.bf16.mxu1 %v4478_v18  ;;  %v4563_v18 = vld [vmem:[%s6564_s3 + $0x320] ss:$8 sps:$4 sm:$0xff]  }
  0x56   : > { %791 = vmatpush2.bf16.msra.mxu0 %v4479_v20  ;;  %v4568_v20 = vld [vmem:[%s6564_s3 + $0x424] ss:$8 sps:$4 sm:$0xff]  }
  0x57   : > { %1380 = vmatprep.subr.bf16.mxu0 %v4487_v22  ;;  %1073 = vmatpush2.bf16.msra.mxu1 %v4476_v23  ;;  %v4566_v22 = vld [vmem:[%s6564_s3 + $0x420] ss:$8 sps:$4 sm:$0xff]   ;;  %v4569_v23 = vld [vmem:[%s6564_s3 + $0x310] ss:$8 sps:$4 sm:$0xff]  }
  0x58   : > { %1074 = vmatprep.subr.bf16.mxu1 %v4484_v25  ;;  %v5580_v25 = vld [vmem:[%s5577_s26] sm:$0xff] }
  0x59   : > { %793 = vmatmul.mubr.bf16.vlgmr.msra.gmra.mxu0 %v539_v24  ;;  %v4574_v24 = vld [vmem:[%s6564_s3 + $0x414] ss:$8 sps:$4 sm:$0xff]  }
  0x5a   : > { %1381 = vmatpush1.bf16.msra.mxu0 %v4485_v26  ;;  %1412 = vmatprep.mubr.bf16.mxu0 %v1173_v28  ;;  %v4577_v26 = vld [vmem:[%s6564_s3 + $0x304] ss:$8 sps:$4 sm:$0xff]   ;;  %v4572_v28 = vld [vmem:[%s6564_s3 + $0x410] ss:$8 sps:$4 sm:$0xff]  }
  0x5b   : > { %1382 = vmatprep.subr.bf16.mxu0 %v4493_v27  ;;  %1075 = vmatpush2.bf16.msra.mxu1 %v4482_v29  ;;  %v4003_v27 = vcombine.high %v5580_v25, %v5580_v25  ;;  %v4575_v29 = vld [vmem:[%s6564_s3 + $0x300] ss:$8 sps:$4 sm:$0xff]  }
  0x5c   : > { %1076 = vmatprep.subr.bf16.mxu1 %v4490_v30  ;;  %v4580_v30 = vld [vmem:[%s6564_s3 + $0x404] ss:$8 sps:$4 sm:$0xff]  }
  0x5e   : > { %1383 = vmatpush1.bf16.msra.mxu0 %v4491_v31  ;;  %v4586_v31 = vld [vmem:[%s6564_s3 + $0x4f4] ss:$8 sps:$4 sm:$0xff]  }
  0x5f   : > { %1384 = vmatprep.subr.bf16.mxu0 %v4499_v32  ;;  %1077 = vmatpush2.bf16.msra.mxu1 %v4488_v33  ;;  %v4578_v32 = vld [vmem:[%s6564_s3 + $0x400] ss:$8 sps:$4 sm:$0xff]   ;;  %v1172_v33 = vrot.slane %v5349_v5, 1  ;;  %v4589_v5 = vld [vmem:[%s6564_s3 + $0x3e4] ss:$8 sps:$4 sm:$0xff]  }
  0x60   : > { %1078 = vmatprep.subr.bf16.mxu1 %v4496_v34  ;;  %v4583_v34 = vld [vmem:[%s6564_s3 + $0x3f4] ss:$8 sps:$4 sm:$0xff]  }
  0x62   : > { %1385 = vmatpush1.bf16.msra.mxu0 %v4497_v35  ;;  %v4584_v35 = vld [vmem:[%s6564_s3 + $0x4f0] ss:$8 sps:$4 sm:$0xff]  }
  0x63   : > { %1386 = vmatprep.subr.bf16.mxu0 %v4505_v36  ;;  %1079 = vmatpush2.bf16.msra.mxu1 %v4494_v37  ;;  %v4592_v36 = vld [vmem:[%s6564_s3 + $0x4e4] ss:$8 sps:$4 sm:$0xff]   ;;  %v4581_v37 = vld [vmem:[%s6564_s3 + $0x3f0] ss:$8 sps:$4 sm:$0xff]  }
  0x64   : > { %1080 = vmatprep.subr.bf16.mxu1 %v4502_v38  ;;  %v4590_v38 = vld [vmem:[%s6564_s3 + $0x4e0] ss:$8 sps:$4 sm:$0xff]  }
  0x66   : > { %1387 = vmatpush1.bf16.msra.mxu0 %v4503_v39  ;;  %v4598_v39 = vld [vmem:[%s6564_s3 + $0x4d4] ss:$8 sps:$4 sm:$0xff]  }
  0x67   : > { %1388 = vmatprep.subr.bf16.mxu0 %v4513_v40  ;;  %1081 = vmatpush2.bf16.msra.mxu1 %v4500_v41  ;;  %v4587_v40 = vld [vmem:[%s6564_s3 + $0x3e0] ss:$8 sps:$4 sm:$0xff]   ;;  %v4595_v41 = vld [vmem:[%s6564_s3 + $0x3d4] ss:$8 sps:$4 sm:$0xff]  }
  0x68   : > { %1099 = vmatprep.subr.bf16.mxu1 %v4510_v42  ;;  %v4596_v42 = vld [vmem:[%s6564_s3 + $0x4d0] ss:$8 sps:$4 sm:$0xff]  }
  0x6a   : > { %1389 = vmatpush1.bf16.msra.mxu0 %v4511_v43  ;;  %1083 = vmatmul.mubr.bf16.vlgmr.msra.gmra.mxu1 %v3917_v45  ;;  %v4604_v43 = vld [vmem:[%s6564_s3 + $0x4c4] ss:$8 sps:$4 sm:$0xff]  }
  0x6b   : > { %1390 = vmatprep.subr.bf16.mxu0 %v4519_v44  ;;  %1100 = vmatpush1.bf16.msra.mxu1 %v4508_v46  ;;  %v4593_v44 = vld [vmem:[%s6564_s3 + $0x3d0] ss:$8 sps:$4 sm:$0xff]   ;;  %v4601_v45 = vld [vmem:[%s6564_s3 + $0x3c4] ss:$8 sps:$4 sm:$0xff]   ;;  %v4602_v46 = vld [vmem:[%s6564_s3 + $0x4c0] ss:$8 sps:$4 sm:$0xff]  }
  0x6c   : > { %1123 = vmatprep.mubr.bf16.mxu1 %v5035_v2  ;;  %1101 = vmatprep.subr.bf16.mxu1 %v4516_v47  ;;  %v5647_v47 = vld [vmem:[%s5577_s26 + $0x8] sm:$0xf] }
  0x6e   : > { %1391 = vmatpush1.bf16.msra.mxu0 %v4517_v48  ;;  %v4612_v48 = vld [vmem:[%s6564_s3 + $0x574] ss:$8 sps:$4 sm:$0xff]  }
  0x6f   : > { %1392 = vmatprep.subr.bf16.mxu0 %v4525_v49  ;;  %1102 = vmatpush1.bf16.msra.mxu1 %v4514_v50  ;;  %v5653_v49 = vld [vmem:[%s5577_s26 + $0xc] sm:$0x11] }
  0x70   : > { %1103 = vmatprep.subr.bf16.mxu1 %v4522_v51  ;;  %v5657_v50 = vcombine.high %v5580_v25, %v5653_v49  ;;  %v4599_v51 = vld [vmem:[%s6564_s3 + $0x3c0] ss:$8 sps:$4 sm:$0xff]  }
  0x72   : > { %1393 = vmatpush1.bf16.msra.mxu0 %v4523_v52  ;;  %v4004_v52 = vcombine.low %v5647_v47, %v5647_v47 }
  0x73   : > { %1394 = vmatprep.subr.bf16.mxu0 %v4531_v53  ;;  %1104 = vmatpush1.bf16.msra.mxu1 %v4520_v54  ;;  %v4607_v53 = vld [vmem:[%s6564_s3 + $0x4b4] ss:$8 sps:$4 sm:$0xff]   ;;  %v4610_v54 = vld [vmem:[%s6564_s3 + $0x570] ss:$8 sps:$4 sm:$0xff]  }
  0x74   : > { %1105 = vmatprep.subr.bf16.mxu1 %v4528_v55  ;;  %v1861_v55 = vshrl.u32 %v5657_v50, 16 }
  0x76   : > { %1395 = vmatpush1.bf16.msra.mxu0 %v4529_v56  ;;  %v1863_v56 = vshll.u32 %v5657_v50, 16 }
  0x77   : > { %1396 = vmatprep.subr.bf16.mxu0 %v4535_v57  ;;  %1106 = vmatpush1.bf16.msra.mxu1 %v4526_v58  ;;  %v4618_v57 = vld [vmem:[%s6564_s3 + $0x564] ss:$8 sps:$4 sm:$0xff]   ;;  %v4605_v58 = vld [vmem:[%s6564_s3 + $0x4b0] ss:$8 sps:$4 sm:$0xff]  }
  0x78   : > { %1429 = vmatprep.subr.bf16.mxu1 %v4538_v60  ;;  %v4615_v60 = vld [vmem:[%s6564_s3 + $0x4a4] ss:$8 sps:$4 sm:$0xff]  }
  0x7a   : > { %1397 = vmatpush2.bf16.msra.mxu0 %v4533_v59  ;;  %3960 = vmatmul.mubr.msk.bf16.vlgmr.msra.gmra.mxu1 %vm756_vm0, %v3919_v62  ;;  %v1865_v59 = vrot.slane %v1863_v56, 1  ;;  %v5834_v56 = vcombine.low %v5580_v25, %v5653_v49  ;;  %v4693_v49 = vld [vmem:[%s6564_s3 + $0x590] ss:$8 sps:$4 sm:$0xff]  }
  0x7b   : > { %1398 = vmatprep.subr.bf16.mxu0 %v4541_v61  ;;  %1430 = vmatpush1.bf16.msra.mxu1 %v4536_v63  ;;  %v4616_v61 = vld [vmem:[%s6564_s3 + $0x560] ss:$8 sps:$4 sm:$0xff]   ;;  %v4624_v63 = vld [vmem:[%s6564_s3 + $0x554] ss:$8 sps:$4 sm:$0xff]  }
  0x7c   : > { %1453 = vmatprep.mubr.bf16.mxu1 %v5035_v2  ;;  %1431 = vmatprep.subr.bf16.mxu1 %v4544_v1  ;;  %v1866_v62 = vor.u32 %v1865_v59, %v1861_v55  ;;  %v4621_v1 = vld [vmem:[%s6564_s3 + $0x494] ss:$8 sps:$4 sm:$0xff]   ;;  %v4684_v55 = vld [vmem:[%s6564_s3 + $0x6b0] ss:$8 sps:$4 sm:$0xff]   ;;  %v4692_v59 = vld [vmem:[%s6564_s3 + $0x6a4] ss:$8 sps:$4 sm:$0xff]  }
  0x7e   : > { %1399 = vmatpush2.bf16.msra.mxu0 %v4539_v0  ;;  %v4613_v0 = vld [vmem:[%s6564_s3 + $0x4a0] ss:$8 sps:$4 sm:$0xff]  }
  0x7f   : > { %1400 = vmatprep.subr.bf16.mxu0 %v4547_v19  ;;  %1432 = vmatpush1.bf16.msra.mxu1 %v4542_v3  ;;  %v4622_v19 = vld [vmem:[%s6564_s3 + $0x550] ss:$8 sps:$4 sm:$0xff]   ;;  %v4630_v3 = vld [vmem:[%s6564_s3 + $0x544] ss:$8 sps:$4 sm:$0xff]  }
  0x80   : > { %1433 = vmatprep.subr.bf16.mxu1 %v4550_v6  ;;  %v4627_v6 = vld [vmem:[%s6564_s3 + $0x484] ss:$8 sps:$4 sm:$0xff]  }
  0x82   : > { %1401 = vmatpush2.bf16.msra.mxu0 %v4545_v4  ;;  %v4619_v4 = vld [vmem:[%s6564_s3 + $0x490] ss:$8 sps:$4 sm:$0xff]  }
  0x83   : > { %1402 = vmatprep.subr.bf16.mxu0 %v4553_v7  ;;  %1434 = vmatpush1.bf16.msra.mxu1 %v4548_v8  ;;  %v4628_v7 = vld [vmem:[%s6564_s3 + $0x540] ss:$8 sps:$4 sm:$0xff]   ;;  %v4636_v8 = vld [vmem:[%s6564_s3 + $0x534] ss:$8 sps:$4 sm:$0xff]  }
  0x84   : > { %1435 = vmatprep.subr.bf16.mxu1 %v4556_v10  ;;  %v4633_v10 = vld [vmem:[%s6564_s3 + $0x474] ss:$8 sps:$4 sm:$0xff]  }
  0x86   : > { %1403 = vmatpush2.bf16.msra.mxu0 %v4551_v9  ;;  %v4625_v9 = vld [vmem:[%s6564_s3 + $0x480] ss:$8 sps:$4 sm:$0xff]  }
  0x87   : > { %1404 = vmatprep.subr.bf16.mxu0 %v4559_v11  ;;  %1436 = vmatpush1.bf16.msra.mxu1 %v4554_v12  ;;  %v4634_v11 = vld [vmem:[%s6564_s3 + $0x530] ss:$8 sps:$4 sm:$0xff]   ;;  %v4642_v12 = vld [vmem:[%s6564_s3 + $0x524] ss:$8 sps:$4 sm:$0xff]  }
  0x88   : > { %1721 = vmatprep.subr.bf16.mxu1 %v4562_v14  ;;  %v4639_v14 = vld [vmem:[%s6564_s3 + $0x464] ss:$8 sps:$4 sm:$0xff]  }
  0x8a   : > { %1405 = vmatpush2.bf16.msra.mxu0 %v4557_v13  ;;  %4001 = vmatmul.mubr.msk.bf16.vlgmr.msra.gmra.mxu1 %vm756_vm0, %v1174_v16  ;;  %v4631_v13 = vld [vmem:[%s6564_s3 + $0x470] ss:$8 sps:$4 sm:$0xff]   ;;  %v4648_v16 = vld [vmem:[%s6564_s3 + $0x514] ss:$8 sps:$4 sm:$0xff]  }
  0x8b   : > { %1406 = vmatprep.subr.bf16.mxu0 %v4565_v15  ;;  %1722 = vmatpush1.bf16.msra.mxu1 %v4560_v17  ;;  %v4640_v15 = vld [vmem:[%s6564_s3 + $0x520] ss:$8 sps:$4 sm:$0xff]  }
  0x8c   : > { %1723 = vmatprep.subr.bf16.mxu1 %v4568_v20  ;;  %1753 = vmatprep.mubr.bf16.mxu1 %v4003_v27  ;;  %v4637_v17 = vld [vmem:[%s6564_s3 + $0x460] ss:$8 sps:$4 sm:$0xff]   ;;  %v4646_v20 = vld [vmem:[%s6564_s3 + $0x510] ss:$8 sps:$4 sm:$0xff]  }
  0x8d   : > { %v4649_v27 = vld [vmem:[%s6564_s3 + $0x440] ss:$8 sps:$4 sm:$0xff]  }
  0x8e   : > { %1407 = vmatpush2.bf16.msra.mxu0 %v4563_v18  ;;  %v4645_v18 = vld [vmem:[%s6564_s3 + $0x454] ss:$8 sps:$4 sm:$0xff]  }
  0x8f   : > { %1408 = vmatprep.subr.bf16.mxu0 %v4571_v21  ;;  %1724 = vmatpush1.bf16.msra.mxu1 %v4566_v22  ;;  %v4654_v21 = vld [vmem:[%s6564_s3 + $0x504] ss:$8 sps:$4 sm:$0xff]   ;;  %v4643_v22 = vld [vmem:[%s6564_s3 + $0x450] ss:$8 sps:$4 sm:$0xff]  }
  0x90   : > { %1725 = vmatprep.subr.bf16.mxu1 %v4574_v24  ;;  %v4652_v24 = vld [vmem:[%s6564_s3 + $0x500] ss:$8 sps:$4 sm:$0xff]  }
  0x92   : > { %1409 = vmatpush2.bf16.msra.mxu0 %v4569_v23  ;;  %v4651_v23 = vld [vmem:[%s6564_s3 + $0x444] ss:$8 sps:$4 sm:$0xff]  }
  0x93   : > { %1410 = vmatprep.subr.bf16.mxu0 %v4577_v26  ;;  %1726 = vmatpush1.bf16.msra.mxu1 %v4572_v28  ;;  %v4659_v26 = vld [vmem:[%s6564_s3 + $0x5f4] ss:$8 sps:$4 sm:$0xff]   ;;  %v4657_v28 = vld [vmem:[%s6564_s3 + $0x5f0] ss:$8 sps:$4 sm:$0xff]  }
  0x94   : > { %1727 = vmatprep.subr.bf16.mxu1 %v4580_v30  ;;  %v4665_v30 = vld [vmem:[%s6564_s3 + $0x5e4] ss:$8 sps:$4 sm:$0xff]  }
  0x96   : > { %1411 = vmatpush2.bf16.msra.mxu0 %v4575_v29  ;;  %v4662_v29 = vld [vmem:[%s6564_s3 + $0x634] ss:$8 sps:$4 sm:$0xff]  }
  0x97   : > { %1770 = vmatprep.subr.bf16.mxu0 %v4586_v31  ;;  %1728 = vmatpush1.bf16.msra.mxu1 %v4578_v32  ;;  %v1467_v31 = vld [vmem:[%s5577_s26 + $0x14] sm:$0x1]  ;;  %v4002_v32 = vcombine.low %v5580_v25, %v5580_v25  ;;  %v4690_v25 = vld [vmem:[%s6564_s3 + $0x6a0] ss:$8 sps:$4 sm:$0xff]   ;;  %s4263_s26 = sshll.u32 %s5017_s30, 1  ;;  %s5039_s30 = smov [#allocation2]  }
  0x98   : > { %1729 = vmatprep.subr.bf16.mxu1 %v4583_v34  ;;  %v4663_v34 = vld [vmem:[%s6564_s3 + $0x5e0] ss:$8 sps:$4 sm:$0xff]   ;;  %s3695_s17 = sadd.s32 %s4264_s23, %s4263_s26  ;;  %s4945_s9 = sshll.u32 %s5039_s30, 4  ;;  %s4946_s9 = int_to_ptr.vmem [resolvable:$false] %s4945_s9 }
  0x99   : > { %1413 = vmatmul.mubr.bf16.vlgmr.msra.gmra.mxu0 %v1172_v33  ;;  %v4660_v33 = vld [vmem:[%s6564_s3 + $0x630] ss:$8 sps:$4 sm:$0xff]   ;;  %s4265_s11 = sshll.u32 %s3695_s17, 7  ;;  %p4948_p7 = scmp.lt.s32.totalorder %s3700_s24, %s4946_s9 }
  0x9a   : > { %1771 = vmatpush1.bf16.msra.mxu0 %v4584_v35  ;;  %1794 = vmatprep.mubr.bf16.mxu0 %v5035_v2  ;;  %v4668_v35 = vld [vmem:[%s6564_s3 + $0x624] ss:$8 sps:$4 sm:$0xff]  }
  0x9b   : > { %1772 = vmatprep.subr.bf16.mxu0 %v4592_v36  ;;  %1730 = vmatpush1.bf16.msra.mxu1 %v4581_v37  ;;  %v4671_v36 = vld [vmem:[%s6564_s3 + $0x5d4] ss:$8 sps:$4 sm:$0xff]   ;;  %v5788_v37 = vcombine.low %v5647_v47, %v1467_v31 }
  0x9c   : > { %1731 = vmatprep.subr.bf16.mxu1 %v4589_v5  ;;  %v4666_v5 = vld [vmem:[%s6564_s3 + $0x620] ss:$8 sps:$4 sm:$0xff]   ;;  %v4733_v31 = vld [vmem:[%s6564_s3 + $0x734] ss:$8 sps:$4 sm:$0xff]  }
  0x9e   : > { %1773 = vmatpush1.bf16.msra.mxu0 %v4590_v38  ;;  %v4669_v38 = vld [vmem:[%s6564_s3 + $0x5d0] ss:$8 sps:$4 sm:$0xff]  }
  0x9f   : > { %1774 = vmatprep.subr.bf16.mxu0 %v4598_v39  ;;  %1732 = vmatpush1.bf16.msra.mxu1 %v4587_v40  ;;  %v4674_v39 = vld [vmem:[%s6564_s3 + $0x614] ss:$8 sps:$4 sm:$0xff]   ;;  %v4677_v40 = vld [vmem:[%s6564_s3 + $0x5c4] ss:$8 sps:$4 sm:$0xff]  }
  0xa0   : > { %1733 = vmatprep.subr.bf16.mxu1 %v4595_v41  ;;  %v1870_v41 = vshll.u32 %v5788_v37, 16 }
  0xa2   : > { %1775 = vmatpush1.bf16.msra.mxu0 %v4596_v42  ;;  %v4672_v42 = vld [vmem:[%s6564_s3 + $0x610] ss:$8 sps:$4 sm:$0xff]   ;;  %v1872_v47 = vrot.slane %v1870_v41, 1 }
  0xa3   : > { %1776 = vmatprep.subr.bf16.mxu0 %v4604_v43  ;;  %1734 = vmatpush1.bf16.msra.mxu1 %v4593_v44  ;;  %v4675_v43 = vld [vmem:[%s6564_s3 + $0x5c0] ss:$8 sps:$4 sm:$0xff]   ;;  %v4680_v44 = vld [vmem:[%s6564_s3 + $0x604] ss:$8 sps:$4 sm:$0xff]   ;;  %v4746_v41 = vld [vmem:[%s6564_s3 + $0x7d0] ss:$8 sps:$4 sm:$0xff]  }
  0xa4   : > { %1735 = vmatprep.subr.bf16.mxu1 %v4601_v45  ;;  %v4683_v45 = vld [vmem:[%s6564_s3 + $0x5b4] ss:$8 sps:$4 sm:$0xff]  }
  0xa6   : > { %1777 = vmatpush1.bf16.msra.mxu0 %v4602_v46  ;;  %v1868_v46 = vshrl.u32 %v5788_v37, 16 }
  0xa7   : > { %2079 = vmatprep.subr.bf16.mxu0 %v4612_v48  ;;  %1736 = vmatpush1.bf16.msra.mxu1 %v4599_v51  ;;  %v4678_v48 = vld [vmem:[%s6564_s3 + $0x600] ss:$8 sps:$4 sm:$0xff]   ;;  %v4681_v51 = vld [vmem:[%s6564_s3 + $0x5b0] ss:$8 sps:$4 sm:$0xff]  }
  0xa8   : > { %1737 = vmatprep.subr.bf16.mxu1 %v4607_v53  ;;  %v4689_v53 = vld [vmem:[%s6564_s3 + $0x5a4] ss:$8 sps:$4 sm:$0xff]  }
  0xa9   : > { %4045 = vmatmul.mubr.msk.bf16.vlgmr.msra.gmra.mxu0 %vm756_vm0, %v4004_v52  ;;  %v4686_v52 = vld [vmem:[%s6564_s3 + $0x6b4] ss:$8 sps:$4 sm:$0xff]  }
  0xaa   : > { %2080 = vmatpush1.bf16.msra.mxu0 %v4610_v54  ;;  %2111 = vmatprep.mubr.bf16.mxu0 %v1866_v62  ;;  %v1873_v54 = vor.u32 %v1872_v47, %v1868_v46  ;;  %v4701_v62 = vld [vmem:[%s6564_s3 + $0x584] ss:$8 sps:$4 sm:$0xff]   ;;  %v4760_v46 = vld [vmem:[%s6564_s3 + $0x7b4] ss:$8 sps:$4 sm:$0xff]   ;;  %v4749_v47 = vld [vmem:[%s6564_s3 + $0x700] ss:$8 sps:$4 sm:$0xff]  }
  0xab   : > { %2081 = vmatprep.subr.bf16.mxu0 %v4618_v57  ;;  %1738 = vmatpush2.bf16.msra.mxu1 %v4605_v58  ;;  %v2204_v57 = vrot.slane %v5657_v50, 1  ;;  %v4687_v58 = vld [vmem:[%s6564_s3 + $0x5a0] ss:$8 sps:$4 sm:$0xff]   ;;  %v1856_v50 = vshll.u32 %v5834_v56, 16 }
  0xac   : > { %1739 = vmatprep.subr.bf16.mxu1 %v4615_v60  ;;  %v4695_v60 = vld [vmem:[%s6564_s3 + $0x594] ss:$8 sps:$4 sm:$0xff]  }
  0xae   : > { %2082 = vmatpush1.bf16.msra.mxu0 %v4616_v61  ;;  %v4698_v61 = vld [vmem:[%s6564_s3 + $0x694] ss:$8 sps:$4 sm:$0xff]  }
  0xaf   : > { %2083 = vmatprep.subr.bf16.mxu0 %v4624_v63  ;;  %1740 = vmatpush2.bf16.msra.mxu1 %v4613_v0  ;;  %v4696_v63 = vld [vmem:[%s6564_s3 + $0x690] ss:$8 sps:$4 sm:$0xff]   ;;  %v4699_v0 = vld [vmem:[%s6564_s3 + $0x580] ss:$8 sps:$4 sm:$0xff]  }
  0xb0   : > { %1741 = vmatprep.subr.bf16.mxu1 %v4621_v1  ;;  %v1854_v1 = vshrl.u32 %v5834_v56, 16 }
  0xb2   : > { %2084 = vmatpush1.bf16.msra.mxu0 %v4622_v19  ;;  %v1858_v19 = vrot.slane %v1856_v50, 1  ;;  %v4775_v50 = vld [vmem:[%s6564_s3 + $0x6c4] ss:$8 sps:$4 sm:$0xff]  }
  0xb3   : > { %2085 = vmatprep.subr.bf16.mxu0 %v4630_v3  ;;  %1742 = vmatpush2.bf16.msra.mxu1 %v4619_v4  ;;  %v4704_v3 = vld [vmem:[%s6564_s3 + $0x684] ss:$8 sps:$4 sm:$0xff]   ;;  %v4712_v4 = vld [vmem:[%s6564_s3 + $0x774] ss:$8 sps:$4 sm:$0xff]  }
  0xb4   : > { %1743 = vmatprep.subr.bf16.mxu1 %v4627_v6  ;;  %v4702_v6 = vld [vmem:[%s6564_s3 + $0x680] ss:$8 sps:$4 sm:$0xff]  }
  0xb6   : > { %2086 = vmatpush1.bf16.msra.mxu0 %v4628_v7  ;;  %v1859_v7 = vor.u32 %v1858_v19, %v1854_v1  ;;  %v4784_v1 = vld [vmem:[%s6564_s3 + $0x8b4] ss:$8 sps:$4 sm:$0xff]   ;;  %v4787_v19 = vld [vmem:[%s6564_s3 + $0x864] ss:$8 sps:$4 sm:$0xff]  }
  0xb7   : > { %2087 = vmatprep.subr.bf16.mxu0 %v4636_v8  ;;  %1744 = vmatpush2.bf16.msra.mxu1 %v4625_v9  ;;  %v4709_v8 = vld [vmem:[%s6564_s3 + $0x674] ss:$8 sps:$4 sm:$0xff]   ;;  %v4710_v9 = vld [vmem:[%s6564_s3 + $0x770] ss:$8 sps:$4 sm:$0xff]  }
  0xb8   : > { %1745 = vmatprep.subr.bf16.mxu1 %v4633_v10  ;;  %v4718_v10 = vld [vmem:[%s6564_s3 + $0x764] ss:$8 sps:$4 sm:$0xff]  }
  0xba   : > { %2088 = vmatpush1.bf16.msra.mxu0 %v4634_v11  ;;  %v4707_v11 = vld [vmem:[%s6564_s3 + $0x670] ss:$8 sps:$4 sm:$0xff]  }
  0xbb   : > { %2089 = vmatprep.subr.bf16.mxu0 %v4642_v12  ;;  %1746 = vmatpush2.bf16.msra.mxu1 %v4631_v13  ;;  %v4715_v12 = vld [vmem:[%s6564_s3 + $0x664] ss:$8 sps:$4 sm:$0xff]   ;;  %v4716_v13 = vld [vmem:[%s6564_s3 + $0x760] ss:$8 sps:$4 sm:$0xff]  }
  0xbc   : > { %1747 = vmatprep.subr.bf16.mxu1 %v4639_v14  ;;  %v4724_v14 = vld [vmem:[%s6564_s3 + $0x754] ss:$8 sps:$4 sm:$0xff]  }
  0xbe   : > { %2090 = vmatpush1.bf16.msra.mxu0 %v4640_v15 }
  0xbf   : > { %2091 = vmatprep.subr.bf16.mxu0 %v4648_v16  ;;  %1748 = vmatpush2.bf16.msra.mxu1 %v4637_v17  ;;  %v4713_v16 = vld [vmem:[%s6564_s3 + $0x660] ss:$8 sps:$4 sm:$0xff]   ;;  %v4721_v17 = vld [vmem:[%s6564_s3 + $0x654] ss:$8 sps:$4 sm:$0xff]  }
  0xc0   : > { %1749 = vmatprep.subr.bf16.mxu1 %v4645_v18  ;;  %v4722_v18 = vld [vmem:[%s6564_s3 + $0x750] ss:$8 sps:$4 sm:$0xff]  }
  0xc2   : > { %2092 = vmatpush1.bf16.msra.mxu0 %v4646_v20 }
  0xc3   : > { %2093 = vmatprep.subr.bf16.mxu0 %v4654_v21  ;;  %1750 = vmatpush2.bf16.msra.mxu1 %v4643_v22  ;;  %v4730_v21 = vld [vmem:[%s6564_s3 + $0x744] ss:$8 sps:$4 sm:$0xff]  }
  0xc4   : > { %1751 = vmatprep.subr.bf16.mxu1 %v4651_v23  ;;  %v4719_v23 = vld [vmem:[%s6564_s3 + $0x650] ss:$8 sps:$4 sm:$0xff]  }
  0xc6   : > { %2094 = vmatpush1.bf16.msra.mxu0 %v4652_v24  ;;  %v4727_v24 = vld [vmem:[%s6564_s3 + $0x644] ss:$8 sps:$4 sm:$0xff]  }
  0xc7   : > { %2095 = vmatprep.subr.bf16.mxu0 %v4659_v26  ;;  %1752 = vmatpush2.bf16.msra.mxu1 %v4649_v27  ;;  %v4728_v26 = vld [vmem:[%s6564_s3 + $0x740] ss:$8 sps:$4 sm:$0xff]  }
  0xc8   : > { %2128 = vmatprep.subr.bf16.mxu1 %v4662_v29  ;;  %v5934_v29 = vld [vmem:[%s5931_s21] sm:$0xff] }
  0xca   : > { %2096 = vmatpush2.bf16.msra.mxu0 %v4657_v28  ;;  %1754 = vmatmul.mubr.bf16.vlgmr.msra.gmra.mxu1 %v4002_v32  ;;  %v4736_v28 = vld [vmem:[%s6564_s3 + $0x7f4] ss:$8 sps:$4 sm:$0xff]   ;;  %v2205_v32 = vrot.slane %v5788_v37, 1  ;;  %v4739_v37 = vld [vmem:[%s6564_s3 + $0x724] ss:$8 sps:$4 sm:$0xff]  }
  0xcb   : > { %2097 = vmatprep.subr.bf16.mxu0 %v4665_v30  ;;  %2129 = vmatpush1.bf16.msra.mxu1 %v4660_v33  ;;  %v4725_v30 = vld [vmem:[%s6564_s3 + $0x640] ss:$8 sps:$4 sm:$0xff]   ;;  %v4734_v33 = vld [vmem:[%s6564_s3 + $0x7f0] ss:$8 sps:$4 sm:$0xff]  }
  0xcc   : > { %2152 = vmatprep.mubr.bf16.mxu1 %v5035_v2  ;;  %2130 = vmatprep.subr.bf16.mxu1 %v4668_v35  ;;  %v4132_v35 = vcombine.high %v5934_v29, %v5934_v29 }
  0xce   : > { %2098 = vmatpush2.bf16.msra.mxu0 %v4663_v34  ;;  %v4742_v34 = vld [vmem:[%s6564_s3 + $0x7e4] ss:$8 sps:$4 sm:$0xff]  }
  0xcf   : > { %2099 = vmatprep.subr.bf16.mxu0 %v4671_v36  ;;  %2131 = vmatpush1.bf16.msra.mxu1 %v4666_v5  ;;  %v4731_v36 = vld [vmem:[%s6564_s3 + $0x730] ss:$8 sps:$4 sm:$0xff]   ;;  %v4740_v5 = vld [vmem:[%s6564_s3 + $0x7e0] ss:$8 sps:$4 sm:$0xff]  }
  0xd0   : > { %2132 = vmatprep.subr.bf16.mxu1 %v4674_v39  ;;  %v4737_v39 = vld [vmem:[%s6564_s3 + $0x720] ss:$8 sps:$4 sm:$0xff]  }
  0xd2   : > { %2100 = vmatpush2.bf16.msra.mxu0 %v4669_v38  ;;  %v4748_v38 = vld [vmem:[%s6564_s3 + $0x7d4] ss:$8 sps:$4 sm:$0xff]  }
  0xd3   : > { %2101 = vmatprep.subr.bf16.mxu0 %v4677_v40  ;;  %2133 = vmatpush1.bf16.msra.mxu1 %v4672_v42  ;;  %v4745_v40 = vld [vmem:[%s6564_s3 + $0x714] ss:$8 sps:$4 sm:$0xff]   ;;  %v4754_v42 = vld [vmem:[%s6564_s3 + $0x7c4] ss:$8 sps:$4 sm:$0xff]  }
  0xd4   : > { %2134 = vmatprep.subr.bf16.mxu1 %v4680_v44  ;;  %v4751_v44 = vld [vmem:[%s6564_s3 + $0x704] ss:$8 sps:$4 sm:$0xff]  }
  0xd6   : > { %2102 = vmatpush2.bf16.msra.mxu0 %v4675_v43  ;;  %v4743_v43 = vld [vmem:[%s6564_s3 + $0x710] ss:$8 sps:$4 sm:$0xff]  }
  0xd7   : > { %2103 = vmatprep.subr.bf16.mxu0 %v4683_v45  ;;  %2135 = vmatpush1.bf16.msra.mxu1 %v4678_v48  ;;  %v4752_v45 = vld [vmem:[%s6564_s3 + $0x7c0] ss:$8 sps:$4 sm:$0xff]   ;;  %v4757_v48 = vld [vmem:[%s6564_s3 + $0x6f4] ss:$8 sps:$4 sm:$0xff]  }
  0xd8   : > { %2411 = vmatprep.subr.bf16.mxu1 %v4686_v52  ;;  %v4766_v52 = vld [vmem:[%s6564_s3 + $0x7a4] ss:$8 sps:$4 sm:$0xff]  }
  0xda   : > { %2104 = vmatpush2.bf16.msra.mxu0 %v4681_v51  ;;  %4089 = vmatmul.mubr.msk.bf16.vlgmr.msra.gmra.mxu1 %vm756_vm0, %v1873_v54  ;;  %v4758_v51 = vld [vmem:[%s6564_s3 + $0x7b0] ss:$8 sps:$4 sm:$0xff]   ;;  %v4763_v54 = vld [vmem:[%s6564_s3 + $0x6e4] ss:$8 sps:$4 sm:$0xff]  }
  0xdb   : > { %2105 = vmatprep.subr.bf16.mxu0 %v4689_v53  ;;  %2412 = vmatpush1.bf16.msra.mxu1 %v4684_v55  ;;  %v4755_v53 = vld [vmem:[%s6564_s3 + $0x6f0] ss:$8 sps:$4 sm:$0xff]   ;;  %v4764_v55 = vld [vmem:[%s6564_s3 + $0x7a0] ss:$8 sps:$4 sm:$0xff]  }
  0xdc   : > { %2443 = vmatprep.mubr.bf16.mxu1 %v2204_v57  ;;  %2413 = vmatprep.subr.bf16.mxu1 %v4692_v59  ;;  %v4772_v57 = vld [vmem:[%s6564_s3 + $0x794] ss:$8 sps:$4 sm:$0xff]  }
  0xdd   : > { %v4769_v59 = vld [vmem:[%s6564_s3 + $0x6d4] ss:$8 sps:$4 sm:$0xff]  }
  0xde   : > { %2106 = vmatpush2.bf16.msra.mxu0 %v4687_v58  ;;  %v4761_v58 = vld [vmem:[%s6564_s3 + $0x6e0] ss:$8 sps:$4 sm:$0xff]  }
  0xdf   : > { %2107 = vmatprep.subr.bf16.mxu0 %v4695_v60  ;;  %2414 = vmatpush1.bf16.msra.mxu1 %v4690_v25  ;;  %v4770_v60 = vld [vmem:[%s6564_s3 + $0x790] ss:$8 sps:$4 sm:$0xff]   ;;  %v4778_v25 = vld [vmem:[%s6564_s3 + $0x784] ss:$8 sps:$4 sm:$0xff]  }
  0xe0   : > { %2415 = vmatprep.subr.bf16.mxu1 %v4698_v61  ;;  %v4776_v61 = vld [vmem:[%s6564_s3 + $0x780] ss:$8 sps:$4 sm:$0xff]  }
  0xe2   : > { %2108 = vmatpush2.bf16.msra.mxu0 %v4693_v49  ;;  %v4767_v49 = vld [vmem:[%s6564_s3 + $0x6d0] ss:$8 sps:$4 sm:$0xff]  }
  0xe3   : > { %2109 = vmatprep.subr.bf16.mxu0 %v4701_v62  ;;  %2416 = vmatpush1.bf16.msra.mxu1 %v4696_v63  ;;  %v4781_v62 = vld [vmem:[%s6564_s3 + $0x874] ss:$8 sps:$4 sm:$0xff]   ;;  %v4773_v63 = vld [vmem:[%s6564_s3 + $0x6c0] ss:$8 sps:$4 sm:$0xff]  }
  0xe4   : > { %2417 = vmatprep.subr.bf16.mxu1 %v4704_v3  ;;  %v2203_v3 = vrot.slane %v5834_v56, 1 }
  0xe6   : > { %2110 = vmatpush2.bf16.msra.mxu0 %v4699_v0  ;;  %v4779_v0 = vld [vmem:[%s6564_s3 + $0x870] ss:$8 sps:$4 sm:$0xff]  }
  0xe7   : > { %2460 = vmatprep.subr.bf16.mxu0 %v4712_v4  ;;  %2418 = vmatpush1.bf16.msra.mxu1 %v4702_v6  ;;  %v4782_v6 = vld [vmem:[%s6564_s3 + $0x8b0] ss:$8 sps:$4 sm:$0xff]  }
  0xe8   : > { %2419 = vmatprep.subr.bf16.mxu1 %v4709_v8  ;;  %v4785_v8 = vld [vmem:[%s6564_s3 + $0x860] ss:$8 sps:$4 sm:$0xff]  }
  0xe9   : > { %2112 = vmatmul.mubr.bf16.vlgmr.msra.gmra.mxu0 %v1859_v7 }
  0xea   : > { %2461 = vmatpush1.bf16.msra.mxu0 %v4710_v9  ;;  %2484 = vmatprep.mubr.bf16.mxu0 %v5035_v2  ;;  %v5899_v15 = vpop.f32.mrf.mxu1  ;;  %v4790_v9 = vld [vmem:[%s6564_s3 + $0x8a4] ss:$8 sps:$4 sm:$0xff]  }
  0xeb   : > { %2462 = vmatprep.subr.bf16.mxu0 %v4718_v10  ;;  %2420 = vmatpush1.bf16.msra.mxu1 %v4707_v11  ;;  %v6060_v10 = vld [vmem:[%s5931_s21 + $0xc] sm:$0x11]  ;;  %v4793_v11 = vld [vmem:[%s6564_s3 + $0x854] ss:$8 sps:$4 sm:$0xff]  }
  0xec   : > { %2421 = vmatprep.subr.bf16.mxu1 %v4715_v12  ;;  %v5911_v20 = vpop.f32.mrf.mxu1 }
  0xee   : > { %2463 = vmatpush1.bf16.msra.mxu0 %v4716_v13  ;;  %v839_v22 = vpop.f32.mrf.mxu1 }
  0xef   : > { %2464 = vmatprep.subr.bf16.mxu0 %v4724_v14  ;;  %2422 = vmatpush1.bf16.msra.mxu1 %v4713_v16  ;;  %v4788_v14 = vld [vmem:[%s6564_s3 + $0x8a0] ss:$8 sps:$4 sm:$0xff]   ;;  %v4791_v16 = vld [vmem:[%s6564_s3 + $0x850] ss:$8 sps:$4 sm:$0xff]  }
  0xf0   : > { %2423 = vmatprep.subr.bf16.mxu1 %v4721_v17  ;;  %v840_v27 = vpop.f32.mrf.mxu1  ;;  %v4796_v17 = vld [vmem:[%s6564_s3 + $0x894] ss:$8 sps:$4 sm:$0xff]  }
  0xf1   : > { %v4800_v27 = vld [vmem:[%s6564_s3 + $0x880] ss:$8 sps:$4 sm:$0xff]  }
  0xf2   : > { %2465 = vmatpush1.bf16.msra.mxu0 %v4722_v18 }
  0xf3   : > { %2466 = vmatprep.subr.bf16.mxu0 %v4730_v21  ;;  %2424 = vmatpush1.bf16.msra.mxu1 %v4719_v23  ;;  %v4794_v21 = vld [vmem:[%s6564_s3 + $0x890] ss:$8 sps:$4 sm:$0xff]   ;;  %v4797_v23 = vld [vmem:[%s6564_s3 + $0x840] ss:$8 sps:$4 sm:$0xff]  }
  0xf4   : > { %2425 = vmatprep.subr.bf16.mxu1 %v4727_v24  ;;  %v4802_v24 = vld [vmem:[%s6564_s3 + $0x884] ss:$8 sps:$4 sm:$0xff]  }
  0xf6   : > { %2467 = vmatpush1.bf16.msra.mxu0 %v4728_v26  ;;  %v4805_v26 = vld [vmem:[%s6564_s3 + $0x834] ss:$8 sps:$4 sm:$0xff]  }
  0xf7   : > { %2752 = vmatprep.subr.bf16.mxu0 %v4736_v28  ;;  %2426 = vmatpush1.bf16.msra.mxu1 %v4725_v30  ;;  %v2496_v28 = vld [vmem:[%s5931_s21 + $0x8] sm:$0xf] }
  0xf8   : > { %2427 = vmatprep.subr.bf16.mxu1 %v4733_v31 }
  0xf9   : > { %4130 = vmatmul.mubr.msk.bf16.vlgmr.msra.gmra.mxu0 %vm756_vm0, %v2205_v32  ;;  %v4803_v32 = vld [vmem:[%s6564_s3 + $0x830] ss:$8 sps:$4 sm:$0xff]  }
  0xfa   : > { %2753 = vmatpush1.bf16.msra.mxu0 %v4734_v33  ;;  %2784 = vmatprep.mubr.bf16.mxu0 %v4132_v35  ;;  %v4808_v33 = vld [vmem:[%s6564_s3 + $0x934] ss:$8 sps:$4 sm:$0xff]   ;;  %v4133_v35 = vcombine.low %v2496_v28, %v2496_v28 }
  0xfb   : > { %2754 = vmatprep.subr.bf16.mxu0 %v4742_v34  ;;  %2428 = vmatpush2.bf16.msra.mxu1 %v4731_v36  ;;  %v4813_v34 = vld [vmem:[%s6564_s3 + $0x824] ss:$8 sps:$4 sm:$0xff]   ;;  %v4806_v36 = vld [vmem:[%s6564_s3 + $0x930] ss:$8 sps:$4 sm:$0xff]  }
  0xfc   : > { %2429 = vmatprep.subr.bf16.mxu1 %v4739_v37 }
  0xfe   : > { %2755 = vmatpush1.bf16.msra.mxu0 %v4740_v5  ;;  %v4811_v5 = vld [vmem:[%s6564_s3 + $0x820] ss:$8 sps:$4 sm:$0xff]  }
  0xff   : > { %2756 = vmatprep.subr.bf16.mxu0 %v4748_v38  ;;  %2430 = vmatpush2.bf16.msra.mxu1 %v4737_v39  ;;  %v4816_v38 = vld [vmem:[%s6564_s3 + $0x924] ss:$8 sps:$4 sm:$0xff]   ;;  %v4819_v39 = vld [vmem:[%s6564_s3 + $0x814] ss:$8 sps:$4 sm:$0xff]  }
 0x100   : > { %2431 = vmatprep.subr.bf16.mxu1 %v4745_v40 }
 0x102   : > { %2757 = vmatpush1.bf16.msra.mxu0 %v4746_v41 }
 0x103   : > { %2758 = vmatprep.subr.bf16.mxu0 %v4754_v42  ;;  %2432 = vmatpush2.bf16.msra.mxu1 %v4743_v43  ;;  %v4814_v42 = vld [vmem:[%s6564_s3 + $0x920] ss:$8 sps:$4 sm:$0xff]  }
 0x104   : > { %2433 = vmatprep.subr.bf16.mxu1 %v4751_v44  ;;  %v4817_v44 = vld [vmem:[%s6564_s3 + $0x810] ss:$8 sps:$4 sm:$0xff]  }
 0x106   : > { %2759 = vmatpush1.bf16.msra.mxu0 %v4752_v45  ;;  %v4822_v45 = vld [vmem:[%s6564_s3 + $0x914] ss:$8 sps:$4 sm:$0xff]  }
 0x107   : > { %2760 = vmatprep.subr.bf16.mxu0 %v4760_v46  ;;  %2434 = vmatpush2.bf16.msra.mxu1 %v4749_v47  ;;  %v4825_v47 = vld [vmem:[%s6564_s3 + $0x804] ss:$8 sps:$4 sm:$0xff]  }
 0x108   : > { %2435 = vmatprep.subr.bf16.mxu1 %v4757_v48 }
 0x10a   : > { %2761 = vmatpush1.bf16.msra.mxu0 %v4758_v51  ;;  %v4820_v51 = vld [vmem:[%s6564_s3 + $0x910] ss:$8 sps:$4 sm:$0xff]  }
 0x10b   : > { %2762 = vmatprep.subr.bf16.mxu0 %v4766_v52  ;;  %2436 = vmatpush2.bf16.msra.mxu1 %v4755_v53  ;;  %v4823_v52 = vld [vmem:[%s6564_s3 + $0x800] ss:$8 sps:$4 sm:$0xff]   ;;  %v4828_v53 = vld [vmem:[%s6564_s3 + $0x904] ss:$8 sps:$4 sm:$0xff]  }
 0x10c   : > { %2437 = vmatprep.subr.bf16.mxu1 %v4763_v54 }
 0x10e   : > { %2763 = vmatpush1.bf16.msra.mxu0 %v4764_v55  ;;  %v4836_v55 = vld [vmem:[%s6564_s3 + $0x9f4] ss:$8 sps:$4 sm:$0xff]  }
 0x10f   : > { %2764 = vmatprep.subr.bf16.mxu0 %v4772_v57  ;;  %2438 = vmatpush2.bf16.msra.mxu1 %v4761_v58  ;;  %v4826_v57 = vld [vmem:[%s6564_s3 + $0x900] ss:$8 sps:$4 sm:$0xff]   ;;  %v4131_v58 = vcombine.low %v5934_v29, %v5934_v29 }
 0x110   : > { %2439 = vmatprep.subr.bf16.mxu1 %v4769_v59  ;;  %v2498_v59 = vld [vmem:[%s5931_s21 + $0x14] sm:$0x1]  ;;  %s6515_s21 = scalar_lea.hbm %s6568_s7, %s4265_s11 }
 0x112   : > { %2765 = vmatpush1.bf16.msra.mxu0 %v4770_v60  ;;  %v4833_v60 = vld [vmem:[%s6564_s3 + $0x8f4] ss:$8 sps:$4 sm:$0xff]  }
 0x113   : > { %2766 = vmatprep.subr.bf16.mxu0 %v4778_v25  ;;  %2440 = vmatpush2.bf16.msra.mxu1 %v4767_v49  ;;  %v4834_v25 = vld [vmem:[%s6564_s3 + $0x9f0] ss:$8 sps:$4 sm:$0xff]   ;;  %v4842_v49 = vld [vmem:[%s6564_s3 + $0x9e4] ss:$8 sps:$4 sm:$0xff]  }
 0x114   : > { %2441 = vmatprep.subr.bf16.mxu1 %v4775_v50  ;;  %v6162_v50 = vcombine.low %v2496_v28, %v2498_v59  ;;  %v4855_v28 = vld [vmem:[%s6564_s3 + $0x9b0] ss:$8 sps:$4 sm:$0xff]   ;;  %v6286_v59 = vcombine.low %v5934_v29, %v6060_v10 }
 0x116   : > { %2767 = vmatpush1.bf16.msra.mxu0 %v4776_v61  ;;  %v4831_v61 = vld [vmem:[%s6564_s3 + $0x8f0] ss:$8 sps:$4 sm:$0xff]  }
 0x117   : > { %2768 = vmatprep.subr.bf16.mxu0 %v4781_v62  ;;  %2442 = vmatpush2.bf16.msra.mxu1 %v4773_v63  ;;  %v4839_v62 = vld [vmem:[%s6564_s3 + $0x8e4] ss:$8 sps:$4 sm:$0xff]   ;;  %v4840_v63 = vld [vmem:[%s6564_s3 + $0x9e0] ss:$8 sps:$4 sm:$0xff]  }
 0x118   : > { %2801 = vmatprep.subr.bf16.mxu1 %v4784_v1 }
 0x119   : > { %v794_v4 = vpop.f32.mrf.mxu0 }
 0x11a   : > { %v836_v7 = vadd.f32 %v5899_v15, %v794_v4  ;;  %2769 = vmatpush2.bf16.msra.mxu0 %v4779_v0  ;;  %2444 = vmatmul.mubr.bf16.vlgmr.msra.gmra.mxu1 %v2203_v3  ;;  %v6072_v15 = vcombine.high %v5934_v29, %v6060_v10  ;;  %v4848_v0 = vld [vmem:[%s6564_s3 + $0x9d4] ss:$8 sps:$4 sm:$0xff]   ;;  %v4837_v3 = vld [vmem:[%s6564_s3 + $0x8e0] ss:$8 sps:$4 sm:$0xff]   ;;  %v2901_v4 = vshll.u32 %v6162_v50, 16 }
 0x11b   : > { %v796_v56 = vpop.f32.mrf.mxu0  ;;  %2770 = vmatprep.subr.bf16.mxu0 %v4787_v19  ;;  %2802 = vmatpush1.bf16.msra.mxu1 %v4782_v6  ;;  %v4894_v29 = vld [vmem:[%s6564_s3 + $0xa10] ss:$8 sps:$4 sm:$0xff]  }
 0x11c   : > { %v838_v12 = vadd.f32 %v5911_v20, %v796_v56  ;;  %2825 = vmatprep.mubr.bf16.mxu1 %v5035_v2  ;;  %2803 = vmatprep.subr.bf16.mxu1 %v4790_v9  ;;  %v4799_v20 = vld [vmem:[%s6564_s3 + $0x844] ss:$8 sps:$4 sm:$0xff]   ;;  %v2894_v22 = vshll.u32 %v6072_v15, 16  ;;  %v2892_v30 = vshrl.u32 %v6072_v15, 16 }
 0x11d   : > { %v798_v13 = vpop.f32.mrf.mxu0  ;;  %v4854_v56 = vld [vmem:[%s6564_s3 + $0x9c4] ss:$8 sps:$4 sm:$0xff]  }
 0x11e   : > { %2771 = vmatpush2.bf16.msra.mxu0 %v4785_v8  ;;  %v2896_v31 = vrot.slane %v2894_v22, 1  ;;  %v4846_v8 = vld [vmem:[%s6564_s3 + $0x9d0] ss:$8 sps:$4 sm:$0xff]   ;;  %v2899_v13 = vshrl.u32 %v6162_v50, 16 }
 0x11f   : > { %v799_v18 = vpop.f32.mrf.mxu0  ;;  %2772 = vmatprep.subr.bf16.mxu0 %v4793_v11  ;;  %2804 = vmatpush1.bf16.msra.mxu1 %v4788_v14  ;;  %v2903_v14 = vrot.slane %v2901_v4, 1  ;;  %v2885_v4 = vshrl.u32 %v6286_v59, 16 }
 0x120   : > { %2805 = vmatprep.subr.bf16.mxu1 %v4796_v17  ;;  %v2897_v37 = vor.u32 %v2896_v31, %v2892_v30  ;;  %v4852_v17 = vld [vmem:[%s6564_s3 + $0x9c0] ss:$8 sps:$4 sm:$0xff]   ;;  %v4863_v30 = vld [vmem:[%s6564_s3 + $0x9a4] ss:$8 sps:$4 sm:$0xff]  }
 0x121   : > { %v2904_v22 = vor.u32 %v2903_v14, %v2899_v13  ;;  %v4864_v31 = vld [vmem:[%s6564_s3 + $0xa60] ss:$8 sps:$4 sm:$0xff]   ;;  %v4914_v13 = vld [vmem:[%s6564_s3 + $0xb30] ss:$8 sps:$4 sm:$0xff]  }
 0x122   : > { %2773 = vmatpush2.bf16.msra.mxu0 %v4791_v16  ;;  %v4851_v16 = vld [vmem:[%s6564_s3 + $0x8c4] ss:$8 sps:$4 sm:$0xff]   ;;  %v4908_v14 = vld [vmem:[%s6564_s3 + $0xae0] ss:$8 sps:$4 sm:$0xff]  }
 0x123   : > { %2774 = vmatprep.subr.bf16.mxu0 %v4799_v20  ;;  %2806 = vmatpush1.bf16.msra.mxu1 %v4794_v21  ;;  %v4860_v20 = vld [vmem:[%s6564_s3 + $0xa74] ss:$8 sps:$4 sm:$0xff]   ;;  %v4849_v21 = vld [vmem:[%s6564_s3 + $0x8c0] ss:$8 sps:$4 sm:$0xff]  }
 0x124   : > { %2807 = vmatprep.subr.bf16.mxu1 %v4802_v24  ;;  %v4858_v24 = vld [vmem:[%s6564_s3 + $0xa70] ss:$8 sps:$4 sm:$0xff]  }
 0x126   : > { %2775 = vmatpush2.bf16.msra.mxu0 %v4797_v23  ;;  %v4857_v23 = vld [vmem:[%s6564_s3 + $0x9b4] ss:$8 sps:$4 sm:$0xff]  }
 0x127   : > { %2776 = vmatprep.subr.bf16.mxu0 %v4805_v26  ;;  %2808 = vmatpush1.bf16.msra.mxu1 %v4800_v27  ;;  %v4866_v26 = vld [vmem:[%s6564_s3 + $0xa64] ss:$8 sps:$4 sm:$0xff]   ;;  %v3235_v27 = vrot.slane %v6072_v15, 1  ;;  %v4872_v15 = vld [vmem:[%s6564_s3 + $0xa54] ss:$8 sps:$4 sm:$0xff]  }
 0x128   : > { %3110 = vmatprep.subr.bf16.mxu1 %v4808_v33  ;;  %v4861_v33 = vld [vmem:[%s6564_s3 + $0x9a0] ss:$8 sps:$4 sm:$0xff]  }
 0x12a   : > { %2777 = vmatpush2.bf16.msra.mxu0 %v4803_v32  ;;  %v1084_v40 = vpop.f32.mrf.mxu1  ;;  %4174 = vmatmul.mubr.msk.bf16.vlgmr.msra.gmra.mxu1 %vm756_vm0, %v4133_v35  ;;  %v4870_v35 = vld [vmem:[%s6564_s3 + $0xa50] ss:$8 sps:$4 sm:$0xff]  }
 0x12b   : > { %2778 = vmatprep.subr.bf16.mxu0 %v4813_v34  ;;  %v1085_v41 = vadd.f32 %v1084_v40, %v836_v7  ;;  %3111 = vmatpush1.bf16.msra.mxu1 %v4806_v36  ;;  %v4845_v7 = vld [vmem:[%s6564_s3 + $0x8d4] ss:$8 sps:$4 sm:$0xff]   ;;  %v4876_v40 = vld [vmem:[%s6564_s3 + $0xa40] ss:$8 sps:$4 sm:$0xff]  }
 0x12c   : > { %3142 = vmatprep.mubr.bf16.mxu1 %v2897_v37  ;;  %v1086_v43 = vpop.f32.mrf.mxu1  ;;  %3112 = vmatprep.subr.bf16.mxu1 %v4816_v38  ;;  %v4869_v34 = vld [vmem:[%s6564_s3 + $0x994] ss:$8 sps:$4 sm:$0xff]   ;;  %v4878_v37 = vld [vmem:[%s6564_s3 + $0xa44] ss:$8 sps:$4 sm:$0xff]   ;;  %v4867_v38 = vld [vmem:[%s6564_s3 + $0x990] ss:$8 sps:$4 sm:$0xff]  }
 0x12d   : > { %v1087_v46 = vadd.f32 %v1086_v43, %v838_v12  ;;  %v4843_v12 = vld [vmem:[%s6564_s3 + $0x8d0] ss:$8 sps:$4 sm:$0xff]   ;;  %v4873_v43 = vld [vmem:[%s6564_s3 + $0x980] ss:$8 sps:$4 sm:$0xff]  }
 0x12e   : > { %2779 = vmatpush2.bf16.msra.mxu0 %v4811_v5  ;;  %v1088_v48 = vpop.f32.mrf.mxu1 }
 0x12f   : > { %2780 = vmatprep.subr.bf16.mxu0 %v4819_v39  ;;  %3113 = vmatpush1.bf16.msra.mxu1 %v4814_v42  ;;  %v4875_v39 = vld [vmem:[%s6564_s3 + $0x984] ss:$8 sps:$4 sm:$0xff]   ;;  %v4884_v42 = vld [vmem:[%s6564_s3 + $0xa34] ss:$8 sps:$4 sm:$0xff]   ;;  %v4879_v48 = vld [vmem:[%s6564_s3 + $0x970] ss:$8 sps:$4 sm:$0xff]  }
 0x130   : > { %3114 = vmatprep.subr.bf16.mxu1 %v4822_v45  ;;  %v1089_v54 = vpop.f32.mrf.mxu1  ;;  %v4882_v45 = vld [vmem:[%s6564_s3 + $0xa30] ss:$8 sps:$4 sm:$0xff]  }
 0x132   : > { %2781 = vmatpush2.bf16.msra.mxu0 %v4817_v44  ;;  %v4881_v44 = vld [vmem:[%s6564_s3 + $0x974] ss:$8 sps:$4 sm:$0xff]  }
 0x133   : > { %2782 = vmatprep.subr.bf16.mxu0 %v4825_v47  ;;  %3115 = vmatpush1.bf16.msra.mxu1 %v4820_v51 }
 0x134   : > { %3116 = vmatprep.subr.bf16.mxu1 %v4828_v53  ;;  %v4888_v53 = vld [vmem:[%s6564_s3 + $0xa20] ss:$8 sps:$4 sm:$0xff]  }
 0x136   : > { %2783 = vmatpush2.bf16.msra.mxu0 %v4823_v52  ;;  %v4887_v52 = vld [vmem:[%s6564_s3 + $0x964] ss:$8 sps:$4 sm:$0xff]  }
 0x137   : > { %3159 = vmatprep.subr.bf16.mxu0 %v4836_v55  ;;  %3117 = vmatpush1.bf16.msra.mxu1 %v4826_v57  ;;  %v4896_v55 = vld [vmem:[%s6564_s3 + $0xa14] ss:$8 sps:$4 sm:$0xff]  }
 0x138   : > { %3118 = vmatprep.subr.bf16.mxu1 %v4833_v60 }
 0x139   : > { %2785 = vmatmul.mubr.bf16.vlgmr.msra.gmra.mxu0 %v4131_v58 }
 0x13a   : > { %3160 = vmatpush1.bf16.msra.mxu0 %v4834_v25  ;;  %3183 = vmatprep.mubr.bf16.mxu0 %v5035_v2  ;;  %v1125_v1 = vpop.f32.mrf.mxu1  ;;  %v4885_v25 = vld [vmem:[%s6564_s3 + $0x960] ss:$8 sps:$4 sm:$0xff]  }
 0x13b   : > { %3161 = vmatprep.subr.bf16.mxu0 %v4842_v49  ;;  %v6177_v19 = vadd.f32 %v1125_v1, %v1085_v41  ;;  %3119 = vmatpush1.bf16.msra.mxu1 %v4831_v61  ;;  %v4893_v61 = vld [vmem:[%s6564_s3 + $0x954] ss:$8 sps:$4 sm:$0xff]   ;;  %v4899_v1 = vld [vmem:[%s6564_s3 + $0x944] ss:$8 sps:$4 sm:$0xff]  }
 0x13c   : > { %v1127_v6 = vpop.f32.mrf.mxu1  ;;  %3120 = vmatprep.subr.bf16.mxu1 %v4839_v62  ;;  %v4902_v62 = vld [vmem:[%s6564_s3 + $0xa04] ss:$8 sps:$4 sm:$0xff]  }
 0x13d   : > { %v6189_v9 = vadd.f32 %v1127_v6, %v1087_v46  ;;  %v4890_v46 = vld [vmem:[%s6564_s3 + $0xa24] ss:$8 sps:$4 sm:$0xff]  }
 0x13e   : > { %3162 = vmatpush1.bf16.msra.mxu0 %v4840_v63  ;;  %v1129_v11 = vpop.f32.mrf.mxu1  ;;  %v2887_v63 = vshll.u32 %v6286_v59, 16 }
 0x13f   : > { %3163 = vmatprep.subr.bf16.mxu0 %v4848_v0  ;;  %3121 = vmatpush1.bf16.msra.mxu1 %v4837_v3  ;;  %v4891_v0 = vld [vmem:[%s6564_s3 + $0x950] ss:$8 sps:$4 sm:$0xff]   ;;  %v4907_v3 = vld [vmem:[%s6564_s3 + $0xaf4] ss:$8 sps:$4 sm:$0xff]  }
 0x140   : > { %3122 = vmatprep.subr.bf16.mxu1 %v4845_v7  ;;  %v1130_v18 = vpop.f32.mrf.mxu1  ;;  %v2889_v6 = vrot.slane %v2887_v63, 1  ;;  %v4897_v7 = vld [vmem:[%s6564_s3 + $0x940] ss:$8 sps:$4 sm:$0xff]  }
 0x141   : > { %v4913_v18 = vld [vmem:[%s6564_s3 + $0xad4] ss:$8 sps:$4 sm:$0xff]   ;;  %v3574_v63 = vld [vmem:[%s6566_s5 + $0xe0] sm:$0xff] }
 0x142   : > { %3164 = vmatpush1.bf16.msra.mxu0 %v4846_v8  ;;  %v4905_v8 = vld [vmem:[%s6564_s3 + $0xaf0] ss:$8 sps:$4 sm:$0xff]   ;;  %v2890_v11 = vor.u32 %v2889_v6, %v2885_v4 }
 0x143   : > { %3165 = vmatprep.subr.bf16.mxu0 %v4854_v56  ;;  %3123 = vmatpush1.bf16.msra.mxu1 %v4843_v12  ;;  %v4910_v56 = vld [vmem:[%s6564_s3 + $0xae4] ss:$8 sps:$4 sm:$0xff]   ;;  %v3572_v4 = vld [vmem:[%s6566_s5 + $0xd0] sm:$0xff] }
 0x144   : > { %3124 = vmatprep.subr.bf16.mxu1 %v4851_v16  ;;  %v4922_v16 = vld [vmem:[%s6564_s3 + $0xb24] ss:$8 sps:$4 sm:$0xff]   ;;  %v3556_v6 = vld [vmem:[%s6566_s5 + $0x50] sm:$0xff] }
 0x146   : > { %3166 = vmatpush1.bf16.msra.mxu0 %v4852_v17 }
 0x147   : > { %3442 = vmatprep.subr.bf16.mxu0 %v4860_v20  ;;  %3125 = vmatpush1.bf16.msra.mxu1 %v4849_v21  ;;  %v4920_v21 = vld [vmem:[%s6564_s3 + $0xb20] ss:$8 sps:$4 sm:$0xff]  }
 0x148   : > { %3126 = vmatprep.subr.bf16.mxu1 %v4857_v23  ;;  %v4928_v23 = vld [vmem:[%s6564_s3 + $0xb14] ss:$8 sps:$4 sm:$0xff]  }
 0x149   : > { %4218 = vmatmul.mubr.msk.bf16.vlgmr.msra.gmra.mxu0 %vm756_vm0, %v2904_v22  ;;  %v4911_v22 = vld [vmem:[%s6564_s3 + $0xad0] ss:$8 sps:$4 sm:$0xff]  }
 0x14a   : > { %3443 = vmatpush1.bf16.msra.mxu0 %v4858_v24  ;;  %3474 = vmatprep.mubr.bf16.mxu0 %v3235_v27  ;;  %v1455_v32 = vpop.f32.mrf.mxu1  ;;  %v4917_v27 = vld [vmem:[%s6564_s3 + $0xac0] ss:$8 sps:$4 sm:$0xff]  }
 0x14b   : > { %3444 = vmatprep.subr.bf16.mxu0 %v4866_v26  ;;  %3127 = vmatpush2.bf16.msra.mxu1 %v4855_v28  ;;  %v4919_v26 = vld [vmem:[%s6564_s3 + $0xac4] ss:$8 sps:$4 sm:$0xff]  }
 0x14c   : > { %3128 = vmatprep.subr.bf16.mxu1 %v4863_v30  ;;  %v1457_v36 = vpop.f32.mrf.mxu1  ;;  %v4934_v28 = vld [vmem:[%s6564_s3 + $0xb04] ss:$8 sps:$4 sm:$0xff]   ;;  %v4925_v30 = vld [vmem:[%s6564_s3 + $0xab4] ss:$8 sps:$4 sm:$0xff]  }
 0x14e   : > { %3445 = vmatpush1.bf16.msra.mxu0 %v4864_v31  ;;  %v1459_v5 = vpop.f32.mrf.mxu1  ;;  %v4932_v31 = vld [vmem:[%s6564_s3 + $0xb00] ss:$8 sps:$4 sm:$0xff]  }
 0x14f   : > { %3446 = vmatprep.subr.bf16.mxu0 %v4872_v15  ;;  %3129 = vmatpush2.bf16.msra.mxu1 %v4861_v33  ;;  %v4923_v15 = vld [vmem:[%s6564_s3 + $0xab0] ss:$8 sps:$4 sm:$0xff]   ;;  %v3236_v33 = vrot.slane %v6162_v50, 1  ;;  %v4940_v50 = vld [vmem:[%s6564_s3 + $0xa84] ss:$8 sps:$4 sm:$0xff]   ;;  %v3234_v5 = vrot.slane %v6286_v59, 1 }
 0x150   : > { %3130 = vmatprep.subr.bf16.mxu1 %v4869_v34  ;;  %v1460_v41 = vpop.f32.mrf.mxu1  ;;  %v4929_v34 = vld [vmem:[%s6564_s3 + $0xaa0] ss:$8 sps:$4 sm:$0xff]  }
 0x152   : > { %3447 = vmatpush1.bf16.msra.mxu0 %v4870_v35  ;;  %v4937_v35 = vld [vmem:[%s6564_s3 + $0xa94] ss:$8 sps:$4 sm:$0xff]  }
 0x153   : > { %3448 = vmatprep.subr.bf16.mxu0 %v4878_v37  ;;  %3131 = vmatpush2.bf16.msra.mxu1 %v4867_v38  ;;  %v4938_v37 = vld [vmem:[%s6564_s3 + $0xa80] ss:$8 sps:$4 sm:$0xff]  }
 0x154   : > { %3132 = vmatprep.subr.bf16.mxu1 %v4875_v39 }
 0x156   : > { %3449 = vmatpush1.bf16.msra.mxu0 %v4876_v40 }
 0x157   : > { %3450 = vmatprep.subr.bf16.mxu0 %v4884_v42  ;;  %3133 = vmatpush2.bf16.msra.mxu1 %v4873_v43 }
 0x158   : > { %3134 = vmatprep.subr.bf16.mxu1 %v4881_v44 }
 0x159   : > { %v1414_v47 = vpop.f32.mrf.mxu0 }
 0x15a   : > { %v1456_v51 = vadd.f32 %v1455_v32, %v1414_v47  ;;  %3451 = vmatpush1.bf16.msra.mxu0 %v4882_v45  ;;  %v4931_v32 = vld [vmem:[%s6564_s3 + $0xaa4] ss:$8 sps:$4 sm:$0xff]  }
 0x15b   : > { %v1416_v54 = vpop.f32.mrf.mxu0  ;;  %3452 = vmatprep.subr.bf16.mxu0 %v4890_v46  ;;  %3135 = vmatpush2.bf16.msra.mxu1 %v4879_v48 }
 0x15c   : > { %v6282_v57 = vadd.f32 %v1456_v51, %v6177_v19  ;;  %v1458_v58 = vadd.f32 %v1457_v36, %v1416_v54  ;;  %3136 = vmatprep.subr.bf16.mxu1 %v4887_v52  ;;  %v4900_v19 = vld [vmem:[%s6564_s3 + $0xa00] ss:$8 sps:$4 sm:$0xff]   ;;  %v4935_v36 = vld [vmem:[%s6564_s3 + $0xa90] ss:$8 sps:$4 sm:$0xff]  }
 0x15d   : > { %v1418_v60 = vpop.f32.mrf.mxu0 }
 0x15e   : > { %v6292_v49 = vadd.f32 %v1458_v58, %v6189_v9  ;;  %3453 = vmatpush1.bf16.msra.mxu0 %v4888_v53  ;;  %v4916_v9 = vld [vmem:[%s6564_s3 + $0xb34] ss:$8 sps:$4 sm:$0xff]  }
 0x15f   : > { %v1419_v10 = vpop.f32.mrf.mxu0  ;;  %3454 = vmatprep.subr.bf16.mxu0 %v4896_v55  ;;  %3137 = vmatpush2.bf16.msra.mxu1 %v4885_v25 }
 0x160   : > { %3138 = vmatprep.subr.bf16.mxu1 %v4893_v61  ;;  %v3576_v61 = vld [vmem:[%s6566_s5 + $0xf0] sm:$0xff]  ;;  %v3575_v10 = vld [vmem:[%s6566_s5 + $0xe8] sm:$0xff] }
 0x162   : > { %3455 = vmatpush1.bf16.msra.mxu0 %v4894_v29  ;;  %v3560_v29 = vld [vmem:[%s6566_s5 + $0x70] sm:$0xff] }
 0x163   : > { %3456 = vmatprep.subr.bf16.mxu0 %v4902_v62  ;;  %3139 = vmatpush2.bf16.msra.mxu1 %v4891_v0  ;;  %v3559_v62 = vld [vmem:[%s6566_s5 + $0x68] sm:$0xff]  ;;  %v3558_v0 = vld [vmem:[%s6566_s5 + $0x60] sm:$0xff] }
 0x164   : > { %3140 = vmatprep.subr.bf16.mxu1 %v4899_v1  ;;  %v3573_v1 = vld [vmem:[%s6566_s5 + $0xd8] sm:$0xff] }
 0x166   : > { %3457 = vmatpush1.bf16.msra.mxu0 %v4900_v19  ;;  %v3557_v19 = vld [vmem:[%s6566_s5 + $0x58] sm:$0xff] }
 0x167   : > { %3458 = vmatprep.subr.bf16.mxu0 %v4907_v3  ;;  %3141 = vmatpush2.bf16.msra.mxu1 %v4897_v7 }
 0x168   : > { %3491 = vmatprep.subr.bf16.mxu1 %v4916_v9  ;;  %v3555_v9 = vld [vmem:[%s6566_s5 + $0x48] sm:$0xff] }
 0x169   : > { %v1796_v12 = vpop.f32.mrf.mxu0 }
 0x16a   : > { %3459 = vmatpush2.bf16.msra.mxu0 %v4905_v8  ;;  %3143 = vmatmul.mubr.bf16.vlgmr.msra.gmra.mxu1 %v2890_v11  ;;  %v3571_v8 = vld [vmem:[%s6566_s5 + $0xc8] sm:$0xff]  ;;  %v3570_v11 = vld [vmem:[%s6566_s5 + $0xc0] sm:$0xff] }
 0x16b   : > { %v1798_v17 = vpop.f32.mrf.mxu0  ;;  %3460 = vmatprep.subr.bf16.mxu0 %v4910_v56  ;;  %3492 = vmatpush1.bf16.msra.mxu1 %v4914_v13 }
 0x16c   : > { %3515 = vmatprep.mubr.bf16.mxu1 %v5035_v2  ;;  %3493 = vmatprep.subr.bf16.mxu1 %v4922_v16  ;;  %v4926_v2 = vld [vmem:[%s6564_s3 + $0xb10] ss:$8 sps:$4 sm:$0xff]  }
 0x16d   : > { %v1800_v20 = vpop.f32.mrf.mxu0  ;;  %v3553_v16 = vld [vmem:[%s6566_s5 + $0x38] sm:$0xff] }
 0x16e   : > { %3461 = vmatpush2.bf16.msra.mxu0 %v4908_v14  ;;  %v3569_v14 = vld [vmem:[%s6566_s5 + $0xb8] sm:$0xff]  ;;  %v3567_v20 = vld [vmem:[%s6566_s5 + $0xa8] sm:$0xff] }
 0x16f   : > { %v1801_v24 = vpop.f32.mrf.mxu0  ;;  %3462 = vmatprep.subr.bf16.mxu0 %v4913_v18  ;;  %3494 = vmatpush1.bf16.msra.mxu1 %v4920_v21  ;;  %v3552_v18 = vld [vmem:[%s6566_s5 + $0x30] sm:$0xff]  ;;  %v3551_v21 = vld [vmem:[%s6566_s5 + $0x28] sm:$0xff] }
 0x170   : > { %3495 = vmatprep.subr.bf16.mxu1 %v4928_v23  ;;  %v3550_v23 = vld [vmem:[%s6566_s5 + $0x20] sm:$0xff]  ;;  %v3565_v24 = vld [vmem:[%s6566_s5 + $0x98] sm:$0xff] }
 0x172   : > { %3463 = vmatpush2.bf16.msra.mxu0 %v4911_v22  ;;  %v3566_v22 = vld [vmem:[%s6566_s5 + $0xa0] sm:$0xff] }
 0x173   : > { %3464 = vmatprep.subr.bf16.mxu0 %v4919_v26  ;;  %3496 = vmatpush1.bf16.msra.mxu1 %v4926_v2  ;;  %v3549_v26 = vld [vmem:[%s6566_s5 + $0x18] sm:$0xff]  ;;  %v3564_v2 = vld [vmem:[%s6566_s5 + $0x90] sm:$0xff] }
 0x174   : > { %3497 = vmatprep.subr.bf16.mxu1 %v4934_v28  ;;  %v3563_v28 = vld [vmem:[%s6566_s5 + $0x88] sm:$0xff] }
 0x176   : > { %3465 = vmatpush2.bf16.msra.mxu0 %v4917_v27  ;;  %v3548_v27 = vld [vmem:[%s6566_s5 + $0x10] sm:$0xff] }
 0x177   : > { %3466 = vmatprep.subr.bf16.mxu0 %v4925_v30  ;;  %3498 = vmatpush1.bf16.msra.mxu1 %v4932_v31  ;;  %v3547_v30 = vld [vmem:[%s6566_s5 + $0x8] sm:$0xff]  ;;  %v3562_v31 = vld [vmem:[%s6566_s5 + $0x80] sm:$0xff] }
 0x17a   : > { %3467 = vmatpush2.bf16.msra.mxu0 %v4923_v15  ;;  %4259 = vmatmul.mubr.msk.bf16.vlgmr.msra.gmra.mxu1 %vm756_vm0, %v3236_v33  ;;  %v3546_v15 = vld [vmem:[%s6566_s5] sm:$0xff] }
 0x17b   : > { %3468 = vmatprep.subr.bf16.mxu0 %v4931_v32 }
 0x17e   : > { %3469 = vmatpush2.bf16.msra.mxu0 %v4929_v34 }
 0x17f   : > { %3470 = vmatprep.subr.bf16.mxu0 %v4937_v35 }
 0x182   : > { %3471 = vmatpush2.bf16.msra.mxu0 %v4935_v36 }
 0x183   : > { %3472 = vmatprep.subr.bf16.mxu0 %v4940_v50 }
 0x186   : > { %3473 = vmatpush2.bf16.msra.mxu0 %v4938_v37 }
 0x189   : > { %3475 = vmatmul.mubr.bf16.vlgmr.msra.gmra.mxu0 %v3234_v5 }
 0x18a   : > { %v1755_v38 = vpop.f32.mrf.mxu1 }
 0x18b   : > { %v1797_v39 = vadd.f32 %v1796_v12, %v1755_v38  ;;  %v3554_v12 = vld [vmem:[%s6566_s5 + $0x40] sm:$0xff] }
 0x18c   : > { %v1757_v40 = vpop.f32.mrf.mxu1 }
 0x18d   : > { %v1803_v41 = vadd.f32 %v1797_v39, %v6282_v57  ;;  %v1799_v42 = vadd.f32 %v1798_v17, %v1757_v40  ;;  %v3577_v57 = vld [vmem:[%s6566_s5 + $0xf8] sm:$0xff]  ;;  %v3568_v17 = vld [vmem:[%s6566_s5 + $0xb0] sm:$0xff] }
 0x18e   : > { %v1759_v43 = vpop.f32.mrf.mxu1  ;;  %4268 = vmatprep.subr.mxu1 %v3577_v57 }
 0x18f   : > { %v1804_v44 = vadd.f32 %v1799_v42, %v6292_v49  ;;  %v3561_v49 = vld [vmem:[%s6566_s5 + $0x78] sm:$0xff] }
 0x190   : > { %v1760_v45 = vpop.f32.mrf.mxu1  ;;  %4269 = vmatpush3.msra.mxu1 %v3561_v49 }
 0x191   : > { %4270 = vmatprep.subr.mxu1 %v3576_v61 }
 0x192   : > { %4271 = vmatpush3.msra.mxu1 %v3560_v29 }
 0x193   : > { %4272 = vmatprep.subr.mxu1 %v3575_v10  ;;  %v3528_v10 = vlaneseq }
 0x194   : > { %4273 = vmatpush3.msra.mxu1 %v3559_v62 }
 0x195   : > { %4274 = vmatprep.subr.mxu1 %v3574_v63  ;;  %v3529_v63 = vshrl.u32 %v3528_v10, 7 }
 0x196   : > { %4275 = vmatpush3.msra.mxu1 %v3558_v0 }
 0x197   : > { %4276 = vmatprep.subr.mxu1 %v3573_v1  ;;  %v3530_v1 = vsub.s32 0, %v3529_v63 }
 0x198   : > { %4277 = vmatpush3.msra.mxu1 %v3557_v19  ;;  %v3526_v19 = vld [vmem:[%s6565_s4] sm:$0x3] }
 0x199   : > { %4278 = vmatprep.subr.mxu1 %v3572_v4  ;;  %v3534_v4 = vsub.s32 1, %v3529_v63 }
 0x19a   : > { %v2154_v46 = vpop.f32.mrf.mxu1  ;;  %4279 = vmatpush3.msra.mxu1 %v3556_v6 }
 0x19b   : > { %4280 = vmatprep.subr.mxu1 %v3571_v8  ;;  %v3531_v8 = vrot.slane %v3526_v19, %v3530_v1 }
 0x19c   : > { %v2156_v47 = vpop.f32.mrf.mxu1  ;;  %4281 = vmatpush3.msra.mxu1 %v3555_v9 }
 0x19d   : > { %4282 = vmatprep.subr.mxu1 %v3570_v11 }
 0x19e   : > { %v2158_v48 = vpop.f32.mrf.mxu1  ;;  %4283 = vmatpush3.msra.mxu1 %v3554_v12 }
 0x19f   : > { %4284 = vmatprep.subr.mxu1 %v3569_v14 }
 0x1a0   : > { %v2159_v51 = vpop.f32.mrf.mxu1  ;;  %4285 = vmatpush3.msra.mxu1 %v3553_v16 }
 0x1a1   : > { %4286 = vmatprep.subr.mxu1 %v3568_v17 }
 0x1a2   : > { %4287 = vmatpush3.msra.mxu1 %v3552_v18 }
 0x1a3   : > { %4288 = vmatprep.subr.mxu1 %v3567_v20 }
 0x1a4   : > { %4289 = vmatpush3.msra.mxu1 %v3551_v21 }
 0x1a5   : > { %4290 = vmatprep.subr.mxu1 %v3566_v22 }
 0x1a6   : > { %4291 = vmatpush3.msra.mxu1 %v3550_v23 }
 0x1a7   : > { %4292 = vmatprep.subr.mxu1 %v3565_v24 }
 0x1a8   : > { %4293 = vmatpush3.msra.mxu1 %v3549_v26  ;;  %v5036_v26 = vmov 1  }
 0x1a9   : > { %v2113_v52 = vpop.f32.mrf.mxu0  ;;  %4294 = vmatprep.subr.mxu1 %v3564_v2  ;;  %4382 = vset.pattern.permute.xlu0 %v5036_v26 }
 0x1aa   : > { %v2155_v53 = vadd.f32 %v2154_v46, %v2113_v52  ;;  %4295 = vmatpush3.msra.mxu1 %v3548_v27  ;;  %v4260_v27 = vld [vmem:[%s6567_s6] ss:$0 sm:$0xff] }
 0x1ab   : > { %v2115_v54 = vpop.f32.mrf.mxu0  ;;  %4296 = vmatprep.subr.mxu1 %v3563_v28 }
 0x1ac   : > { %v6395_v55 = vadd.f32 %v2155_v53, %v1803_v41  ;;  %v2157_v58 = vadd.f32 %v2156_v47, %v2115_v54  ;;  %4297 = vmatpush3.msra.mxu1 %v3547_v30 }
 0x1ad   : > { %v2117_v59 = vpop.f32.mrf.mxu0  ;;  %4298 = vmatprep.subr.mxu1 %v3562_v31 }
 0x1ae   : > { %v6397_v60 = vadd.f32 %v2157_v58, %v1804_v44  ;;  %4299 = vmatpush3.msra.mxu1 %v3546_v15 }
 0x1af   : > { %v2118_v25 = vpop.f32.mrf.mxu0 }
 0x1b9   : > { %v2486_v3 = vpop.f32.mrf.mxu0 }
 0x1bb   : > { %v2488_v7 = vpop.f32.mrf.mxu0 }
 0x1bd   : > { %v2490_v56 = vpop.f32.mrf.mxu0 }
 0x1bf   : > { %v2491_v13 = vpop.f32.mrf.mxu0 }
 0x1c0   : > { %v3535_v13 = vrot.slane %v3526_v19, %v3534_v4 }
 0x1da   : > { %v2445_v32 = vpop.f32.mrf.mxu1 }
 0x1db   : > { %v2487_v33 = vadd.f32 %v2486_v3, %v2445_v32  ;;  %v5038_v32 = vmov 0.0  }
 0x1dc   : > { %v2447_v34 = vpop.f32.mrf.mxu1 }
 0x1dd   : > { %v2493_v35 = vadd.f32 %v2487_v33, %v6395_v55  ;;  %v2489_v36 = vadd.f32 %v2488_v7, %v2447_v34 }
 0x1de   : > { %v2449_v50 = vpop.f32.mrf.mxu1 }
 0x1df   : > { %v2494_v37 = vadd.f32 %v2489_v36, %v6397_v60 }
 0x1e0   : > { %v2450_v5 = vpop.f32.mrf.mxu1 }
 0x1ea   : > { %v2827_v38 = vpop.f32.mrf.mxu1 }
 0x1ec   : > { %v2829_v39 = vpop.f32.mrf.mxu1 }
 0x1ee   : > { %v2831_v40 = vpop.f32.mrf.mxu1 }
 0x1f0   : > { %v2832_v41 = vpop.f32.mrf.mxu1 }
 0x1f9   : > { %v2786_v42 = vpop.f32.mrf.mxu0 }
 0x1fa   : > { %v2828_v43 = vadd.f32 %v2827_v38, %v2786_v42 }
 0x1fb   : > { %v2788_v44 = vpop.f32.mrf.mxu0 }
 0x1fc   : > { %v2834_v45 = vadd.f32 %v2828_v43, %v2493_v35  ;;  %v2830_v46 = vadd.f32 %v2829_v39, %v2788_v44 }
 0x1fd   : > { %v2790_v47 = vpop.f32.mrf.mxu0 }
 0x1fe   : > { %v2835_v48 = vadd.f32 %v2830_v46, %v2494_v37 }
 0x1ff   : > { %v2791_v51 = vpop.f32.mrf.mxu0 }
 0x209   : > { %v3185_v52 = vpop.f32.mrf.mxu0 }
 0x20b   : > { %v3187_v53 = vpop.f32.mrf.mxu0 }
 0x20d   : > { %v3189_v54 = vpop.f32.mrf.mxu0 }
 0x20f   : > { %v3190_v55 = vpop.f32.mrf.mxu0 }
 0x22a   : > { %v3144_v58 = vpop.f32.mrf.mxu1 }
 0x22b   : > { %v3186_v59 = vadd.f32 %v3185_v52, %v3144_v58 }
 0x22c   : > { %v3146_v60 = vpop.f32.mrf.mxu1 }
 0x22d   : > { %v3192_v25 = vadd.f32 %v3186_v59, %v2834_v45  ;;  %v3188_v3 = vadd.f32 %v3187_v53, %v3146_v60 }
 0x22e   : > { %v3148_v57 = vpop.f32.mrf.mxu1 }
 0x22f   : > { %v3193_v56 = vadd.f32 %v3188_v3, %v2835_v48 }
 0x230   : > { %v3149_v49 = vpop.f32.mrf.mxu1 }
 0x23a   : > { %v3517_v61 = vpop.f32.mrf.mxu1 }
 0x23c   : > { %v3519_v29 = vpop.f32.mrf.mxu1 }
 0x23e   : > { %v3521_v62 = vpop.f32.mrf.mxu1 }
 0x240   : > { %v3522_v0 = vpop.f32.mrf.mxu1 }
 0x249   : > { %v3476_v6 = vpop.f32.mrf.mxu0 }
 0x24a   : > { %v3518_v7 = vadd.f32 %v3517_v61, %v3476_v6 }
 0x24b   : > { %v3478_v9 = vpop.f32.mrf.mxu0 }
 0x24c   : > { %v3524_v11 = vadd.f32 %v3518_v7, %v3192_v25  ;;  %v3520_v12 = vadd.f32 %v3519_v29, %v3478_v9 }
 0x24d   : > { %v3480_v14 = vpop.f32.mrf.mxu0 }
 0x24e   : > { %v3538_v16 = vadd.f32 %v3531_v8, %v3524_v11  ;;  %v3525_v17 = vadd.f32 %v3520_v12, %v3193_v56 }
 0x24f   : > { %v3481_v18 = vpop.f32.mrf.mxu0 }
 0x250   : > { %v3539_v20 = vadd.f32 %v3535_v13, %v3525_v17  ;;  %v3542_v21 = vmul.f32 0.01, %v3538_v16  ;;  %vm3540_vm2 = vcmp.ge.f32.partialorder %v3538_v16, 0.0 }
 0x252   : > { %vm3541_vm1 = vcmp.ge.f32.partialorder %v3539_v20, 0.0  ;;  %v3543_v22 = vmul.f32 0.01, %v3539_v20  ;;  %v3544_v24 = vsel %vm3540_vm2, %v3538_v16, %v3542_v21 }
 0x254   : > { %v3545_v23 = vsel %vm3541_vm1, %v3539_v20, %v3543_v22 }
 0x255   : > { %3649 = vmatprep.mubr.f32.mxu1 %v3545_v23 }
 0x256   : > { %3650 = vmatmul.mubr.f32.vlgmr.msra.gmra.mxu1 %v3544_v24 }
 0x316   : > { %v4300_v2 = vpop.f32.mrf.mxu1 }
 0x318   : > { %v4301_v28 = vpop.f32.mrf.mxu1 }
 0x319   : > { %v4302_v30 = vadd.f32 %v4301_v28, %v4300_v2 }
 0x31b   : > { %v3652_v31 = vadd.f32 %v4302_v30, %v4260_v27 }
 0x31d   : > { %3656 = vst.msk [vmem:[%s434_s13] sm:$0xff] %vm3655_vm3, %v3652_v31  ;;  %3658 = vrot.lane.b32.xlu0 %v3652_v31, %s5037_s22  ;;  %s4941_s13 = scalar_lea.vmem %s3700_s24, 256  ;;  %s4947_s22 = scalar_lea.vmem %s4946_s9, 512 }
 0x31e   : > { %p4942_p4 = scmp.ne.s32.totalorder %s3700_s24, %s4941_s13  ;;  %p4949_p9 = scmp.lt.s32.totalorder %s4947_s22, %s4941_s13 }
 0x320   : > { %p4943_p5 = pnand %p4942_p4, %p5136_p3  ;;  %p4950_p10 = por %p4949_p9, %p4948_p7 }
 0x322   : > { %p4944_p6 = pneg %p4943_p5 }
 0x324   : > { %p4951_p11 = pnand %p4950_p10, %p4944_p6 }
 0x38f   : > { %v3659_v15 = vpop.permute.xlu0 %3658 }
 0x390   : > { %vm3661_vm4 = vcmp.gt.f32.partialorder %v3652_v31, %v3659_v15 }
 0x391   : > { %v4261_v33 = vsel %vm3661_vm4, 1.0, %v5038_v32 }
 0x392   : > { %v3664_v34 = vadd.f32 1.0, %v4261_v33 }
 0x394   : > { %3667 = vperm.xlu0 %4382, %v3664_v34  }
 0x40f   : > { %v3668_v35 = vpop.permute.xlu0 %3667 }
 0x410   : > { %v3670_v36 = vmul.f32 %v3668_v35, %v3544_v24  ;;  %v3671_v50 = vmul.f32 %v3668_v35, %v3545_v23 }
 0x412   : > { %3672 = vst [vmem:[%s385_s14] sm:$0xff] %v3670_v36  ;;  %3673 = vst [vmem:[%s385_s14 + $0x8] sm:$0xff] %v3671_v50 }
 0x413   : > { %4954 = shalt.err (!%p4951_p11)
}
 0x414   : > { %s4955_s25 = scalar_lea.hbm %s6515_s21, 256  ;;  %s4959_s23 = scalar_lea.hbm %s6568_s7, 4096 }
 0x415   : > { %p4956_p12 = scmp.ne.s32.totalorder %s6515_s21, %s4955_s25  ;;  %p4960_p1 = scmp.lt.s32.totalorder %s6515_s21, %s6568_s7 }
 0x416   : > { %p4961_p2 = scmp.lt.s32.totalorder %s4959_s23, %s4955_s25 }
 0x417   : > { %p4957_p13 = pnand %p4956_p12, %p5136_p3 }
 0x418   : > { %p4962_p4 = por %p4961_p2, %p4960_p1 }
 0x419   : > { %p4958_p0 = pneg %p4957_p13 }
 0x41b   : > { %p4963_p5 = pnand %p4962_p4, %p4958_p0 }
 0x41d   : > { %4966 = shalt.err (!%p4963_p5)
}
 0x41e   : > { %4307 = dma.vmem_to_hbm [thread:$0]  (%p5136_p3), %s3700_s24, 256, %s6515_s21, %s3675_s16  }
 0x41f PF: > { %p4313_p6 = scmp.ge.s32.totalorder %s5033_s12, 2  ;;  %s3714_s14 = sand.u32 1, %s5005_s27  }
 0x420   : > { %s3715_s15 = scalar_lea.sflag [#allocation3], %s3714_s14 }
 0x421   : > { %p4310_p7 = pnand %p4313_p6, %p5145_p8 }
 0x423   : > { %p4311_p9 = pneg %p4310_p7 }
 0x425   : > { %5000 = dma.done.wait (%p4311_p9), %s3715_s15, 256  }
 0x426   : > { %5002 = vsyncadd (%p4311_p9), %s3715_s15, 4294967040  ;;  %s22_s12 = sadd.s32 1, %s5033_s12   ;;  %s6581_s18 = sld [smem:[#allocation9_spill]] }
 0x427   : > { %p19_p10 = scmp.ge.s32.totalorder %s22_s12, 18   ;;  %s6582_s30 = sld [smem:[#allocation5_spill]] }
 0x428   : > { %s6583_s9 = sld [smem:[#allocation6_spill]]  ;;  %s6586_s27 = smov %s5009_s28 }
 0x429   : > { %s6584_s10 = sld [smem:[#allocation7_spill]]  ;;  %s6587_s28 = smov %s5013_s29 }
 0x42a   : > { %s6585_s11 = sld [smem:[#allocation8_spill]]  ;;  %21 = sbr.rel (!%p19_p10) target bundleno = 5 (0x5), region = 101 }
 0x42c   : > { %s6588_s29 = smov %s6581_s18 }
 0x42f   :  { %3731 = vsyncpa [#allocation3], 1 }
 0x430   :  { %3733 = vsyncpa [#allocation3 + $0x1], 1 }

</bundles_post_ra>
